<compile_context>
chip_gen: v5e
topology: v5e:2x2
jax: 0.10.0
libtpu: 0.0.40
codegen_flags: <defaults>
</compile_context>

<pallas_src>
import numpy as np
import jax
import jax.numpy as jnp
from jax import lax
from jax.experimental import pallas as pl
from jax.experimental.pallas import tpu as pltpu

# ---- problem sizes (from the module) ----
N_NODES = 3    # graph nodes
F_IN = 2       # num_node_features
HID = 5        # hidden width of conv1

# ---- padded sizes for TPU tiling ----
NP = 8         # padded node count   (sublane multiple)
LANES = 128    # padded feature dim  (lane multiple); used for both F and HID
B_ROW = NP - 1 # spare row inside each weight tile that carries the bias

NSTEPS = 8     # fixed RK4 steps integrating t in [0, 1]


def _tree_sum(terms):
    """Balanced-tree add: shortens the dependent-op chain vs a serial fold."""
    terms = list(terms)
    while len(terms) > 1:
        nxt = [terms[i] + terms[i + 1] for i in range(0, len(terms) - 1, 2)]
        if len(terms) % 2:
            nxt.append(terms[-1])
        terms = nxt
    return terms[0]


def gnode_kernel(x_ref, params_ref, out_ref):
    # Packed constants: rows [0:8) adj, [8:16) W1 (+b1 in row 15),
    #                   rows [16:24) W2 (+b2 in row 23).
    adj = params_ref[0:NP, :]                 # only [:3, :3] nonzero
    w1 = params_ref[NP:2 * NP, :]             # rows 0..1, cols 0..4 real
    w2 = params_ref[2 * NP:3 * NP, :]         # rows 0..4, cols 0..1 real

    # ---- hoisted, loop-invariant broadcasts (not CSE'd if left in the loop) ----
    adj_cb = [jnp.broadcast_to(adj[:, s:s + 1], (NP, LANES)) for s in range(N_NODES)]
    w1_rb = [jnp.broadcast_to(w1[j:j + 1, :], (NP, LANES)) for j in range(F_IN)]
    w2_rb = [jnp.broadcast_to(w2[c:c + 1, :], (NP, LANES)) for c in range(HID)]
    b1f = jnp.broadcast_to(w1[B_ROW:B_ROW + 1, :], (NP, LANES))
    b2f = jnp.broadcast_to(w2[B_ROW:B_ROW + 1, :], (NP, LANES))

    def aggregate(h, bias):
        # Ahat @ h + bias, as 3 sublane-broadcast FMAs with the bias folded
        # into the accumulator init and a tree reduction (depth 2, not 4).
        return _tree_sum([bias] + [adj_cb[s] * h[s:s + 1, :] for s in range(N_NODES)])

    def ode_func(x):
        # conv1: Ahat @ (x @ W1) + b1, then ReLU  -- all on the VPU.
        xw = _tree_sum([x[:, j:j + 1] * w1_rb[j] for j in range(F_IN)])
        h = jnp.maximum(aggregate(xw, b1f), 0.0)
        # conv2: Ahat @ (h @ W2) + b2
        hw = _tree_sum([h[:, c:c + 1] * w2_rb[c] for c in range(HID)])
        return aggregate(hw, b2f)

    dt = 1.0 / NSTEPS
    half_dt = jnp.float32(0.5 * dt)
    dt_f = jnp.float32(dt)
    dt6 = jnp.float32(dt / 6.0)

    def rk4_step(_, x):
        k1 = ode_func(x)
        k2 = ode_func(x + half_dt * k1)
        k3 = ode_func(x + half_dt * k2)
        k4 = ode_func(x + dt_f * k3)
        return x + dt6 * ((k1 + k4) + 2.0 * (k2 + k3))

    # Short fixed trip count, fully unrolled for LLO scheduler visibility.
    out_ref[...] = lax.fori_loop(0, NSTEPS, rk4_step, x_ref[...], unroll=True)


# --------------------------- host-side (one-time) ---------------------------

def build_normalized_adjacency_np(edge_index, num_nodes):
    """Dense Ahat = D^-1/2 (A + I) D^-1/2 (GCNConv's default normalization)."""
    ei = np.asarray(edge_index)
    src, dst = ei[0], ei[1]
    adj = np.zeros((num_nodes, num_nodes), np.float32)
    np.add.at(adj, (dst, src), 1.0)                       # message src -> dst
    adj += np.eye(num_nodes, dtype=np.float32)            # self loops
    deg = adj.sum(axis=1)
    dinv = np.where(deg > 0, 1.0 / np.sqrt(deg), 0.0).astype(np.float32)
    return dinv[:, None] * adj * dinv[None, :]


def pack_params(edge_index, w1, b1, w2, b2):
    """Pack adjacency + weights + biases into a single (24, 128) VMEM tile."""
    adj = build_normalized_adjacency_np(edge_index, N_NODES)
    p = np.zeros((3 * NP, LANES), np.float32)
    p[0:N_NODES, 0:N_NODES] = adj
    p[NP:NP + F_IN, 0:HID] = np.asarray(w1, np.float32)
    p[NP + B_ROW, 0:HID] = np.asarray(b1, np.float32)
    p[2 * NP:2 * NP + HID, 0:F_IN] = np.asarray(w2, np.float32)
    p[2 * NP + B_ROW, 0:F_IN] = np.asarray(b2, np.float32)
    return jnp.asarray(p)


def glorot(key, shape):
    fan_in, fan_out = shape
    limit = jnp.sqrt(6.0 / (fan_in + fan_out))
    return jax.random.uniform(key, shape, jnp.float32, -limit, limit)


# ------------------------------ per-call path -------------------------------

@jax.jit
def gnode_forward(x, params_packed):
    x_p = jnp.zeros((NP, LANES), jnp.float32).at[:N_NODES, :F_IN].set(
        x.astype(jnp.float32))
    vmem = pltpu.MemorySpace.VMEM
    out_p = pl.pallas_call(
        gnode_kernel,
        out_shape=jax.ShapeDtypeStruct((NP, LANES), jnp.float32),
        in_specs=[pl.BlockSpec(memory_space=vmem),
                  pl.BlockSpec(memory_space=vmem)],
        out_specs=pl.BlockSpec(memory_space=vmem),
        cost_estimate=pl.CostEstimate(
            flops=1_000_000, transcendentals=0, bytes_accessed=20_480),
    )(x_p, params_packed)
    return out_p[:N_NODES, :F_IN]


if __name__ == "__main__":
    key = jax.random.PRNGKey(0)
    k1, k2 = jax.random.split(key)

    # Deterministic parameter init (GCNConv: glorot weights, zero bias).
    w1 = glorot(k1, (F_IN, HID))
    b1 = jnp.zeros((HID,), jnp.float32)
    w2 = glorot(k2, (HID, F_IN))
    b2 = jnp.zeros((F_IN,), jnp.float32)

    # Inputs exactly as in the module.
    x = jnp.array([[3.0, 2.0], [4.0, 3.0], [5.0, 1.0]], jnp.float32)
    edge_index = np.array([[0, 1, 1, 2], [1, 0, 2, 1]], np.int64)

    # One-time constant packing (adjacency build + padding), reused per call.
    params_packed = pack_params(edge_index,
                                np.asarray(w1), np.asarray(b1),
                                np.asarray(w2), np.asarray(b2))

    out = gnode_forward(x, params_packed)
    jax.block_until_ready(out)
    assert out.shape == (N_NODES, F_IN)
    print("KERNEL_OK")
</pallas_src>

<mosaic_0001>
module attributes {stable_mosaic.version = 11 : i64} {
  func.func @gnode_kernel(%arg0: memref<8x128xf32, #tpu.memory_space<vmem>>, %arg1: memref<24x128xf32, #tpu.memory_space<vmem>>, %arg2: memref<8x128xf32, #tpu.memory_space<vmem>>) attributes {dimension_semantics = [], scalar_prefetch = 0 : i64, scratch_operands = 0 : i64, tpu.core_type = #tpu.core_type<tc>} {
    %c0 = arith.constant 0 : index
    %c0_0 = arith.constant 0 : index
    %0 = vector.load %arg1[%c0, %c0_0] : memref<24x128xf32, #tpu.memory_space<vmem>>, vector<8x128xf32>
    %c8 = arith.constant 8 : index
    %c0_1 = arith.constant 0 : index
    %1 = vector.load %arg1[%c8, %c0_1] : memref<24x128xf32, #tpu.memory_space<vmem>>, vector<8x128xf32>
    %c16 = arith.constant 16 : index
    %c0_2 = arith.constant 0 : index
    %2 = vector.load %arg1[%c16, %c0_2] : memref<24x128xf32, #tpu.memory_space<vmem>>, vector<8x128xf32>
    %3 = vector.extract_strided_slice %0 {offsets = [0, 0], sizes = [8, 1], strides = [1, 1]} : vector<8x128xf32> to vector<8x1xf32>
    %4 = vector.shape_cast %3 : vector<8x1xf32> to vector<8x1xf32>
    %5 = vector.broadcast %4 : vector<8x1xf32> to vector<8x128xf32>
    %6 = vector.extract_strided_slice %0 {offsets = [0, 1], sizes = [8, 1], strides = [1, 1]} : vector<8x128xf32> to vector<8x1xf32>
    %7 = vector.shape_cast %6 : vector<8x1xf32> to vector<8x1xf32>
    %8 = vector.broadcast %7 : vector<8x1xf32> to vector<8x128xf32>
    %9 = vector.extract_strided_slice %0 {offsets = [0, 2], sizes = [8, 1], strides = [1, 1]} : vector<8x128xf32> to vector<8x1xf32>
    %10 = vector.shape_cast %9 : vector<8x1xf32> to vector<8x1xf32>
    %11 = vector.broadcast %10 : vector<8x1xf32> to vector<8x128xf32>
    %12 = vector.extract_strided_slice %1 {offsets = [0, 0], sizes = [1, 128], strides = [1, 1]} : vector<8x128xf32> to vector<1x128xf32>
    %13 = vector.shape_cast %12 : vector<1x128xf32> to vector<1x128xf32>
    %14 = vector.broadcast %13 : vector<1x128xf32> to vector<8x128xf32>
    %15 = vector.extract_strided_slice %1 {offsets = [1, 0], sizes = [1, 128], strides = [1, 1]} : vector<8x128xf32> to vector<1x128xf32>
    %16 = vector.shape_cast %15 : vector<1x128xf32> to vector<1x128xf32>
    %17 = vector.broadcast %16 : vector<1x128xf32> to vector<8x128xf32>
    %18 = vector.extract_strided_slice %2 {offsets = [0, 0], sizes = [1, 128], strides = [1, 1]} : vector<8x128xf32> to vector<1x128xf32>
    %19 = vector.shape_cast %18 : vector<1x128xf32> to vector<1x128xf32>
    %20 = vector.broadcast %19 : vector<1x128xf32> to vector<8x128xf32>
    %21 = vector.extract_strided_slice %2 {offsets = [1, 0], sizes = [1, 128], strides = [1, 1]} : vector<8x128xf32> to vector<1x128xf32>
    %22 = vector.shape_cast %21 : vector<1x128xf32> to vector<1x128xf32>
    %23 = vector.broadcast %22 : vector<1x128xf32> to vector<8x128xf32>
    %24 = vector.extract_strided_slice %2 {offsets = [2, 0], sizes = [1, 128], strides = [1, 1]} : vector<8x128xf32> to vector<1x128xf32>
    %25 = vector.shape_cast %24 : vector<1x128xf32> to vector<1x128xf32>
    %26 = vector.broadcast %25 : vector<1x128xf32> to vector<8x128xf32>
    %27 = vector.extract_strided_slice %2 {offsets = [3, 0], sizes = [1, 128], strides = [1, 1]} : vector<8x128xf32> to vector<1x128xf32>
    %28 = vector.shape_cast %27 : vector<1x128xf32> to vector<1x128xf32>
    %29 = vector.broadcast %28 : vector<1x128xf32> to vector<8x128xf32>
    %30 = vector.extract_strided_slice %2 {offsets = [4, 0], sizes = [1, 128], strides = [1, 1]} : vector<8x128xf32> to vector<1x128xf32>
    %31 = vector.shape_cast %30 : vector<1x128xf32> to vector<1x128xf32>
    %32 = vector.broadcast %31 : vector<1x128xf32> to vector<8x128xf32>
    %33 = vector.extract_strided_slice %1 {offsets = [7, 0], sizes = [1, 128], strides = [1, 1]} : vector<8x128xf32> to vector<1x128xf32>
    %34 = vector.shape_cast %33 : vector<1x128xf32> to vector<1x128xf32>
    %35 = vector.broadcast %34 : vector<1x128xf32> to vector<8x128xf32>
    %36 = vector.extract_strided_slice %2 {offsets = [7, 0], sizes = [1, 128], strides = [1, 1]} : vector<8x128xf32> to vector<1x128xf32>
    %37 = vector.shape_cast %36 : vector<1x128xf32> to vector<1x128xf32>
    %38 = vector.broadcast %37 : vector<1x128xf32> to vector<8x128xf32>
    %c0_3 = arith.constant 0 : index
    %c0_4 = arith.constant 0 : index
    %39 = vector.load %arg0[%c0_3, %c0_4] : memref<8x128xf32, #tpu.memory_space<vmem>>, vector<8x128xf32>
    %cst = arith.constant 6.250000e-02 : f32
    %cst_5 = arith.constant 1.250000e-01 : f32
    %cst_6 = arith.constant 0.020833334 : f32
    %c0_i32 = arith.constant 0 : i32
    %40 = vector.extract_strided_slice %39 {offsets = [0, 0], sizes = [8, 1], strides = [1, 1]} : vector<8x128xf32> to vector<8x1xf32>
    %41 = vector.broadcast %40 : vector<8x1xf32> to vector<8x128xf32>
    %42 = arith.mulf %41, %14 : vector<8x128xf32>
    %43 = vector.extract_strided_slice %39 {offsets = [0, 1], sizes = [8, 1], strides = [1, 1]} : vector<8x128xf32> to vector<8x1xf32>
    %44 = vector.broadcast %43 : vector<8x1xf32> to vector<8x128xf32>
    %45 = arith.mulf %44, %17 : vector<8x128xf32>
    %46 = arith.addf %42, %45 : vector<8x128xf32>
    %47 = vector.extract_strided_slice %46 {offsets = [0, 0], sizes = [1, 128], strides = [1, 1]} : vector<8x128xf32> to vector<1x128xf32>
    %48 = vector.broadcast %47 : vector<1x128xf32> to vector<8x128xf32>
    %49 = arith.mulf %5, %48 : vector<8x128xf32>
    %50 = vector.extract_strided_slice %46 {offsets = [1, 0], sizes = [1, 128], strides = [1, 1]} : vector<8x128xf32> to vector<1x128xf32>
    %51 = vector.broadcast %50 : vector<1x128xf32> to vector<8x128xf32>
    %52 = arith.mulf %8, %51 : vector<8x128xf32>
    %53 = vector.extract_strided_slice %46 {offsets = [2, 0], sizes = [1, 128], strides = [1, 1]} : vector<8x128xf32> to vector<1x128xf32>
    %54 = vector.broadcast %53 : vector<1x128xf32> to vector<8x128xf32>
    %55 = arith.mulf %11, %54 : vector<8x128xf32>
    %56 = arith.addf %35, %49 : vector<8x128xf32>
    %57 = arith.addf %52, %55 : vector<8x128xf32>
    %58 = arith.addf %56, %57 : vector<8x128xf32>
    %cst_7 = arith.constant 0.000000e+00 : f32
    %59 = vector.broadcast %cst_7 : f32 to vector<8x128xf32>
    %60 = arith.maximumf %58, %59 : vector<8x128xf32>
    %61 = vector.extract_strided_slice %60 {offsets = [0, 0], sizes = [8, 1], strides = [1, 1]} : vector<8x128xf32> to vector<8x1xf32>
    %62 = vector.broadcast %61 : vector<8x1xf32> to vector<8x128xf32>
    %63 = arith.mulf %62, %20 : vector<8x128xf32>
    %64 = vector.extract_strided_slice %60 {offsets = [0, 1], sizes = [8, 1], strides = [1, 1]} : vector<8x128xf32> to vector<8x1xf32>
    %65 = vector.broadcast %64 : vector<8x1xf32> to vector<8x128xf32>
    %66 = arith.mulf %65, %23 : vector<8x128xf32>
    %67 = vector.extract_strided_slice %60 {offsets = [0, 2], sizes = [8, 1], strides = [1, 1]} : vector<8x128xf32> to vector<8x1xf32>
    %68 = vector.broadcast %67 : vector<8x1xf32> to vector<8x128xf32>
    %69 = arith.mulf %68, %26 : vector<8x128xf32>
    %70 = vector.extract_strided_slice %60 {offsets = [0, 3], sizes = [8, 1], strides = [1, 1]} : vector<8x128xf32> to vector<8x1xf32>
    %71 = vector.broadcast %70 : vector<8x1xf32> to vector<8x128xf32>
    %72 = arith.mulf %71, %29 : vector<8x128xf32>
    %73 = vector.extract_strided_slice %60 {offsets = [0, 4], sizes = [8, 1], strides = [1, 1]} : vector<8x128xf32> to vector<8x1xf32>
    %74 = vector.broadcast %73 : vector<8x1xf32> to vector<8x128xf32>
    %75 = arith.mulf %74, %32 : vector<8x128xf32>
    %76 = arith.addf %63, %66 : vector<8x128xf32>
    %77 = arith.addf %69, %72 : vector<8x128xf32>
    %78 = arith.addf %76, %77 : vector<8x128xf32>
    %79 = arith.addf %78, %75 : vector<8x128xf32>
    %80 = vector.extract_strided_slice %79 {offsets = [0, 0], sizes = [1, 128], strides = [1, 1]} : vector<8x128xf32> to vector<1x128xf32>
    %81 = vector.broadcast %80 : vector<1x128xf32> to vector<8x128xf32>
    %82 = arith.mulf %5, %81 : vector<8x128xf32>
    %83 = vector.extract_strided_slice %79 {offsets = [1, 0], sizes = [1, 128], strides = [1, 1]} : vector<8x128xf32> to vector<1x128xf32>
    %84 = vector.broadcast %83 : vector<1x128xf32> to vector<8x128xf32>
    %85 = arith.mulf %8, %84 : vector<8x128xf32>
    %86 = vector.extract_strided_slice %79 {offsets = [2, 0], sizes = [1, 128], strides = [1, 1]} : vector<8x128xf32> to vector<1x128xf32>
    %87 = vector.broadcast %86 : vector<1x128xf32> to vector<8x128xf32>
    %88 = arith.mulf %11, %87 : vector<8x128xf32>
    %89 = arith.addf %38, %82 : vector<8x128xf32>
    %90 = arith.addf %85, %88 : vector<8x128xf32>
    %91 = arith.addf %89, %90 : vector<8x128xf32>
    %92 = vector.broadcast %cst : f32 to vector<8x128xf32>
    %93 = arith.mulf %92, %91 : vector<8x128xf32>
    %94 = arith.addf %39, %93 : vector<8x128xf32>
    %95 = vector.extract_strided_slice %94 {offsets = [0, 0], sizes = [8, 1], strides = [1, 1]} : vector<8x128xf32> to vector<8x1xf32>
    %96 = vector.broadcast %95 : vector<8x1xf32> to vector<8x128xf32>
    %97 = arith.mulf %96, %14 : vector<8x128xf32>
    %98 = vector.extract_strided_slice %94 {offsets = [0, 1], sizes = [8, 1], strides = [1, 1]} : vector<8x128xf32> to vector<8x1xf32>
    %99 = vector.broadcast %98 : vector<8x1xf32> to vector<8x128xf32>
    %100 = arith.mulf %99, %17 : vector<8x128xf32>
    %101 = arith.addf %97, %100 : vector<8x128xf32>
    %102 = vector.extract_strided_slice %101 {offsets = [0, 0], sizes = [1, 128], strides = [1, 1]} : vector<8x128xf32> to vector<1x128xf32>
    %103 = vector.broadcast %102 : vector<1x128xf32> to vector<8x128xf32>
    %104 = arith.mulf %5, %103 : vector<8x128xf32>
    %105 = vector.extract_strided_slice %101 {offsets = [1, 0], sizes = [1, 128], strides = [1, 1]} : vector<8x128xf32> to vector<1x128xf32>
    %106 = vector.broadcast %105 : vector<1x128xf32> to vector<8x128xf32>
    %107 = arith.mulf %8, %106 : vector<8x128xf32>
    %108 = vector.extract_strided_slice %101 {offsets = [2, 0], sizes = [1, 128], strides = [1, 1]} : vector<8x128xf32> to vector<1x128xf32>
    %109 = vector.broadcast %108 : vector<1x128xf32> to vector<8x128xf32>
    %110 = arith.mulf %11, %109 : vector<8x128xf32>
    %111 = arith.addf %35, %104 : vector<8x128xf32>
    %112 = arith.addf %107, %110 : vector<8x128xf32>
    %113 = arith.addf %111, %112 : vector<8x128xf32>
    %cst_8 = arith.constant 0.000000e+00 : f32
    %114 = vector.broadcast %cst_8 : f32 to vector<8x128xf32>
    %115 = arith.maximumf %113, %114 : vector<8x128xf32>
    %116 = vector.extract_strided_slice %115 {offsets = [0, 0], sizes = [8, 1], strides = [1, 1]} : vector<8x128xf32> to vector<8x1xf32>
    %117 = vector.broadcast %116 : vector<8x1xf32> to vector<8x128xf32>
    %118 = arith.mulf %117, %20 : vector<8x128xf32>
    %119 = vector.extract_strided_slice %115 {offsets = [0, 1], sizes = [8, 1], strides = [1, 1]} : vector<8x128xf32> to vector<8x1xf32>
    %120 = vector.broadcast %119 : vector<8x1xf32> to vector<8x128xf32>
    %121 = arith.mulf %120, %23 : vector<8x128xf32>
    %122 = vector.extract_strided_slice %115 {offsets = [0, 2], sizes = [8, 1], strides = [1, 1]} : vector<8x128xf32> to vector<8x1xf32>
    %123 = vector.broadcast %122 : vector<8x1xf32> to vector<8x128xf32>
    %124 = arith.mulf %123, %26 : vector<8x128xf32>
    %125 = vector.extract_strided_slice %115 {offsets = [0, 3], sizes = [8, 1], strides = [1, 1]} : vector<8x128xf32> to vector<8x1xf32>
    %126 = vector.broadcast %125 : vector<8x1xf32> to vector<8x128xf32>
    %127 = arith.mulf %126, %29 : vector<8x128xf32>
    %128 = vector.extract_strided_slice %115 {offsets = [0, 4], sizes = [8, 1], strides = [1, 1]} : vector<8x128xf32> to vector<8x1xf32>
    %129 = vector.broadcast %128 : vector<8x1xf32> to vector<8x128xf32>
    %130 = arith.mulf %129, %32 : vector<8x128xf32>
    %131 = arith.addf %118, %121 : vector<8x128xf32>
    %132 = arith.addf %124, %127 : vector<8x128xf32>
    %133 = arith.addf %131, %132 : vector<8x128xf32>
    %134 = arith.addf %133, %130 : vector<8x128xf32>
    %135 = vector.extract_strided_slice %134 {offsets = [0, 0], sizes = [1, 128], strides = [1, 1]} : vector<8x128xf32> to vector<1x128xf32>
    %136 = vector.broadcast %135 : vector<1x128xf32> to vector<8x128xf32>
    %137 = arith.mulf %5, %136 : vector<8x128xf32>
    %138 = vector.extract_strided_slice %134 {offsets = [1, 0], sizes = [1, 128], strides = [1, 1]} : vector<8x128xf32> to vector<1x128xf32>
    %139 = vector.broadcast %138 : vector<1x128xf32> to vector<8x128xf32>
    %140 = arith.mulf %8, %139 : vector<8x128xf32>
    %141 = vector.extract_strided_slice %134 {offsets = [2, 0], sizes = [1, 128], strides = [1, 1]} : vector<8x128xf32> to vector<1x128xf32>
    %142 = vector.broadcast %141 : vector<1x128xf32> to vector<8x128xf32>
    %143 = arith.mulf %11, %142 : vector<8x128xf32>
    %144 = arith.addf %38, %137 : vector<8x128xf32>
    %145 = arith.addf %140, %143 : vector<8x128xf32>
    %146 = arith.addf %144, %145 : vector<8x128xf32>
    %147 = vector.broadcast %cst : f32 to vector<8x128xf32>
    %148 = arith.mulf %147, %146 : vector<8x128xf32>
    %149 = arith.addf %39, %148 : vector<8x128xf32>
    %150 = vector.extract_strided_slice %149 {offsets = [0, 0], sizes = [8, 1], strides = [1, 1]} : vector<8x128xf32> to vector<8x1xf32>
    %151 = vector.broadcast %150 : vector<8x1xf32> to vector<8x128xf32>
    %152 = arith.mulf %151, %14 : vector<8x128xf32>
    %153 = vector.extract_strided_slice %149 {offsets = [0, 1], sizes = [8, 1], strides = [1, 1]} : vector<8x128xf32> to vector<8x1xf32>
    %154 = vector.broadcast %153 : vector<8x1xf32> to vector<8x128xf32>
    %155 = arith.mulf %154, %17 : vector<8x128xf32>
    %156 = arith.addf %152, %155 : vector<8x128xf32>
    %157 = vector.extract_strided_slice %156 {offsets = [0, 0], sizes = [1, 128], strides = [1, 1]} : vector<8x128xf32> to vector<1x128xf32>
    %158 = vector.broadcast %157 : vector<1x128xf32> to vector<8x128xf32>
    %159 = arith.mulf %5, %158 : vector<8x128xf32>
    %160 = vector.extract_strided_slice %156 {offsets = [1, 0], sizes = [1, 128], strides = [1, 1]} : vector<8x128xf32> to vector<1x128xf32>
    %161 = vector.broadcast %160 : vector<1x128xf32> to vector<8x128xf32>
    %162 = arith.mulf %8, %161 : vector<8x128xf32>
    %163 = vector.extract_strided_slice %156 {offsets = [2, 0], sizes = [1, 128], strides = [1, 1]} : vector<8x128xf32> to vector<1x128xf32>
    %164 = vector.broadcast %163 : vector<1x128xf32> to vector<8x128xf32>
    %165 = arith.mulf %11, %164 : vector<8x128xf32>
    %166 = arith.addf %35, %159 : vector<8x128xf32>
    %167 = arith.addf %162, %165 : vector<8x128xf32>
    %168 = arith.addf %166, %167 : vector<8x128xf32>
    %cst_9 = arith.constant 0.000000e+00 : f32
    %169 = vector.broadcast %cst_9 : f32 to vector<8x128xf32>
    %170 = arith.maximumf %168, %169 : vector<8x128xf32>
    %171 = vector.extract_strided_slice %170 {offsets = [0, 0], sizes = [8, 1], strides = [1, 1]} : vector<8x128xf32> to vector<8x1xf32>
    %172 = vector.broadcast %171 : vector<8x1xf32> to vector<8x128xf32>
    %173 = arith.mulf %172, %20 : vector<8x128xf32>
    %174 = vector.extract_strided_slice %170 {offsets = [0, 1], sizes = [8, 1], strides = [1, 1]} : vector<8x128xf32> to vector<8x1xf32>
    %175 = vector.broadcast %174 : vector<8x1xf32> to vector<8x128xf32>
    %176 = arith.mulf %175, %23 : vector<8x128xf32>
    %177 = vector.extract_strided_slice %170 {offsets = [0, 2], sizes = [8, 1], strides = [1, 1]} : vector<8x128xf32> to vector<8x1xf32>
    %178 = vector.broadcast %177 : vector<8x1xf32> to vector<8x128xf32>
    %179 = arith.mulf %178, %26 : vector<8x128xf32>
    %180 = vector.extract_strided_slice %170 {offsets = [0, 3], sizes = [8, 1], strides = [1, 1]} : vector<8x128xf32> to vector<8x1xf32>
    %181 = vector.broadcast %180 : vector<8x1xf32> to vector<8x128xf32>
    %182 = arith.mulf %181, %29 : vector<8x128xf32>
    %183 = vector.extract_strided_slice %170 {offsets = [0, 4], sizes = [8, 1], strides = [1, 1]} : vector<8x128xf32> to vector<8x1xf32>
    %184 = vector.broadcast %183 : vector<8x1xf32> to vector<8x128xf32>
    %185 = arith.mulf %184, %32 : vector<8x128xf32>
    %186 = arith.addf %173, %176 : vector<8x128xf32>
    %187 = arith.addf %179, %182 : vector<8x128xf32>
    %188 = arith.addf %186, %187 : vector<8x128xf32>
    %189 = arith.addf %188, %185 : vector<8x128xf32>
    %190 = vector.extract_strided_slice %189 {offsets = [0, 0], sizes = [1, 128], strides = [1, 1]} : vector<8x128xf32> to vector<1x128xf32>
    %191 = vector.broadcast %190 : vector<1x128xf32> to vector<8x128xf32>
    %192 = arith.mulf %5, %191 : vector<8x128xf32>
    %193 = vector.extract_strided_slice %189 {offsets = [1, 0], sizes = [1, 128], strides = [1, 1]} : vector<8x128xf32> to vector<1x128xf32>
    %194 = vector.broadcast %193 : vector<1x128xf32> to vector<8x128xf32>
    %195 = arith.mulf %8, %194 : vector<8x128xf32>
    %196 = vector.extract_strided_slice %189 {offsets = [2, 0], sizes = [1, 128], strides = [1, 1]} : vector<8x128xf32> to vector<1x128xf32>
    %197 = vector.broadcast %196 : vector<1x128xf32> to vector<8x128xf32>
    %198 = arith.mulf %11, %197 : vector<8x128xf32>
    %199 = arith.addf %38, %192 : vector<8x128xf32>
    %200 = arith.addf %195, %198 : vector<8x128xf32>
    %201 = arith.addf %199, %200 : vector<8x128xf32>
    %202 = vector.broadcast %cst_5 : f32 to vector<8x128xf32>
    %203 = arith.mulf %202, %201 : vector<8x128xf32>
    %204 = arith.addf %39, %203 : vector<8x128xf32>
    %205 = vector.extract_strided_slice %204 {offsets = [0, 0], sizes = [8, 1], strides = [1, 1]} : vector<8x128xf32> to vector<8x1xf32>
    %206 = vector.broadcast %205 : vector<8x1xf32> to vector<8x128xf32>
    %207 = arith.mulf %206, %14 : vector<8x128xf32>
    %208 = vector.extract_strided_slice %204 {offsets = [0, 1], sizes = [8, 1], strides = [1, 1]} : vector<8x128xf32> to vector<8x1xf32>
    %209 = vector.broadcast %208 : vector<8x1xf32> to vector<8x128xf32>
    %210 = arith.mulf %209, %17 : vector<8x128xf32>
    %211 = arith.addf %207, %210 : vector<8x128xf32>
    %212 = vector.extract_strided_slice %211 {offsets = [0, 0], sizes = [1, 128], strides = [1, 1]} : vector<8x128xf32> to vector<1x128xf32>
    %213 = vector.broadcast %212 : vector<1x128xf32> to vector<8x128xf32>
    %214 = arith.mulf %5, %213 : vector<8x128xf32>
    %215 = vector.extract_strided_slice %211 {offsets = [1, 0], sizes = [1, 128], strides = [1, 1]} : vector<8x128xf32> to vector<1x128xf32>
    %216 = vector.broadcast %215 : vector<1x128xf32> to vector<8x128xf32>
    %217 = arith.mulf %8, %216 : vector<8x128xf32>
    %218 = vector.extract_strided_slice %211 {offsets = [2, 0], sizes = [1, 128], strides = [1, 1]} : vector<8x128xf32> to vector<1x128xf32>
    %219 = vector.broadcast %218 : vector<1x128xf32> to vector<8x128xf32>
    %220 = arith.mulf %11, %219 : vector<8x128xf32>
    %221 = arith.addf %35, %214 : vector<8x128xf32>
    %222 = arith.addf %217, %220 : vector<8x128xf32>
    %223 = arith.addf %221, %222 : vector<8x128xf32>
    %cst_10 = arith.constant 0.000000e+00 : f32
    %224 = vector.broadcast %cst_10 : f32 to vector<8x128xf32>
    %225 = arith.maximumf %223, %224 : vector<8x128xf32>
    %226 = vector.extract_strided_slice %225 {offsets = [0, 0], sizes = [8, 1], strides = [1, 1]} : vector<8x128xf32> to vector<8x1xf32>
    %227 = vector.broadcast %226 : vector<8x1xf32> to vector<8x128xf32>
    %228 = arith.mulf %227, %20 : vector<8x128xf32>
    %229 = vector.extract_strided_slice %225 {offsets = [0, 1], sizes = [8, 1], strides = [1, 1]} : vector<8x128xf32> to vector<8x1xf32>
    %230 = vector.broadcast %229 : vector<8x1xf32> to vector<8x128xf32>
    %231 = arith.mulf %230, %23 : vector<8x128xf32>
    %232 = vector.extract_strided_slice %225 {offsets = [0, 2], sizes = [8, 1], strides = [1, 1]} : vector<8x128xf32> to vector<8x1xf32>
    %233 = vector.broadcast %232 : vector<8x1xf32> to vector<8x128xf32>
    %234 = arith.mulf %233, %26 : vector<8x128xf32>
    %235 = vector.extract_strided_slice %225 {offsets = [0, 3], sizes = [8, 1], strides = [1, 1]} : vector<8x128xf32> to vector<8x1xf32>
    %236 = vector.broadcast %235 : vector<8x1xf32> to vector<8x128xf32>
    %237 = arith.mulf %236, %29 : vector<8x128xf32>
    %238 = vector.extract_strided_slice %225 {offsets = [0, 4], sizes = [8, 1], strides = [1, 1]} : vector<8x128xf32> to vector<8x1xf32>
    %239 = vector.broadcast %238 : vector<8x1xf32> to vector<8x128xf32>
    %240 = arith.mulf %239, %32 : vector<8x128xf32>
    %241 = arith.addf %228, %231 : vector<8x128xf32>
    %242 = arith.addf %234, %237 : vector<8x128xf32>
    %243 = arith.addf %241, %242 : vector<8x128xf32>
    %244 = arith.addf %243, %240 : vector<8x128xf32>
    %245 = vector.extract_strided_slice %244 {offsets = [0, 0], sizes = [1, 128], strides = [1, 1]} : vector<8x128xf32> to vector<1x128xf32>
    %246 = vector.broadcast %245 : vector<1x128xf32> to vector<8x128xf32>
    %247 = arith.mulf %5, %246 : vector<8x128xf32>
    %248 = vector.extract_strided_slice %244 {offsets = [1, 0], sizes = [1, 128], strides = [1, 1]} : vector<8x128xf32> to vector<1x128xf32>
    %249 = vector.broadcast %248 : vector<1x128xf32> to vector<8x128xf32>
    %250 = arith.mulf %8, %249 : vector<8x128xf32>
    %251 = vector.extract_strided_slice %244 {offsets = [2, 0], sizes = [1, 128], strides = [1, 1]} : vector<8x128xf32> to vector<1x128xf32>
    %252 = vector.broadcast %251 : vector<1x128xf32> to vector<8x128xf32>
    %253 = arith.mulf %11, %252 : vector<8x128xf32>
    %254 = arith.addf %38, %247 : vector<8x128xf32>
    %255 = arith.addf %250, %253 : vector<8x128xf32>
    %256 = arith.addf %254, %255 : vector<8x128xf32>
    %257 = arith.addf %91, %256 : vector<8x128xf32>
    %258 = arith.addf %146, %201 : vector<8x128xf32>
    %cst_11 = arith.constant 2.000000e+00 : f32
    %259 = vector.broadcast %cst_11 : f32 to vector<8x128xf32>
    %260 = arith.mulf %259, %258 : vector<8x128xf32>
    %261 = arith.addf %257, %260 : vector<8x128xf32>
    %262 = vector.broadcast %cst_6 : f32 to vector<8x128xf32>
    %263 = arith.mulf %262, %261 : vector<8x128xf32>
    %264 = arith.addf %39, %263 : vector<8x128xf32>
    %c1_i32 = arith.constant 1 : i32
    %265 = vector.extract_strided_slice %264 {offsets = [0, 0], sizes = [8, 1], strides = [1, 1]} : vector<8x128xf32> to vector<8x1xf32>
    %266 = vector.broadcast %265 : vector<8x1xf32> to vector<8x128xf32>
    %267 = arith.mulf %266, %14 : vector<8x128xf32>
    %268 = vector.extract_strided_slice %264 {offsets = [0, 1], sizes = [8, 1], strides = [1, 1]} : vector<8x128xf32> to vector<8x1xf32>
    %269 = vector.broadcast %268 : vector<8x1xf32> to vector<8x128xf32>
    %270 = arith.mulf %269, %17 : vector<8x128xf32>
    %271 = arith.addf %267, %270 : vector<8x128xf32>
    %272 = vector.extract_strided_slice %271 {offsets = [0, 0], sizes = [1, 128], strides = [1, 1]} : vector<8x128xf32> to vector<1x128xf32>
    %273 = vector.broadcast %272 : vector<1x128xf32> to vector<8x128xf32>
    %274 = arith.mulf %5, %273 : vector<8x128xf32>
    %275 = vector.extract_strided_slice %271 {offsets = [1, 0], sizes = [1, 128], strides = [1, 1]} : vector<8x128xf32> to vector<1x128xf32>
    %276 = vector.broadcast %275 : vector<1x128xf32> to vector<8x128xf32>
    %277 = arith.mulf %8, %276 : vector<8x128xf32>
    %278 = vector.extract_strided_slice %271 {offsets = [2, 0], sizes = [1, 128], strides = [1, 1]} : vector<8x128xf32> to vector<1x128xf32>
    %279 = vector.broadcast %278 : vector<1x128xf32> to vector<8x128xf32>
    %280 = arith.mulf %11, %279 : vector<8x128xf32>
    %281 = arith.addf %35, %274 : vector<8x128xf32>
    %282 = arith.addf %277, %280 : vector<8x128xf32>
    %283 = arith.addf %281, %282 : vector<8x128xf32>
    %cst_12 = arith.constant 0.000000e+00 : f32
    %284 = vector.broadcast %cst_12 : f32 to vector<8x128xf32>
    %285 = arith.maximumf %283, %284 : vector<8x128xf32>
    %286 = vector.extract_strided_slice %285 {offsets = [0, 0], sizes = [8, 1], strides = [1, 1]} : vector<8x128xf32> to vector<8x1xf32>
    %287 = vector.broadcast %286 : vector<8x1xf32> to vector<8x128xf32>
    %288 = arith.mulf %287, %20 : vector<8x128xf32>
    %289 = vector.extract_strided_slice %285 {offsets = [0, 1], sizes = [8, 1], strides = [1, 1]} : vector<8x128xf32> to vector<8x1xf32>
    %290 = vector.broadcast %289 : vector<8x1xf32> to vector<8x128xf32>
    %291 = arith.mulf %290, %23 : vector<8x128xf32>
    %292 = vector.extract_strided_slice %285 {offsets = [0, 2], sizes = [8, 1], strides = [1, 1]} : vector<8x128xf32> to vector<8x1xf32>
    %293 = vector.broadcast %292 : vector<8x1xf32> to vector<8x128xf32>
    %294 = arith.mulf %293, %26 : vector<8x128xf32>
    %295 = vector.extract_strided_slice %285 {offsets = [0, 3], sizes = [8, 1], strides = [1, 1]} : vector<8x128xf32> to vector<8x1xf32>
    %296 = vector.broadcast %295 : vector<8x1xf32> to vector<8x128xf32>
    %297 = arith.mulf %296, %29 : vector<8x128xf32>
    %298 = vector.extract_strided_slice %285 {offsets = [0, 4], sizes = [8, 1], strides = [1, 1]} : vector<8x128xf32> to vector<8x1xf32>
    %299 = vector.broadcast %298 : vector<8x1xf32> to vector<8x128xf32>
    %300 = arith.mulf %299, %32 : vector<8x128xf32>
    %301 = arith.addf %288, %291 : vector<8x128xf32>
    %302 = arith.addf %294, %297 : vector<8x128xf32>
    %303 = arith.addf %301, %302 : vector<8x128xf32>
    %304 = arith.addf %303, %300 : vector<8x128xf32>
    %305 = vector.extract_strided_slice %304 {offsets = [0, 0], sizes = [1, 128], strides = [1, 1]} : vector<8x128xf32> to vector<1x128xf32>
    %306 = vector.broadcast %305 : vector<1x128xf32> to vector<8x128xf32>
    %307 = arith.mulf %5, %306 : vector<8x128xf32>
    %308 = vector.extract_strided_slice %304 {offsets = [1, 0], sizes = [1, 128], strides = [1, 1]} : vector<8x128xf32> to vector<1x128xf32>
    %309 = vector.broadcast %308 : vector<1x128xf32> to vector<8x128xf32>
    %310 = arith.mulf %8, %309 : vector<8x128xf32>
    %311 = vector.extract_strided_slice %304 {offsets = [2, 0], sizes = [1, 128], strides = [1, 1]} : vector<8x128xf32> to vector<1x128xf32>
    %312 = vector.broadcast %311 : vector<1x128xf32> to vector<8x128xf32>
    %313 = arith.mulf %11, %312 : vector<8x128xf32>
    %314 = arith.addf %38, %307 : vector<8x128xf32>
    %315 = arith.addf %310, %313 : vector<8x128xf32>
    %316 = arith.addf %314, %315 : vector<8x128xf32>
    %317 = vector.broadcast %cst : f32 to vector<8x128xf32>
    %318 = arith.mulf %317, %316 : vector<8x128xf32>
    %319 = arith.addf %264, %318 : vector<8x128xf32>
    %320 = vector.extract_strided_slice %319 {offsets = [0, 0], sizes = [8, 1], strides = [1, 1]} : vector<8x128xf32> to vector<8x1xf32>
    %321 = vector.broadcast %320 : vector<8x1xf32> to vector<8x128xf32>
    %322 = arith.mulf %321, %14 : vector<8x128xf32>
    %323 = vector.extract_strided_slice %319 {offsets = [0, 1], sizes = [8, 1], strides = [1, 1]} : vector<8x128xf32> to vector<8x1xf32>
    %324 = vector.broadcast %323 : vector<8x1xf32> to vector<8x128xf32>
    %325 = arith.mulf %324, %17 : vector<8x128xf32>
    %326 = arith.addf %322, %325 : vector<8x128xf32>
    %327 = vector.extract_strided_slice %326 {offsets = [0, 0], sizes = [1, 128], strides = [1, 1]} : vector<8x128xf32> to vector<1x128xf32>
    %328 = vector.broadcast %327 : vector<1x128xf32> to vector<8x128xf32>
    %329 = arith.mulf %5, %328 : vector<8x128xf32>
    %330 = vector.extract_strided_slice %326 {offsets = [1, 0], sizes = [1, 128], strides = [1, 1]} : vector<8x128xf32> to vector<1x128xf32>
    %331 = vector.broadcast %330 : vector<1x128xf32> to vector<8x128xf32>
    %332 = arith.mulf %8, %331 : vector<8x128xf32>
    %333 = vector.extract_strided_slice %326 {offsets = [2, 0], sizes = [1, 128], strides = [1, 1]} : vector<8x128xf32> to vector<1x128xf32>
    %334 = vector.broadcast %333 : vector<1x128xf32> to vector<8x128xf32>
    %335 = arith.mulf %11, %334 : vector<8x128xf32>
    %336 = arith.addf %35, %329 : vector<8x128xf32>
    %337 = arith.addf %332, %335 : vector<8x128xf32>
    %338 = arith.addf %336, %337 : vector<8x128xf32>
    %cst_13 = arith.constant 0.000000e+00 : f32
    %339 = vector.broadcast %cst_13 : f32 to vector<8x128xf32>
    %340 = arith.maximumf %338, %339 : vector<8x128xf32>
    %341 = vector.extract_strided_slice %340 {offsets = [0, 0], sizes = [8, 1], strides = [1, 1]} : vector<8x128xf32> to vector<8x1xf32>
    %342 = vector.broadcast %341 : vector<8x1xf32> to vector<8x128xf32>
    %343 = arith.mulf %342, %20 : vector<8x128xf32>
    %344 = vector.extract_strided_slice %340 {offsets = [0, 1], sizes = [8, 1], strides = [1, 1]} : vector<8x128xf32> to vector<8x1xf32>
    %345 = vector.broadcast %344 : vector<8x1xf32> to vector<8x128xf32>
    %346 = arith.mulf %345, %23 : vector<8x128xf32>
    %347 = vector.extract_strided_slice %340 {offsets = [0, 2], sizes = [8, 1], strides = [1, 1]} : vector<8x128xf32> to vector<8x1xf32>
    %348 = vector.broadcast %347 : vector<8x1xf32> to vector<8x128xf32>
    %349 = arith.mulf %348, %26 : vector<8x128xf32>
    %350 = vector.extract_strided_slice %340 {offsets = [0, 3], sizes = [8, 1], strides = [1, 1]} : vector<8x128xf32> to vector<8x1xf32>
    %351 = vector.broadcast %350 : vector<8x1xf32> to vector<8x128xf32>
    %352 = arith.mulf %351, %29 : vector<8x128xf32>
    %353 = vector.extract_strided_slice %340 {offsets = [0, 4], sizes = [8, 1], strides = [1, 1]} : vector<8x128xf32> to vector<8x1xf32>
    %354 = vector.broadcast %353 : vector<8x1xf32> to vector<8x128xf32>
    %355 = arith.mulf %354, %32 : vector<8x128xf32>
    %356 = arith.addf %343, %346 : vector<8x128xf32>
    %357 = arith.addf %349, %352 : vector<8x128xf32>
    %358 = arith.addf %356, %357 : vector<8x128xf32>
    %359 = arith.addf %358, %355 : vector<8x128xf32>
    %360 = vector.extract_strided_slice %359 {offsets = [0, 0], sizes = [1, 128], strides = [1, 1]} : vector<8x128xf32> to vector<1x128xf32>
    %361 = vector.broadcast %360 : vector<1x128xf32> to vector<8x128xf32>
    %362 = arith.mulf %5, %361 : vector<8x128xf32>
    %363 = vector.extract_strided_slice %359 {offsets = [1, 0], sizes = [1, 128], strides = [1, 1]} : vector<8x128xf32> to vector<1x128xf32>
    %364 = vector.broadcast %363 : vector<1x128xf32> to vector<8x128xf32>
    %365 = arith.mulf %8, %364 : vector<8x128xf32>
    %366 = vector.extract_strided_slice %359 {offsets = [2, 0], sizes = [1, 128], strides = [1, 1]} : vector<8x128xf32> to vector<1x128xf32>
    %367 = vector.broadcast %366 : vector<1x128xf32> to vector<8x128xf32>
    %368 = arith.mulf %11, %367 : vector<8x128xf32>
    %369 = arith.addf %38, %362 : vector<8x128xf32>
    %370 = arith.addf %365, %368 : vector<8x128xf32>
    %371 = arith.addf %369, %370 : vector<8x128xf32>
    %372 = vector.broadcast %cst : f32 to vector<8x128xf32>
    %373 = arith.mulf %372, %371 : vector<8x128xf32>
    %374 = arith.addf %264, %373 : vector<8x128xf32>
    %375 = vector.extract_strided_slice %374 {offsets = [0, 0], sizes = [8, 1], strides = [1, 1]} : vector<8x128xf32> to vector<8x1xf32>
    %376 = vector.broadcast %375 : vector<8x1xf32> to vector<8x128xf32>
    %377 = arith.mulf %376, %14 : vector<8x128xf32>
    %378 = vector.extract_strided_slice %374 {offsets = [0, 1], sizes = [8, 1], strides = [1, 1]} : vector<8x128xf32> to vector<8x1xf32>
    %379 = vector.broadcast %378 : vector<8x1xf32> to vector<8x128xf32>
    %380 = arith.mulf %379, %17 : vector<8x128xf32>
    %381 = arith.addf %377, %380 : vector<8x128xf32>
    %382 = vector.extract_strided_slice %381 {offsets = [0, 0], sizes = [1, 128], strides = [1, 1]} : vector<8x128xf32> to vector<1x128xf32>
    %383 = vector.broadcast %382 : vector<1x128xf32> to vector<8x128xf32>
    %384 = arith.mulf %5, %383 : vector<8x128xf32>
    %385 = vector.extract_strided_slice %381 {offsets = [1, 0], sizes = [1, 128], strides = [1, 1]} : vector<8x128xf32> to vector<1x128xf32>
    %386 = vector.broadcast %385 : vector<1x128xf32> to vector<8x128xf32>
    %387 = arith.mulf %8, %386 : vector<8x128xf32>
    %388 = vector.extract_strided_slice %381 {offsets = [2, 0], sizes = [1, 128], strides = [1, 1]} : vector<8x128xf32> to vector<1x128xf32>
    %389 = vector.broadcast %388 : vector<1x128xf32> to vector<8x128xf32>
    %390 = arith.mulf %11, %389 : vector<8x128xf32>
    %391 = arith.addf %35, %384 : vector<8x128xf32>
    %392 = arith.addf %387, %390 : vector<8x128xf32>
    %393 = arith.addf %391, %392 : vector<8x128xf32>
    %cst_14 = arith.constant 0.000000e+00 : f32
    %394 = vector.broadcast %cst_14 : f32 to vector<8x128xf32>
    %395 = arith.maximumf %393, %394 : vector<8x128xf32>
    %396 = vector.extract_strided_slice %395 {offsets = [0, 0], sizes = [8, 1], strides = [1, 1]} : vector<8x128xf32> to vector<8x1xf32>
    %397 = vector.broadcast %396 : vector<8x1xf32> to vector<8x128xf32>
    %398 = arith.mulf %397, %20 : vector<8x128xf32>
    %399 = vector.extract_strided_slice %395 {offsets = [0, 1], sizes = [8, 1], strides = [1, 1]} : vector<8x128xf32> to vector<8x1xf32>
    %400 = vector.broadcast %399 : vector<8x1xf32> to vector<8x128xf32>
    %401 = arith.mulf %400, %23 : vector<8x128xf32>
    %402 = vector.extract_strided_slice %395 {offsets = [0, 2], sizes = [8, 1], strides = [1, 1]} : vector<8x128xf32> to vector<8x1xf32>
    %403 = vector.broadcast %402 : vector<8x1xf32> to vector<8x128xf32>
    %404 = arith.mulf %403, %26 : vector<8x128xf32>
    %405 = vector.extract_strided_slice %395 {offsets = [0, 3], sizes = [8, 1], strides = [1, 1]} : vector<8x128xf32> to vector<8x1xf32>
    %406 = vector.broadcast %405 : vector<8x1xf32> to vector<8x128xf32>
    %407 = arith.mulf %406, %29 : vector<8x128xf32>
    %408 = vector.extract_strided_slice %395 {offsets = [0, 4], sizes = [8, 1], strides = [1, 1]} : vector<8x128xf32> to vector<8x1xf32>
    %409 = vector.broadcast %408 : vector<8x1xf32> to vector<8x128xf32>
    %410 = arith.mulf %409, %32 : vector<8x128xf32>
    %411 = arith.addf %398, %401 : vector<8x128xf32>
    %412 = arith.addf %404, %407 : vector<8x128xf32>
    %413 = arith.addf %411, %412 : vector<8x128xf32>
    %414 = arith.addf %413, %410 : vector<8x128xf32>
    %415 = vector.extract_strided_slice %414 {offsets = [0, 0], sizes = [1, 128], strides = [1, 1]} : vector<8x128xf32> to vector<1x128xf32>
    %416 = vector.broadcast %415 : vector<1x128xf32> to vector<8x128xf32>
    %417 = arith.mulf %5, %416 : vector<8x128xf32>
    %418 = vector.extract_strided_slice %414 {offsets = [1, 0], sizes = [1, 128], strides = [1, 1]} : vector<8x128xf32> to vector<1x128xf32>
    %419 = vector.broadcast %418 : vector<1x128xf32> to vector<8x128xf32>
    %420 = arith.mulf %8, %419 : vector<8x128xf32>
    %421 = vector.extract_strided_slice %414 {offsets = [2, 0], sizes = [1, 128], strides = [1, 1]} : vector<8x128xf32> to vector<1x128xf32>
    %422 = vector.broadcast %421 : vector<1x128xf32> to vector<8x128xf32>
    %423 = arith.mulf %11, %422 : vector<8x128xf32>
    %424 = arith.addf %38, %417 : vector<8x128xf32>
    %425 = arith.addf %420, %423 : vector<8x128xf32>
    %426 = arith.addf %424, %425 : vector<8x128xf32>
    %427 = vector.broadcast %cst_5 : f32 to vector<8x128xf32>
    %428 = arith.mulf %427, %426 : vector<8x128xf32>
    %429 = arith.addf %264, %428 : vector<8x128xf32>
    %430 = vector.extract_strided_slice %429 {offsets = [0, 0], sizes = [8, 1], strides = [1, 1]} : vector<8x128xf32> to vector<8x1xf32>
    %431 = vector.broadcast %430 : vector<8x1xf32> to vector<8x128xf32>
    %432 = arith.mulf %431, %14 : vector<8x128xf32>
    %433 = vector.extract_strided_slice %429 {offsets = [0, 1], sizes = [8, 1], strides = [1, 1]} : vector<8x128xf32> to vector<8x1xf32>
    %434 = vector.broadcast %433 : vector<8x1xf32> to vector<8x128xf32>
    %435 = arith.mulf %434, %17 : vector<8x128xf32>
    %436 = arith.addf %432, %435 : vector<8x128xf32>
    %437 = vector.extract_strided_slice %436 {offsets = [0, 0], sizes = [1, 128], strides = [1, 1]} : vector<8x128xf32> to vector<1x128xf32>
    %438 = vector.broadcast %437 : vector<1x128xf32> to vector<8x128xf32>
    %439 = arith.mulf %5, %438 : vector<8x128xf32>
    %440 = vector.extract_strided_slice %436 {offsets = [1, 0], sizes = [1, 128], strides = [1, 1]} : vector<8x128xf32> to vector<1x128xf32>
    %441 = vector.broadcast %440 : vector<1x128xf32> to vector<8x128xf32>
    %442 = arith.mulf %8, %441 : vector<8x128xf32>
    %443 = vector.extract_strided_slice %436 {offsets = [2, 0], sizes = [1, 128], strides = [1, 1]} : vector<8x128xf32> to vector<1x128xf32>
    %444 = vector.broadcast %443 : vector<1x128xf32> to vector<8x128xf32>
    %445 = arith.mulf %11, %444 : vector<8x128xf32>
    %446 = arith.addf %35, %439 : vector<8x128xf32>
    %447 = arith.addf %442, %445 : vector<8x128xf32>
    %448 = arith.addf %446, %447 : vector<8x128xf32>
    %cst_15 = arith.constant 0.000000e+00 : f32
    %449 = vector.broadcast %cst_15 : f32 to vector<8x128xf32>
    %450 = arith.maximumf %448, %449 : vector<8x128xf32>
    %451 = vector.extract_strided_slice %450 {offsets = [0, 0], sizes = [8, 1], strides = [1, 1]} : vector<8x128xf32> to vector<8x1xf32>
    %452 = vector.broadcast %451 : vector<8x1xf32> to vector<8x128xf32>
    %453 = arith.mulf %452, %20 : vector<8x128xf32>
    %454 = vector.extract_strided_slice %450 {offsets = [0, 1], sizes = [8, 1], strides = [1, 1]} : vector<8x128xf32> to vector<8x1xf32>
    %455 = vector.broadcast %454 : vector<8x1xf32> to vector<8x128xf32>
    %456 = arith.mulf %455, %23 : vector<8x128xf32>
    %457 = vector.extract_strided_slice %450 {offsets = [0, 2], sizes = [8, 1], strides = [1, 1]} : vector<8x128xf32> to vector<8x1xf32>
    %458 = vector.broadcast %457 : vector<8x1xf32> to vector<8x128xf32>
    %459 = arith.mulf %458, %26 : vector<8x128xf32>
    %460 = vector.extract_strided_slice %450 {offsets = [0, 3], sizes = [8, 1], strides = [1, 1]} : vector<8x128xf32> to vector<8x1xf32>
    %461 = vector.broadcast %460 : vector<8x1xf32> to vector<8x128xf32>
    %462 = arith.mulf %461, %29 : vector<8x128xf32>
    %463 = vector.extract_strided_slice %450 {offsets = [0, 4], sizes = [8, 1], strides = [1, 1]} : vector<8x128xf32> to vector<8x1xf32>
    %464 = vector.broadcast %463 : vector<8x1xf32> to vector<8x128xf32>
    %465 = arith.mulf %464, %32 : vector<8x128xf32>
    %466 = arith.addf %453, %456 : vector<8x128xf32>
    %467 = arith.addf %459, %462 : vector<8x128xf32>
    %468 = arith.addf %466, %467 : vector<8x128xf32>
    %469 = arith.addf %468, %465 : vector<8x128xf32>
    %470 = vector.extract_strided_slice %469 {offsets = [0, 0], sizes = [1, 128], strides = [1, 1]} : vector<8x128xf32> to vector<1x128xf32>
    %471 = vector.broadcast %470 : vector<1x128xf32> to vector<8x128xf32>
    %472 = arith.mulf %5, %471 : vector<8x128xf32>
    %473 = vector.extract_strided_slice %469 {offsets = [1, 0], sizes = [1, 128], strides = [1, 1]} : vector<8x128xf32> to vector<1x128xf32>
    %474 = vector.broadcast %473 : vector<1x128xf32> to vector<8x128xf32>
    %475 = arith.mulf %8, %474 : vector<8x128xf32>
    %476 = vector.extract_strided_slice %469 {offsets = [2, 0], sizes = [1, 128], strides = [1, 1]} : vector<8x128xf32> to vector<1x128xf32>
    %477 = vector.broadcast %476 : vector<1x128xf32> to vector<8x128xf32>
    %478 = arith.mulf %11, %477 : vector<8x128xf32>
    %479 = arith.addf %38, %472 : vector<8x128xf32>
    %480 = arith.addf %475, %478 : vector<8x128xf32>
    %481 = arith.addf %479, %480 : vector<8x128xf32>
    %482 = arith.addf %316, %481 : vector<8x128xf32>
    %483 = arith.addf %371, %426 : vector<8x128xf32>
    %cst_16 = arith.constant 2.000000e+00 : f32
    %484 = vector.broadcast %cst_16 : f32 to vector<8x128xf32>
    %485 = arith.mulf %484, %483 : vector<8x128xf32>
    %486 = arith.addf %482, %485 : vector<8x128xf32>
    %487 = vector.broadcast %cst_6 : f32 to vector<8x128xf32>
    %488 = arith.mulf %487, %486 : vector<8x128xf32>
    %489 = arith.addf %264, %488 : vector<8x128xf32>
    %c2_i32 = arith.constant 2 : i32
    %490 = vector.extract_strided_slice %489 {offsets = [0, 0], sizes = [8, 1], strides = [1, 1]} : vector<8x128xf32> to vector<8x1xf32>
    %491 = vector.broadcast %490 : vector<8x1xf32> to vector<8x128xf32>
    %492 = arith.mulf %491, %14 : vector<8x128xf32>
    %493 = vector.extract_strided_slice %489 {offsets = [0, 1], sizes = [8, 1], strides = [1, 1]} : vector<8x128xf32> to vector<8x1xf32>
    %494 = vector.broadcast %493 : vector<8x1xf32> to vector<8x128xf32>
    %495 = arith.mulf %494, %17 : vector<8x128xf32>
    %496 = arith.addf %492, %495 : vector<8x128xf32>
    %497 = vector.extract_strided_slice %496 {offsets = [0, 0], sizes = [1, 128], strides = [1, 1]} : vector<8x128xf32> to vector<1x128xf32>
    %498 = vector.broadcast %497 : vector<1x128xf32> to vector<8x128xf32>
    %499 = arith.mulf %5, %498 : vector<8x128xf32>
    %500 = vector.extract_strided_slice %496 {offsets = [1, 0], sizes = [1, 128], strides = [1, 1]} : vector<8x128xf32> to vector<1x128xf32>
    %501 = vector.broadcast %500 : vector<1x128xf32> to vector<8x128xf32>
    %502 = arith.mulf %8, %501 : vector<8x128xf32>
    %503 = vector.extract_strided_slice %496 {offsets = [2, 0], sizes = [1, 128], strides = [1, 1]} : vector<8x128xf32> to vector<1x128xf32>
    %504 = vector.broadcast %503 : vector<1x128xf32> to vector<8x128xf32>
    %505 = arith.mulf %11, %504 : vector<8x128xf32>
    %506 = arith.addf %35, %499 : vector<8x128xf32>
    %507 = arith.addf %502, %505 : vector<8x128xf32>
    %508 = arith.addf %506, %507 : vector<8x128xf32>
    %cst_17 = arith.constant 0.000000e+00 : f32
    %509 = vector.broadcast %cst_17 : f32 to vector<8x128xf32>
    %510 = arith.maximumf %508, %509 : vector<8x128xf32>
    %511 = vector.extract_strided_slice %510 {offsets = [0, 0], sizes = [8, 1], strides = [1, 1]} : vector<8x128xf32> to vector<8x1xf32>
    %512 = vector.broadcast %511 : vector<8x1xf32> to vector<8x128xf32>
    %513 = arith.mulf %512, %20 : vector<8x128xf32>
    %514 = vector.extract_strided_slice %510 {offsets = [0, 1], sizes = [8, 1], strides = [1, 1]} : vector<8x128xf32> to vector<8x1xf32>
    %515 = vector.broadcast %514 : vector<8x1xf32> to vector<8x128xf32>
    %516 = arith.mulf %515, %23 : vector<8x128xf32>
    %517 = vector.extract_strided_slice %510 {offsets = [0, 2], sizes = [8, 1], strides = [1, 1]} : vector<8x128xf32> to vector<8x1xf32>
    %518 = vector.broadcast %517 : vector<8x1xf32> to vector<8x128xf32>
    %519 = arith.mulf %518, %26 : vector<8x128xf32>
    %520 = vector.extract_strided_slice %510 {offsets = [0, 3], sizes = [8, 1], strides = [1, 1]} : vector<8x128xf32> to vector<8x1xf32>
    %521 = vector.broadcast %520 : vector<8x1xf32> to vector<8x128xf32>
    %522 = arith.mulf %521, %29 : vector<8x128xf32>
    %523 = vector.extract_strided_slice %510 {offsets = [0, 4], sizes = [8, 1], strides = [1, 1]} : vector<8x128xf32> to vector<8x1xf32>
    %524 = vector.broadcast %523 : vector<8x1xf32> to vector<8x128xf32>
    %525 = arith.mulf %524, %32 : vector<8x128xf32>
    %526 = arith.addf %513, %516 : vector<8x128xf32>
    %527 = arith.addf %519, %522 : vector<8x128xf32>
    %528 = arith.addf %526, %527 : vector<8x128xf32>
    %529 = arith.addf %528, %525 : vector<8x128xf32>
    %530 = vector.extract_strided_slice %529 {offsets = [0, 0], sizes = [1, 128], strides = [1, 1]} : vector<8x128xf32> to vector<1x128xf32>
    %531 = vector.broadcast %530 : vector<1x128xf32> to vector<8x128xf32>
    %532 = arith.mulf %5, %531 : vector<8x128xf32>
    %533 = vector.extract_strided_slice %529 {offsets = [1, 0], sizes = [1, 128], strides = [1, 1]} : vector<8x128xf32> to vector<1x128xf32>
    %534 = vector.broadcast %533 : vector<1x128xf32> to vector<8x128xf32>
    %535 = arith.mulf %8, %534 : vector<8x128xf32>
    %536 = vector.extract_strided_slice %529 {offsets = [2, 0], sizes = [1, 128], strides = [1, 1]} : vector<8x128xf32> to vector<1x128xf32>
    %537 = vector.broadcast %536 : vector<1x128xf32> to vector<8x128xf32>
    %538 = arith.mulf %11, %537 : vector<8x128xf32>
    %539 = arith.addf %38, %532 : vector<8x128xf32>
    %540 = arith.addf %535, %538 : vector<8x128xf32>
    %541 = arith.addf %539, %540 : vector<8x128xf32>
    %542 = vector.broadcast %cst : f32 to vector<8x128xf32>
    %543 = arith.mulf %542, %541 : vector<8x128xf32>
    %544 = arith.addf %489, %543 : vector<8x128xf32>
    %545 = vector.extract_strided_slice %544 {offsets = [0, 0], sizes = [8, 1], strides = [1, 1]} : vector<8x128xf32> to vector<8x1xf32>
    %546 = vector.broadcast %545 : vector<8x1xf32> to vector<8x128xf32>
    %547 = arith.mulf %546, %14 : vector<8x128xf32>
    %548 = vector.extract_strided_slice %544 {offsets = [0, 1], sizes = [8, 1], strides = [1, 1]} : vector<8x128xf32> to vector<8x1xf32>
    %549 = vector.broadcast %548 : vector<8x1xf32> to vector<8x128xf32>
    %550 = arith.mulf %549, %17 : vector<8x128xf32>
    %551 = arith.addf %547, %550 : vector<8x128xf32>
    %552 = vector.extract_strided_slice %551 {offsets = [0, 0], sizes = [1, 128], strides = [1, 1]} : vector<8x128xf32> to vector<1x128xf32>
    %553 = vector.broadcast %552 : vector<1x128xf32> to vector<8x128xf32>
    %554 = arith.mulf %5, %553 : vector<8x128xf32>
    %555 = vector.extract_strided_slice %551 {offsets = [1, 0], sizes = [1, 128], strides = [1, 1]} : vector<8x128xf32> to vector<1x128xf32>
    %556 = vector.broadcast %555 : vector<1x128xf32> to vector<8x128xf32>
    %557 = arith.mulf %8, %556 : vector<8x128xf32>
    %558 = vector.extract_strided_slice %551 {offsets = [2, 0], sizes = [1, 128], strides = [1, 1]} : vector<8x128xf32> to vector<1x128xf32>
    %559 = vector.broadcast %558 : vector<1x128xf32> to vector<8x128xf32>
    %560 = arith.mulf %11, %559 : vector<8x128xf32>
    %561 = arith.addf %35, %554 : vector<8x128xf32>
    %562 = arith.addf %557, %560 : vector<8x128xf32>
    %563 = arith.addf %561, %562 : vector<8x128xf32>
    %cst_18 = arith.constant 0.000000e+00 : f32
    %564 = vector.broadcast %cst_18 : f32 to vector<8x128xf32>
    %565 = arith.maximumf %563, %564 : vector<8x128xf32>
    %566 = vector.extract_strided_slice %565 {offsets = [0, 0], sizes = [8, 1], strides = [1, 1]} : vector<8x128xf32> to vector<8x1xf32>
    %567 = vector.broadcast %566 : vector<8x1xf32> to vector<8x128xf32>
    %568 = arith.mulf %567, %20 : vector<8x128xf32>
    %569 = vector.extract_strided_slice %565 {offsets = [0, 1], sizes = [8, 1], strides = [1, 1]} : vector<8x128xf32> to vector<8x1xf32>
    %570 = vector.broadcast %569 : vector<8x1xf32> to vector<8x128xf32>
    %571 = arith.mulf %570, %23 : vector<8x128xf32>
    %572 = vector.extract_strided_slice %565 {offsets = [0, 2], sizes = [8, 1], strides = [1, 1]} : vector<8x128xf32> to vector<8x1xf32>
    %573 = vector.broadcast %572 : vector<8x1xf32> to vector<8x128xf32>
    %574 = arith.mulf %573, %26 : vector<8x128xf32>
    %575 = vector.extract_strided_slice %565 {offsets = [0, 3], sizes = [8, 1], strides = [1, 1]} : vector<8x128xf32> to vector<8x1xf32>
    %576 = vector.broadcast %575 : vector<8x1xf32> to vector<8x128xf32>
    %577 = arith.mulf %576, %29 : vector<8x128xf32>
    %578 = vector.extract_strided_slice %565 {offsets = [0, 4], sizes = [8, 1], strides = [1, 1]} : vector<8x128xf32> to vector<8x1xf32>
    %579 = vector.broadcast %578 : vector<8x1xf32> to vector<8x128xf32>
    %580 = arith.mulf %579, %32 : vector<8x128xf32>
    %581 = arith.addf %568, %571 : vector<8x128xf32>
    %582 = arith.addf %574, %577 : vector<8x128xf32>
    %583 = arith.addf %581, %582 : vector<8x128xf32>
    %584 = arith.addf %583, %580 : vector<8x128xf32>
    %585 = vector.extract_strided_slice %584 {offsets = [0, 0], sizes = [1, 128], strides = [1, 1]} : vector<8x128xf32> to vector<1x128xf32>
    %586 = vector.broadcast %585 : vector<1x128xf32> to vector<8x128xf32>
    %587 = arith.mulf %5, %586 : vector<8x128xf32>
    %588 = vector.extract_strided_slice %584 {offsets = [1, 0], sizes = [1, 128], strides = [1, 1]} : vector<8x128xf32> to vector<1x128xf32>
    %589 = vector.broadcast %588 : vector<1x128xf32> to vector<8x128xf32>
    %590 = arith.mulf %8, %589 : vector<8x128xf32>
    %591 = vector.extract_strided_slice %584 {offsets = [2, 0], sizes = [1, 128], strides = [1, 1]} : vector<8x128xf32> to vector<1x128xf32>
    %592 = vector.broadcast %591 : vector<1x128xf32> to vector<8x128xf32>
    %593 = arith.mulf %11, %592 : vector<8x128xf32>
    %594 = arith.addf %38, %587 : vector<8x128xf32>
    %595 = arith.addf %590, %593 : vector<8x128xf32>
    %596 = arith.addf %594, %595 : vector<8x128xf32>
    %597 = vector.broadcast %cst : f32 to vector<8x128xf32>
    %598 = arith.mulf %597, %596 : vector<8x128xf32>
    %599 = arith.addf %489, %598 : vector<8x128xf32>
    %600 = vector.extract_strided_slice %599 {offsets = [0, 0], sizes = [8, 1], strides = [1, 1]} : vector<8x128xf32> to vector<8x1xf32>
    %601 = vector.broadcast %600 : vector<8x1xf32> to vector<8x128xf32>
    %602 = arith.mulf %601, %14 : vector<8x128xf32>
    %603 = vector.extract_strided_slice %599 {offsets = [0, 1], sizes = [8, 1], strides = [1, 1]} : vector<8x128xf32> to vector<8x1xf32>
    %604 = vector.broadcast %603 : vector<8x1xf32> to vector<8x128xf32>
    %605 = arith.mulf %604, %17 : vector<8x128xf32>
    %606 = arith.addf %602, %605 : vector<8x128xf32>
    %607 = vector.extract_strided_slice %606 {offsets = [0, 0], sizes = [1, 128], strides = [1, 1]} : vector<8x128xf32> to vector<1x128xf32>
    %608 = vector.broadcast %607 : vector<1x128xf32> to vector<8x128xf32>
    %609 = arith.mulf %5, %608 : vector<8x128xf32>
    %610 = vector.extract_strided_slice %606 {offsets = [1, 0], sizes = [1, 128], strides = [1, 1]} : vector<8x128xf32> to vector<1x128xf32>
    %611 = vector.broadcast %610 : vector<1x128xf32> to vector<8x128xf32>
    %612 = arith.mulf %8, %611 : vector<8x128xf32>
    %613 = vector.extract_strided_slice %606 {offsets = [2, 0], sizes = [1, 128], strides = [1, 1]} : vector<8x128xf32> to vector<1x128xf32>
    %614 = vector.broadcast %613 : vector<1x128xf32> to vector<8x128xf32>
    %615 = arith.mulf %11, %614 : vector<8x128xf32>
    %616 = arith.addf %35, %609 : vector<8x128xf32>
    %617 = arith.addf %612, %615 : vector<8x128xf32>
    %618 = arith.addf %616, %617 : vector<8x128xf32>
    %cst_19 = arith.constant 0.000000e+00 : f32
    %619 = vector.broadcast %cst_19 : f32 to vector<8x128xf32>
    %620 = arith.maximumf %618, %619 : vector<8x128xf32>
    %621 = vector.extract_strided_slice %620 {offsets = [0, 0], sizes = [8, 1], strides = [1, 1]} : vector<8x128xf32> to vector<8x1xf32>
    %622 = vector.broadcast %621 : vector<8x1xf32> to vector<8x128xf32>
    %623 = arith.mulf %622, %20 : vector<8x128xf32>
    %624 = vector.extract_strided_slice %620 {offsets = [0, 1], sizes = [8, 1], strides = [1, 1]} : vector<8x128xf32> to vector<8x1xf32>
    %625 = vector.broadcast %624 : vector<8x1xf32> to vector<8x128xf32>
    %626 = arith.mulf %625, %23 : vector<8x128xf32>
    %627 = vector.extract_strided_slice %620 {offsets = [0, 2], sizes = [8, 1], strides = [1, 1]} : vector<8x128xf32> to vector<8x1xf32>
    %628 = vector.broadcast %627 : vector<8x1xf32> to vector<8x128xf32>
    %629 = arith.mulf %628, %26 : vector<8x128xf32>
    %630 = vector.extract_strided_slice %620 {offsets = [0, 3], sizes = [8, 1], strides = [1, 1]} : vector<8x128xf32> to vector<8x1xf32>
    %631 = vector.broadcast %630 : vector<8x1xf32> to vector<8x128xf32>
    %632 = arith.mulf %631, %29 : vector<8x128xf32>
    %633 = vector.extract_strided_slice %620 {offsets = [0, 4], sizes = [8, 1], strides = [1, 1]} : vector<8x128xf32> to vector<8x1xf32>
    %634 = vector.broadcast %633 : vector<8x1xf32> to vector<8x128xf32>
    %635 = arith.mulf %634, %32 : vector<8x128xf32>
    %636 = arith.addf %623, %626 : vector<8x128xf32>
    %637 = arith.addf %629, %632 : vector<8x128xf32>
    %638 = arith.addf %636, %637 : vector<8x128xf32>
    %639 = arith.addf %638, %635 : vector<8x128xf32>
    %640 = vector.extract_strided_slice %639 {offsets = [0, 0], sizes = [1, 128], strides = [1, 1]} : vector<8x128xf32> to vector<1x128xf32>
    %641 = vector.broadcast %640 : vector<1x128xf32> to vector<8x128xf32>
    %642 = arith.mulf %5, %641 : vector<8x128xf32>
    %643 = vector.extract_strided_slice %639 {offsets = [1, 0], sizes = [1, 128], strides = [1, 1]} : vector<8x128xf32> to vector<1x128xf32>
    %644 = vector.broadcast %643 : vector<1x128xf32> to vector<8x128xf32>
    %645 = arith.mulf %8, %644 : vector<8x128xf32>
    %646 = vector.extract_strided_slice %639 {offsets = [2, 0], sizes = [1, 128], strides = [1, 1]} : vector<8x128xf32> to vector<1x128xf32>
    %647 = vector.broadcast %646 : vector<1x128xf32> to vector<8x128xf32>
    %648 = arith.mulf %11, %647 : vector<8x128xf32>
    %649 = arith.addf %38, %642 : vector<8x128xf32>
    %650 = arith.addf %645, %648 : vector<8x128xf32>
    %651 = arith.addf %649, %650 : vector<8x128xf32>
    %652 = vector.broadcast %cst_5 : f32 to vector<8x128xf32>
    %653 = arith.mulf %652, %651 : vector<8x128xf32>
    %654 = arith.addf %489, %653 : vector<8x128xf32>
    %655 = vector.extract_strided_slice %654 {offsets = [0, 0], sizes = [8, 1], strides = [1, 1]} : vector<8x128xf32> to vector<8x1xf32>
    %656 = vector.broadcast %655 : vector<8x1xf32> to vector<8x128xf32>
    %657 = arith.mulf %656, %14 : vector<8x128xf32>
    %658 = vector.extract_strided_slice %654 {offsets = [0, 1], sizes = [8, 1], strides = [1, 1]} : vector<8x128xf32> to vector<8x1xf32>
    %659 = vector.broadcast %658 : vector<8x1xf32> to vector<8x128xf32>
    %660 = arith.mulf %659, %17 : vector<8x128xf32>
    %661 = arith.addf %657, %660 : vector<8x128xf32>
    %662 = vector.extract_strided_slice %661 {offsets = [0, 0], sizes = [1, 128], strides = [1, 1]} : vector<8x128xf32> to vector<1x128xf32>
    %663 = vector.broadcast %662 : vector<1x128xf32> to vector<8x128xf32>
    %664 = arith.mulf %5, %663 : vector<8x128xf32>
    %665 = vector.extract_strided_slice %661 {offsets = [1, 0], sizes = [1, 128], strides = [1, 1]} : vector<8x128xf32> to vector<1x128xf32>
    %666 = vector.broadcast %665 : vector<1x128xf32> to vector<8x128xf32>
    %667 = arith.mulf %8, %666 : vector<8x128xf32>
    %668 = vector.extract_strided_slice %661 {offsets = [2, 0], sizes = [1, 128], strides = [1, 1]} : vector<8x128xf32> to vector<1x128xf32>
    %669 = vector.broadcast %668 : vector<1x128xf32> to vector<8x128xf32>
    %670 = arith.mulf %11, %669 : vector<8x128xf32>
    %671 = arith.addf %35, %664 : vector<8x128xf32>
    %672 = arith.addf %667, %670 : vector<8x128xf32>
    %673 = arith.addf %671, %672 : vector<8x128xf32>
    %cst_20 = arith.constant 0.000000e+00 : f32
    %674 = vector.broadcast %cst_20 : f32 to vector<8x128xf32>
    %675 = arith.maximumf %673, %674 : vector<8x128xf32>
    %676 = vector.extract_strided_slice %675 {offsets = [0, 0], sizes = [8, 1], strides = [1, 1]} : vector<8x128xf32> to vector<8x1xf32>
    %677 = vector.broadcast %676 : vector<8x1xf32> to vector<8x128xf32>
    %678 = arith.mulf %677, %20 : vector<8x128xf32>
    %679 = vector.extract_strided_slice %675 {offsets = [0, 1], sizes = [8, 1], strides = [1, 1]} : vector<8x128xf32> to vector<8x1xf32>
    %680 = vector.broadcast %679 : vector<8x1xf32> to vector<8x128xf32>
    %681 = arith.mulf %680, %23 : vector<8x128xf32>
    %682 = vector.extract_strided_slice %675 {offsets = [0, 2], sizes = [8, 1], strides = [1, 1]} : vector<8x128xf32> to vector<8x1xf32>
    %683 = vector.broadcast %682 : vector<8x1xf32> to vector<8x128xf32>
    %684 = arith.mulf %683, %26 : vector<8x128xf32>
    %685 = vector.extract_strided_slice %675 {offsets = [0, 3], sizes = [8, 1], strides = [1, 1]} : vector<8x128xf32> to vector<8x1xf32>
    %686 = vector.broadcast %685 : vector<8x1xf32> to vector<8x128xf32>
    %687 = arith.mulf %686, %29 : vector<8x128xf32>
    %688 = vector.extract_strided_slice %675 {offsets = [0, 4], sizes = [8, 1], strides = [1, 1]} : vector<8x128xf32> to vector<8x1xf32>
    %689 = vector.broadcast %688 : vector<8x1xf32> to vector<8x128xf32>
    %690 = arith.mulf %689, %32 : vector<8x128xf32>
    %691 = arith.addf %678, %681 : vector<8x128xf32>
    %692 = arith.addf %684, %687 : vector<8x128xf32>
    %693 = arith.addf %691, %692 : vector<8x128xf32>
    %694 = arith.addf %693, %690 : vector<8x128xf32>
    %695 = vector.extract_strided_slice %694 {offsets = [0, 0], sizes = [1, 128], strides = [1, 1]} : vector<8x128xf32> to vector<1x128xf32>
    %696 = vector.broadcast %695 : vector<1x128xf32> to vector<8x128xf32>
    %697 = arith.mulf %5, %696 : vector<8x128xf32>
    %698 = vector.extract_strided_slice %694 {offsets = [1, 0], sizes = [1, 128], strides = [1, 1]} : vector<8x128xf32> to vector<1x128xf32>
    %699 = vector.broadcast %698 : vector<1x128xf32> to vector<8x128xf32>
    %700 = arith.mulf %8, %699 : vector<8x128xf32>
    %701 = vector.extract_strided_slice %694 {offsets = [2, 0], sizes = [1, 128], strides = [1, 1]} : vector<8x128xf32> to vector<1x128xf32>
    %702 = vector.broadcast %701 : vector<1x128xf32> to vector<8x128xf32>
    %703 = arith.mulf %11, %702 : vector<8x128xf32>
    %704 = arith.addf %38, %697 : vector<8x128xf32>
    %705 = arith.addf %700, %703 : vector<8x128xf32>
    %706 = arith.addf %704, %705 : vector<8x128xf32>
    %707 = arith.addf %541, %706 : vector<8x128xf32>
    %708 = arith.addf %596, %651 : vector<8x128xf32>
    %cst_21 = arith.constant 2.000000e+00 : f32
    %709 = vector.broadcast %cst_21 : f32 to vector<8x128xf32>
    %710 = arith.mulf %709, %708 : vector<8x128xf32>
    %711 = arith.addf %707, %710 : vector<8x128xf32>
    %712 = vector.broadcast %cst_6 : f32 to vector<8x128xf32>
    %713 = arith.mulf %712, %711 : vector<8x128xf32>
    %714 = arith.addf %489, %713 : vector<8x128xf32>
    %c3_i32 = arith.constant 3 : i32
    %715 = vector.extract_strided_slice %714 {offsets = [0, 0], sizes = [8, 1], strides = [1, 1]} : vector<8x128xf32> to vector<8x1xf32>
    %716 = vector.broadcast %715 : vector<8x1xf32> to vector<8x128xf32>
    %717 = arith.mulf %716, %14 : vector<8x128xf32>
    %718 = vector.extract_strided_slice %714 {offsets = [0, 1], sizes = [8, 1], strides = [1, 1]} : vector<8x128xf32> to vector<8x1xf32>
    %719 = vector.broadcast %718 : vector<8x1xf32> to vector<8x128xf32>
    %720 = arith.mulf %719, %17 : vector<8x128xf32>
    %721 = arith.addf %717, %720 : vector<8x128xf32>
    %722 = vector.extract_strided_slice %721 {offsets = [0, 0], sizes = [1, 128], strides = [1, 1]} : vector<8x128xf32> to vector<1x128xf32>
    %723 = vector.broadcast %722 : vector<1x128xf32> to vector<8x128xf32>
    %724 = arith.mulf %5, %723 : vector<8x128xf32>
    %725 = vector.extract_strided_slice %721 {offsets = [1, 0], sizes = [1, 128], strides = [1, 1]} : vector<8x128xf32> to vector<1x128xf32>
    %726 = vector.broadcast %725 : vector<1x128xf32> to vector<8x128xf32>
    %727 = arith.mulf %8, %726 : vector<8x128xf32>
    %728 = vector.extract_strided_slice %721 {offsets = [2, 0], sizes = [1, 128], strides = [1, 1]} : vector<8x128xf32> to vector<1x128xf32>
    %729 = vector.broadcast %728 : vector<1x128xf32> to vector<8x128xf32>
    %730 = arith.mulf %11, %729 : vector<8x128xf32>
    %731 = arith.addf %35, %724 : vector<8x128xf32>
    %732 = arith.addf %727, %730 : vector<8x128xf32>
    %733 = arith.addf %731, %732 : vector<8x128xf32>
    %cst_22 = arith.constant 0.000000e+00 : f32
    %734 = vector.broadcast %cst_22 : f32 to vector<8x128xf32>
    %735 = arith.maximumf %733, %734 : vector<8x128xf32>
    %736 = vector.extract_strided_slice %735 {offsets = [0, 0], sizes = [8, 1], strides = [1, 1]} : vector<8x128xf32> to vector<8x1xf32>
    %737 = vector.broadcast %736 : vector<8x1xf32> to vector<8x128xf32>
    %738 = arith.mulf %737, %20 : vector<8x128xf32>
    %739 = vector.extract_strided_slice %735 {offsets = [0, 1], sizes = [8, 1], strides = [1, 1]} : vector<8x128xf32> to vector<8x1xf32>
    %740 = vector.broadcast %739 : vector<8x1xf32> to vector<8x128xf32>
    %741 = arith.mulf %740, %23 : vector<8x128xf32>
    %742 = vector.extract_strided_slice %735 {offsets = [0, 2], sizes = [8, 1], strides = [1, 1]} : vector<8x128xf32> to vector<8x1xf32>
    %743 = vector.broadcast %742 : vector<8x1xf32> to vector<8x128xf32>
    %744 = arith.mulf %743, %26 : vector<8x128xf32>
    %745 = vector.extract_strided_slice %735 {offsets = [0, 3], sizes = [8, 1], strides = [1, 1]} : vector<8x128xf32> to vector<8x1xf32>
    %746 = vector.broadcast %745 : vector<8x1xf32> to vector<8x128xf32>
    %747 = arith.mulf %746, %29 : vector<8x128xf32>
    %748 = vector.extract_strided_slice %735 {offsets = [0, 4], sizes = [8, 1], strides = [1, 1]} : vector<8x128xf32> to vector<8x1xf32>
    %749 = vector.broadcast %748 : vector<8x1xf32> to vector<8x128xf32>
    %750 = arith.mulf %749, %32 : vector<8x128xf32>
    %751 = arith.addf %738, %741 : vector<8x128xf32>
    %752 = arith.addf %744, %747 : vector<8x128xf32>
    %753 = arith.addf %751, %752 : vector<8x128xf32>
    %754 = arith.addf %753, %750 : vector<8x128xf32>
    %755 = vector.extract_strided_slice %754 {offsets = [0, 0], sizes = [1, 128], strides = [1, 1]} : vector<8x128xf32> to vector<1x128xf32>
    %756 = vector.broadcast %755 : vector<1x128xf32> to vector<8x128xf32>
    %757 = arith.mulf %5, %756 : vector<8x128xf32>
    %758 = vector.extract_strided_slice %754 {offsets = [1, 0], sizes = [1, 128], strides = [1, 1]} : vector<8x128xf32> to vector<1x128xf32>
    %759 = vector.broadcast %758 : vector<1x128xf32> to vector<8x128xf32>
    %760 = arith.mulf %8, %759 : vector<8x128xf32>
    %761 = vector.extract_strided_slice %754 {offsets = [2, 0], sizes = [1, 128], strides = [1, 1]} : vector<8x128xf32> to vector<1x128xf32>
    %762 = vector.broadcast %761 : vector<1x128xf32> to vector<8x128xf32>
    %763 = arith.mulf %11, %762 : vector<8x128xf32>
    %764 = arith.addf %38, %757 : vector<8x128xf32>
    %765 = arith.addf %760, %763 : vector<8x128xf32>
    %766 = arith.addf %764, %765 : vector<8x128xf32>
    %767 = vector.broadcast %cst : f32 to vector<8x128xf32>
    %768 = arith.mulf %767, %766 : vector<8x128xf32>
    %769 = arith.addf %714, %768 : vector<8x128xf32>
    %770 = vector.extract_strided_slice %769 {offsets = [0, 0], sizes = [8, 1], strides = [1, 1]} : vector<8x128xf32> to vector<8x1xf32>
    %771 = vector.broadcast %770 : vector<8x1xf32> to vector<8x128xf32>
    %772 = arith.mulf %771, %14 : vector<8x128xf32>
    %773 = vector.extract_strided_slice %769 {offsets = [0, 1], sizes = [8, 1], strides = [1, 1]} : vector<8x128xf32> to vector<8x1xf32>
    %774 = vector.broadcast %773 : vector<8x1xf32> to vector<8x128xf32>
    %775 = arith.mulf %774, %17 : vector<8x128xf32>
    %776 = arith.addf %772, %775 : vector<8x128xf32>
    %777 = vector.extract_strided_slice %776 {offsets = [0, 0], sizes = [1, 128], strides = [1, 1]} : vector<8x128xf32> to vector<1x128xf32>
    %778 = vector.broadcast %777 : vector<1x128xf32> to vector<8x128xf32>
    %779 = arith.mulf %5, %778 : vector<8x128xf32>
    %780 = vector.extract_strided_slice %776 {offsets = [1, 0], sizes = [1, 128], strides = [1, 1]} : vector<8x128xf32> to vector<1x128xf32>
    %781 = vector.broadcast %780 : vector<1x128xf32> to vector<8x128xf32>
    %782 = arith.mulf %8, %781 : vector<8x128xf32>
    %783 = vector.extract_strided_slice %776 {offsets = [2, 0], sizes = [1, 128], strides = [1, 1]} : vector<8x128xf32> to vector<1x128xf32>
    %784 = vector.broadcast %783 : vector<1x128xf32> to vector<8x128xf32>
    %785 = arith.mulf %11, %784 : vector<8x128xf32>
    %786 = arith.addf %35, %779 : vector<8x128xf32>
    %787 = arith.addf %782, %785 : vector<8x128xf32>
    %788 = arith.addf %786, %787 : vector<8x128xf32>
    %cst_23 = arith.constant 0.000000e+00 : f32
    %789 = vector.broadcast %cst_23 : f32 to vector<8x128xf32>
    %790 = arith.maximumf %788, %789 : vector<8x128xf32>
    %791 = vector.extract_strided_slice %790 {offsets = [0, 0], sizes = [8, 1], strides = [1, 1]} : vector<8x128xf32> to vector<8x1xf32>
    %792 = vector.broadcast %791 : vector<8x1xf32> to vector<8x128xf32>
    %793 = arith.mulf %792, %20 : vector<8x128xf32>
    %794 = vector.extract_strided_slice %790 {offsets = [0, 1], sizes = [8, 1], strides = [1, 1]} : vector<8x128xf32> to vector<8x1xf32>
    %795 = vector.broadcast %794 : vector<8x1xf32> to vector<8x128xf32>
    %796 = arith.mulf %795, %23 : vector<8x128xf32>
    %797 = vector.extract_strided_slice %790 {offsets = [0, 2], sizes = [8, 1], strides = [1, 1]} : vector<8x128xf32> to vector<8x1xf32>
    %798 = vector.broadcast %797 : vector<8x1xf32> to vector<8x128xf32>
    %799 = arith.mulf %798, %26 : vector<8x128xf32>
    %800 = vector.extract_strided_slice %790 {offsets = [0, 3], sizes = [8, 1], strides = [1, 1]} : vector<8x128xf32> to vector<8x1xf32>
    %801 = vector.broadcast %800 : vector<8x1xf32> to vector<8x128xf32>
    %802 = arith.mulf %801, %29 : vector<8x128xf32>
    %803 = vector.extract_strided_slice %790 {offsets = [0, 4], sizes = [8, 1], strides = [1, 1]} : vector<8x128xf32> to vector<8x1xf32>
    %804 = vector.broadcast %803 : vector<8x1xf32> to vector<8x128xf32>
    %805 = arith.mulf %804, %32 : vector<8x128xf32>
    %806 = arith.addf %793, %796 : vector<8x128xf32>
    %807 = arith.addf %799, %802 : vector<8x128xf32>
    %808 = arith.addf %806, %807 : vector<8x128xf32>
    %809 = arith.addf %808, %805 : vector<8x128xf32>
    %810 = vector.extract_strided_slice %809 {offsets = [0, 0], sizes = [1, 128], strides = [1, 1]} : vector<8x128xf32> to vector<1x128xf32>
    %811 = vector.broadcast %810 : vector<1x128xf32> to vector<8x128xf32>
    %812 = arith.mulf %5, %811 : vector<8x128xf32>
    %813 = vector.extract_strided_slice %809 {offsets = [1, 0], sizes = [1, 128], strides = [1, 1]} : vector<8x128xf32> to vector<1x128xf32>
    %814 = vector.broadcast %813 : vector<1x128xf32> to vector<8x128xf32>
    %815 = arith.mulf %8, %814 : vector<8x128xf32>
    %816 = vector.extract_strided_slice %809 {offsets = [2, 0], sizes = [1, 128], strides = [1, 1]} : vector<8x128xf32> to vector<1x128xf32>
    %817 = vector.broadcast %816 : vector<1x128xf32> to vector<8x128xf32>
    %818 = arith.mulf %11, %817 : vector<8x128xf32>
    %819 = arith.addf %38, %812 : vector<8x128xf32>
    %820 = arith.addf %815, %818 : vector<8x128xf32>
    %821 = arith.addf %819, %820 : vector<8x128xf32>
    %822 = vector.broadcast %cst : f32 to vector<8x128xf32>
    %823 = arith.mulf %822, %821 : vector<8x128xf32>
    %824 = arith.addf %714, %823 : vector<8x128xf32>
    %825 = vector.extract_strided_slice %824 {offsets = [0, 0], sizes = [8, 1], strides = [1, 1]} : vector<8x128xf32> to vector<8x1xf32>
    %826 = vector.broadcast %825 : vector<8x1xf32> to vector<8x128xf32>
    %827 = arith.mulf %826, %14 : vector<8x128xf32>
    %828 = vector.extract_strided_slice %824 {offsets = [0, 1], sizes = [8, 1], strides = [1, 1]} : vector<8x128xf32> to vector<8x1xf32>
    %829 = vector.broadcast %828 : vector<8x1xf32> to vector<8x128xf32>
    %830 = arith.mulf %829, %17 : vector<8x128xf32>
    %831 = arith.addf %827, %830 : vector<8x128xf32>
    %832 = vector.extract_strided_slice %831 {offsets = [0, 0], sizes = [1, 128], strides = [1, 1]} : vector<8x128xf32> to vector<1x128xf32>
    %833 = vector.broadcast %832 : vector<1x128xf32> to vector<8x128xf32>
    %834 = arith.mulf %5, %833 : vector<8x128xf32>
    %835 = vector.extract_strided_slice %831 {offsets = [1, 0], sizes = [1, 128], strides = [1, 1]} : vector<8x128xf32> to vector<1x128xf32>
    %836 = vector.broadcast %835 : vector<1x128xf32> to vector<8x128xf32>
    %837 = arith.mulf %8, %836 : vector<8x128xf32>
    %838 = vector.extract_strided_slice %831 {offsets = [2, 0], sizes = [1, 128], strides = [1, 1]} : vector<8x128xf32> to vector<1x128xf32>
    %839 = vector.broadcast %838 : vector<1x128xf32> to vector<8x128xf32>
    %840 = arith.mulf %11, %839 : vector<8x128xf32>
    %841 = arith.addf %35, %834 : vector<8x128xf32>
    %842 = arith.addf %837, %840 : vector<8x128xf32>
    %843 = arith.addf %841, %842 : vector<8x128xf32>
    %cst_24 = arith.constant 0.000000e+00 : f32
    %844 = vector.broadcast %cst_24 : f32 to vector<8x128xf32>
    %845 = arith.maximumf %843, %844 : vector<8x128xf32>
    %846 = vector.extract_strided_slice %845 {offsets = [0, 0], sizes = [8, 1], strides = [1, 1]} : vector<8x128xf32> to vector<8x1xf32>
    %847 = vector.broadcast %846 : vector<8x1xf32> to vector<8x128xf32>
    %848 = arith.mulf %847, %20 : vector<8x128xf32>
    %849 = vector.extract_strided_slice %845 {offsets = [0, 1], sizes = [8, 1], strides = [1, 1]} : vector<8x128xf32> to vector<8x1xf32>
    %850 = vector.broadcast %849 : vector<8x1xf32> to vector<8x128xf32>
    %851 = arith.mulf %850, %23 : vector<8x128xf32>
    %852 = vector.extract_strided_slice %845 {offsets = [0, 2], sizes = [8, 1], strides = [1, 1]} : vector<8x128xf32> to vector<8x1xf32>
    %853 = vector.broadcast %852 : vector<8x1xf32> to vector<8x128xf32>
    %854 = arith.mulf %853, %26 : vector<8x128xf32>
    %855 = vector.extract_strided_slice %845 {offsets = [0, 3], sizes = [8, 1], strides = [1, 1]} : vector<8x128xf32> to vector<8x1xf32>
    %856 = vector.broadcast %855 : vector<8x1xf32> to vector<8x128xf32>
    %857 = arith.mulf %856, %29 : vector<8x128xf32>
    %858 = vector.extract_strided_slice %845 {offsets = [0, 4], sizes = [8, 1], strides = [1, 1]} : vector<8x128xf32> to vector<8x1xf32>
    %859 = vector.broadcast %858 : vector<8x1xf32> to vector<8x128xf32>
    %860 = arith.mulf %859, %32 : vector<8x128xf32>
    %861 = arith.addf %848, %851 : vector<8x128xf32>
    %862 = arith.addf %854, %857 : vector<8x128xf32>
    %863 = arith.addf %861, %862 : vector<8x128xf32>
    %864 = arith.addf %863, %860 : vector<8x128xf32>
    %865 = vector.extract_strided_slice %864 {offsets = [0, 0], sizes = [1, 128], strides = [1, 1]} : vector<8x128xf32> to vector<1x128xf32>
    %866 = vector.broadcast %865 : vector<1x128xf32> to vector<8x128xf32>
    %867 = arith.mulf %5, %866 : vector<8x128xf32>
    %868 = vector.extract_strided_slice %864 {offsets = [1, 0], sizes = [1, 128], strides = [1, 1]} : vector<8x128xf32> to vector<1x128xf32>
    %869 = vector.broadcast %868 : vector<1x128xf32> to vector<8x128xf32>
    %870 = arith.mulf %8, %869 : vector<8x128xf32>
    %871 = vector.extract_strided_slice %864 {offsets = [2, 0], sizes = [1, 128], strides = [1, 1]} : vector<8x128xf32> to vector<1x128xf32>
    %872 = vector.broadcast %871 : vector<1x128xf32> to vector<8x128xf32>
    %873 = arith.mulf %11, %872 : vector<8x128xf32>
    %874 = arith.addf %38, %867 : vector<8x128xf32>
    %875 = arith.addf %870, %873 : vector<8x128xf32>
    %876 = arith.addf %874, %875 : vector<8x128xf32>
    %877 = vector.broadcast %cst_5 : f32 to vector<8x128xf32>
    %878 = arith.mulf %877, %876 : vector<8x128xf32>
    %879 = arith.addf %714, %878 : vector<8x128xf32>
    %880 = vector.extract_strided_slice %879 {offsets = [0, 0], sizes = [8, 1], strides = [1, 1]} : vector<8x128xf32> to vector<8x1xf32>
    %881 = vector.broadcast %880 : vector<8x1xf32> to vector<8x128xf32>
    %882 = arith.mulf %881, %14 : vector<8x128xf32>
    %883 = vector.extract_strided_slice %879 {offsets = [0, 1], sizes = [8, 1], strides = [1, 1]} : vector<8x128xf32> to vector<8x1xf32>
    %884 = vector.broadcast %883 : vector<8x1xf32> to vector<8x128xf32>
    %885 = arith.mulf %884, %17 : vector<8x128xf32>
    %886 = arith.addf %882, %885 : vector<8x128xf32>
    %887 = vector.extract_strided_slice %886 {offsets = [0, 0], sizes = [1, 128], strides = [1, 1]} : vector<8x128xf32> to vector<1x128xf32>
    %888 = vector.broadcast %887 : vector<1x128xf32> to vector<8x128xf32>
    %889 = arith.mulf %5, %888 : vector<8x128xf32>
    %890 = vector.extract_strided_slice %886 {offsets = [1, 0], sizes = [1, 128], strides = [1, 1]} : vector<8x128xf32> to vector<1x128xf32>
    %891 = vector.broadcast %890 : vector<1x128xf32> to vector<8x128xf32>
    %892 = arith.mulf %8, %891 : vector<8x128xf32>
    %893 = vector.extract_strided_slice %886 {offsets = [2, 0], sizes = [1, 128], strides = [1, 1]} : vector<8x128xf32> to vector<1x128xf32>
    %894 = vector.broadcast %893 : vector<1x128xf32> to vector<8x128xf32>
    %895 = arith.mulf %11, %894 : vector<8x128xf32>
    %896 = arith.addf %35, %889 : vector<8x128xf32>
    %897 = arith.addf %892, %895 : vector<8x128xf32>
    %898 = arith.addf %896, %897 : vector<8x128xf32>
    %cst_25 = arith.constant 0.000000e+00 : f32
    %899 = vector.broadcast %cst_25 : f32 to vector<8x128xf32>
    %900 = arith.maximumf %898, %899 : vector<8x128xf32>
    %901 = vector.extract_strided_slice %900 {offsets = [0, 0], sizes = [8, 1], strides = [1, 1]} : vector<8x128xf32> to vector<8x1xf32>
    %902 = vector.broadcast %901 : vector<8x1xf32> to vector<8x128xf32>
    %903 = arith.mulf %902, %20 : vector<8x128xf32>
    %904 = vector.extract_strided_slice %900 {offsets = [0, 1], sizes = [8, 1], strides = [1, 1]} : vector<8x128xf32> to vector<8x1xf32>
    %905 = vector.broadcast %904 : vector<8x1xf32> to vector<8x128xf32>
    %906 = arith.mulf %905, %23 : vector<8x128xf32>
    %907 = vector.extract_strided_slice %900 {offsets = [0, 2], sizes = [8, 1], strides = [1, 1]} : vector<8x128xf32> to vector<8x1xf32>
    %908 = vector.broadcast %907 : vector<8x1xf32> to vector<8x128xf32>
    %909 = arith.mulf %908, %26 : vector<8x128xf32>
    %910 = vector.extract_strided_slice %900 {offsets = [0, 3], sizes = [8, 1], strides = [1, 1]} : vector<8x128xf32> to vector<8x1xf32>
    %911 = vector.broadcast %910 : vector<8x1xf32> to vector<8x128xf32>
    %912 = arith.mulf %911, %29 : vector<8x128xf32>
    %913 = vector.extract_strided_slice %900 {offsets = [0, 4], sizes = [8, 1], strides = [1, 1]} : vector<8x128xf32> to vector<8x1xf32>
    %914 = vector.broadcast %913 : vector<8x1xf32> to vector<8x128xf32>
    %915 = arith.mulf %914, %32 : vector<8x128xf32>
    %916 = arith.addf %903, %906 : vector<8x128xf32>
    %917 = arith.addf %909, %912 : vector<8x128xf32>
    %918 = arith.addf %916, %917 : vector<8x128xf32>
    %919 = arith.addf %918, %915 : vector<8x128xf32>
    %920 = vector.extract_strided_slice %919 {offsets = [0, 0], sizes = [1, 128], strides = [1, 1]} : vector<8x128xf32> to vector<1x128xf32>
    %921 = vector.broadcast %920 : vector<1x128xf32> to vector<8x128xf32>
    %922 = arith.mulf %5, %921 : vector<8x128xf32>
    %923 = vector.extract_strided_slice %919 {offsets = [1, 0], sizes = [1, 128], strides = [1, 1]} : vector<8x128xf32> to vector<1x128xf32>
    %924 = vector.broadcast %923 : vector<1x128xf32> to vector<8x128xf32>
    %925 = arith.mulf %8, %924 : vector<8x128xf32>
    %926 = vector.extract_strided_slice %919 {offsets = [2, 0], sizes = [1, 128], strides = [1, 1]} : vector<8x128xf32> to vector<1x128xf32>
    %927 = vector.broadcast %926 : vector<1x128xf32> to vector<8x128xf32>
    %928 = arith.mulf %11, %927 : vector<8x128xf32>
    %929 = arith.addf %38, %922 : vector<8x128xf32>
    %930 = arith.addf %925, %928 : vector<8x128xf32>
    %931 = arith.addf %929, %930 : vector<8x128xf32>
    %932 = arith.addf %766, %931 : vector<8x128xf32>
    %933 = arith.addf %821, %876 : vector<8x128xf32>
    %cst_26 = arith.constant 2.000000e+00 : f32
    %934 = vector.broadcast %cst_26 : f32 to vector<8x128xf32>
    %935 = arith.mulf %934, %933 : vector<8x128xf32>
    %936 = arith.addf %932, %935 : vector<8x128xf32>
    %937 = vector.broadcast %cst_6 : f32 to vector<8x128xf32>
    %938 = arith.mulf %937, %936 : vector<8x128xf32>
    %939 = arith.addf %714, %938 : vector<8x128xf32>
    %c4_i32 = arith.constant 4 : i32
    %940 = vector.extract_strided_slice %939 {offsets = [0, 0], sizes = [8, 1], strides = [1, 1]} : vector<8x128xf32> to vector<8x1xf32>
    %941 = vector.broadcast %940 : vector<8x1xf32> to vector<8x128xf32>
    %942 = arith.mulf %941, %14 : vector<8x128xf32>
    %943 = vector.extract_strided_slice %939 {offsets = [0, 1], sizes = [8, 1], strides = [1, 1]} : vector<8x128xf32> to vector<8x1xf32>
    %944 = vector.broadcast %943 : vector<8x1xf32> to vector<8x128xf32>
    %945 = arith.mulf %944, %17 : vector<8x128xf32>
    %946 = arith.addf %942, %945 : vector<8x128xf32>
    %947 = vector.extract_strided_slice %946 {offsets = [0, 0], sizes = [1, 128], strides = [1, 1]} : vector<8x128xf32> to vector<1x128xf32>
    %948 = vector.broadcast %947 : vector<1x128xf32> to vector<8x128xf32>
    %949 = arith.mulf %5, %948 : vector<8x128xf32>
    %950 = vector.extract_strided_slice %946 {offsets = [1, 0], sizes = [1, 128], strides = [1, 1]} : vector<8x128xf32> to vector<1x128xf32>
    %951 = vector.broadcast %950 : vector<1x128xf32> to vector<8x128xf32>
    %952 = arith.mulf %8, %951 : vector<8x128xf32>
    %953 = vector.extract_strided_slice %946 {offsets = [2, 0], sizes = [1, 128], strides = [1, 1]} : vector<8x128xf32> to vector<1x128xf32>
    %954 = vector.broadcast %953 : vector<1x128xf32> to vector<8x128xf32>
    %955 = arith.mulf %11, %954 : vector<8x128xf32>
    %956 = arith.addf %35, %949 : vector<8x128xf32>
    %957 = arith.addf %952, %955 : vector<8x128xf32>
    %958 = arith.addf %956, %957 : vector<8x128xf32>
    %cst_27 = arith.constant 0.000000e+00 : f32
    %959 = vector.broadcast %cst_27 : f32 to vector<8x128xf32>
    %960 = arith.maximumf %958, %959 : vector<8x128xf32>
    %961 = vector.extract_strided_slice %960 {offsets = [0, 0], sizes = [8, 1], strides = [1, 1]} : vector<8x128xf32> to vector<8x1xf32>
    %962 = vector.broadcast %961 : vector<8x1xf32> to vector<8x128xf32>
    %963 = arith.mulf %962, %20 : vector<8x128xf32>
    %964 = vector.extract_strided_slice %960 {offsets = [0, 1], sizes = [8, 1], strides = [1, 1]} : vector<8x128xf32> to vector<8x1xf32>
    %965 = vector.broadcast %964 : vector<8x1xf32> to vector<8x128xf32>
    %966 = arith.mulf %965, %23 : vector<8x128xf32>
    %967 = vector.extract_strided_slice %960 {offsets = [0, 2], sizes = [8, 1], strides = [1, 1]} : vector<8x128xf32> to vector<8x1xf32>
    %968 = vector.broadcast %967 : vector<8x1xf32> to vector<8x128xf32>
    %969 = arith.mulf %968, %26 : vector<8x128xf32>
    %970 = vector.extract_strided_slice %960 {offsets = [0, 3], sizes = [8, 1], strides = [1, 1]} : vector<8x128xf32> to vector<8x1xf32>
    %971 = vector.broadcast %970 : vector<8x1xf32> to vector<8x128xf32>
    %972 = arith.mulf %971, %29 : vector<8x128xf32>
    %973 = vector.extract_strided_slice %960 {offsets = [0, 4], sizes = [8, 1], strides = [1, 1]} : vector<8x128xf32> to vector<8x1xf32>
    %974 = vector.broadcast %973 : vector<8x1xf32> to vector<8x128xf32>
    %975 = arith.mulf %974, %32 : vector<8x128xf32>
    %976 = arith.addf %963, %966 : vector<8x128xf32>
    %977 = arith.addf %969, %972 : vector<8x128xf32>
    %978 = arith.addf %976, %977 : vector<8x128xf32>
    %979 = arith.addf %978, %975 : vector<8x128xf32>
    %980 = vector.extract_strided_slice %979 {offsets = [0, 0], sizes = [1, 128], strides = [1, 1]} : vector<8x128xf32> to vector<1x128xf32>
    %981 = vector.broadcast %980 : vector<1x128xf32> to vector<8x128xf32>
    %982 = arith.mulf %5, %981 : vector<8x128xf32>
    %983 = vector.extract_strided_slice %979 {offsets = [1, 0], sizes = [1, 128], strides = [1, 1]} : vector<8x128xf32> to vector<1x128xf32>
    %984 = vector.broadcast %983 : vector<1x128xf32> to vector<8x128xf32>
    %985 = arith.mulf %8, %984 : vector<8x128xf32>
    %986 = vector.extract_strided_slice %979 {offsets = [2, 0], sizes = [1, 128], strides = [1, 1]} : vector<8x128xf32> to vector<1x128xf32>
    %987 = vector.broadcast %986 : vector<1x128xf32> to vector<8x128xf32>
    %988 = arith.mulf %11, %987 : vector<8x128xf32>
    %989 = arith.addf %38, %982 : vector<8x128xf32>
    %990 = arith.addf %985, %988 : vector<8x128xf32>
    %991 = arith.addf %989, %990 : vector<8x128xf32>
    %992 = vector.broadcast %cst : f32 to vector<8x128xf32>
    %993 = arith.mulf %992, %991 : vector<8x128xf32>
    %994 = arith.addf %939, %993 : vector<8x128xf32>
    %995 = vector.extract_strided_slice %994 {offsets = [0, 0], sizes = [8, 1], strides = [1, 1]} : vector<8x128xf32> to vector<8x1xf32>
    %996 = vector.broadcast %995 : vector<8x1xf32> to vector<8x128xf32>
    %997 = arith.mulf %996, %14 : vector<8x128xf32>
    %998 = vector.extract_strided_slice %994 {offsets = [0, 1], sizes = [8, 1], strides = [1, 1]} : vector<8x128xf32> to vector<8x1xf32>
    %999 = vector.broadcast %998 : vector<8x1xf32> to vector<8x128xf32>
    %1000 = arith.mulf %999, %17 : vector<8x128xf32>
    %1001 = arith.addf %997, %1000 : vector<8x128xf32>
    %1002 = vector.extract_strided_slice %1001 {offsets = [0, 0], sizes = [1, 128], strides = [1, 1]} : vector<8x128xf32> to vector<1x128xf32>
    %1003 = vector.broadcast %1002 : vector<1x128xf32> to vector<8x128xf32>
    %1004 = arith.mulf %5, %1003 : vector<8x128xf32>
    %1005 = vector.extract_strided_slice %1001 {offsets = [1, 0], sizes = [1, 128], strides = [1, 1]} : vector<8x128xf32> to vector<1x128xf32>
    %1006 = vector.broadcast %1005 : vector<1x128xf32> to vector<8x128xf32>
    %1007 = arith.mulf %8, %1006 : vector<8x128xf32>
    %1008 = vector.extract_strided_slice %1001 {offsets = [2, 0], sizes = [1, 128], strides = [1, 1]} : vector<8x128xf32> to vector<1x128xf32>
    %1009 = vector.broadcast %1008 : vector<1x128xf32> to vector<8x128xf32>
    %1010 = arith.mulf %11, %1009 : vector<8x128xf32>
    %1011 = arith.addf %35, %1004 : vector<8x128xf32>
    %1012 = arith.addf %1007, %1010 : vector<8x128xf32>
    %1013 = arith.addf %1011, %1012 : vector<8x128xf32>
    %cst_28 = arith.constant 0.000000e+00 : f32
    %1014 = vector.broadcast %cst_28 : f32 to vector<8x128xf32>
    %1015 = arith.maximumf %1013, %1014 : vector<8x128xf32>
    %1016 = vector.extract_strided_slice %1015 {offsets = [0, 0], sizes = [8, 1], strides = [1, 1]} : vector<8x128xf32> to vector<8x1xf32>
    %1017 = vector.broadcast %1016 : vector<8x1xf32> to vector<8x128xf32>
    %1018 = arith.mulf %1017, %20 : vector<8x128xf32>
    %1019 = vector.extract_strided_slice %1015 {offsets = [0, 1], sizes = [8, 1], strides = [1, 1]} : vector<8x128xf32> to vector<8x1xf32>
    %1020 = vector.broadcast %1019 : vector<8x1xf32> to vector<8x128xf32>
    %1021 = arith.mulf %1020, %23 : vector<8x128xf32>
    %1022 = vector.extract_strided_slice %1015 {offsets = [0, 2], sizes = [8, 1], strides = [1, 1]} : vector<8x128xf32> to vector<8x1xf32>
    %1023 = vector.broadcast %1022 : vector<8x1xf32> to vector<8x128xf32>
    %1024 = arith.mulf %1023, %26 : vector<8x128xf32>
    %1025 = vector.extract_strided_slice %1015 {offsets = [0, 3], sizes = [8, 1], strides = [1, 1]} : vector<8x128xf32> to vector<8x1xf32>
    %1026 = vector.broadcast %1025 : vector<8x1xf32> to vector<8x128xf32>
    %1027 = arith.mulf %1026, %29 : vector<8x128xf32>
    %1028 = vector.extract_strided_slice %1015 {offsets = [0, 4], sizes = [8, 1], strides = [1, 1]} : vector<8x128xf32> to vector<8x1xf32>
    %1029 = vector.broadcast %1028 : vector<8x1xf32> to vector<8x128xf32>
    %1030 = arith.mulf %1029, %32 : vector<8x128xf32>
    %1031 = arith.addf %1018, %1021 : vector<8x128xf32>
    %1032 = arith.addf %1024, %1027 : vector<8x128xf32>
    %1033 = arith.addf %1031, %1032 : vector<8x128xf32>
    %1034 = arith.addf %1033, %1030 : vector<8x128xf32>
    %1035 = vector.extract_strided_slice %1034 {offsets = [0, 0], sizes = [1, 128], strides = [1, 1]} : vector<8x128xf32> to vector<1x128xf32>
    %1036 = vector.broadcast %1035 : vector<1x128xf32> to vector<8x128xf32>
    %1037 = arith.mulf %5, %1036 : vector<8x128xf32>
    %1038 = vector.extract_strided_slice %1034 {offsets = [1, 0], sizes = [1, 128], strides = [1, 1]} : vector<8x128xf32> to vector<1x128xf32>
    %1039 = vector.broadcast %1038 : vector<1x128xf32> to vector<8x128xf32>
    %1040 = arith.mulf %8, %1039 : vector<8x128xf32>
    %1041 = vector.extract_strided_slice %1034 {offsets = [2, 0], sizes = [1, 128], strides = [1, 1]} : vector<8x128xf32> to vector<1x128xf32>
    %1042 = vector.broadcast %1041 : vector<1x128xf32> to vector<8x128xf32>
    %1043 = arith.mulf %11, %1042 : vector<8x128xf32>
    %1044 = arith.addf %38, %1037 : vector<8x128xf32>
    %1045 = arith.addf %1040, %1043 : vector<8x128xf32>
    %1046 = arith.addf %1044, %1045 : vector<8x128xf32>
    %1047 = vector.broadcast %cst : f32 to vector<8x128xf32>
    %1048 = arith.mulf %1047, %1046 : vector<8x128xf32>
    %1049 = arith.addf %939, %1048 : vector<8x128xf32>
    %1050 = vector.extract_strided_slice %1049 {offsets = [0, 0], sizes = [8, 1], strides = [1, 1]} : vector<8x128xf32> to vector<8x1xf32>
    %1051 = vector.broadcast %1050 : vector<8x1xf32> to vector<8x128xf32>
    %1052 = arith.mulf %1051, %14 : vector<8x128xf32>
    %1053 = vector.extract_strided_slice %1049 {offsets = [0, 1], sizes = [8, 1], strides = [1, 1]} : vector<8x128xf32> to vector<8x1xf32>
    %1054 = vector.broadcast %1053 : vector<8x1xf32> to vector<8x128xf32>
    %1055 = arith.mulf %1054, %17 : vector<8x128xf32>
    %1056 = arith.addf %1052, %1055 : vector<8x128xf32>
    %1057 = vector.extract_strided_slice %1056 {offsets = [0, 0], sizes = [1, 128], strides = [1, 1]} : vector<8x128xf32> to vector<1x128xf32>
    %1058 = vector.broadcast %1057 : vector<1x128xf32> to vector<8x128xf32>
    %1059 = arith.mulf %5, %1058 : vector<8x128xf32>
    %1060 = vector.extract_strided_slice %1056 {offsets = [1, 0], sizes = [1, 128], strides = [1, 1]} : vector<8x128xf32> to vector<1x128xf32>
    %1061 = vector.broadcast %1060 : vector<1x128xf32> to vector<8x128xf32>
    %1062 = arith.mulf %8, %1061 : vector<8x128xf32>
    %1063 = vector.extract_strided_slice %1056 {offsets = [2, 0], sizes = [1, 128], strides = [1, 1]} : vector<8x128xf32> to vector<1x128xf32>
    %1064 = vector.broadcast %1063 : vector<1x128xf32> to vector<8x128xf32>
    %1065 = arith.mulf %11, %1064 : vector<8x128xf32>
    %1066 = arith.addf %35, %1059 : vector<8x128xf32>
    %1067 = arith.addf %1062, %1065 : vector<8x128xf32>
    %1068 = arith.addf %1066, %1067 : vector<8x128xf32>
    %cst_29 = arith.constant 0.000000e+00 : f32
    %1069 = vector.broadcast %cst_29 : f32 to vector<8x128xf32>
    %1070 = arith.maximumf %1068, %1069 : vector<8x128xf32>
    %1071 = vector.extract_strided_slice %1070 {offsets = [0, 0], sizes = [8, 1], strides = [1, 1]} : vector<8x128xf32> to vector<8x1xf32>
    %1072 = vector.broadcast %1071 : vector<8x1xf32> to vector<8x128xf32>
    %1073 = arith.mulf %1072, %20 : vector<8x128xf32>
    %1074 = vector.extract_strided_slice %1070 {offsets = [0, 1], sizes = [8, 1], strides = [1, 1]} : vector<8x128xf32> to vector<8x1xf32>
    %1075 = vector.broadcast %1074 : vector<8x1xf32> to vector<8x128xf32>
    %1076 = arith.mulf %1075, %23 : vector<8x128xf32>
    %1077 = vector.extract_strided_slice %1070 {offsets = [0, 2], sizes = [8, 1], strides = [1, 1]} : vector<8x128xf32> to vector<8x1xf32>
    %1078 = vector.broadcast %1077 : vector<8x1xf32> to vector<8x128xf32>
    %1079 = arith.mulf %1078, %26 : vector<8x128xf32>
    %1080 = vector.extract_strided_slice %1070 {offsets = [0, 3], sizes = [8, 1], strides = [1, 1]} : vector<8x128xf32> to vector<8x1xf32>
    %1081 = vector.broadcast %1080 : vector<8x1xf32> to vector<8x128xf32>
    %1082 = arith.mulf %1081, %29 : vector<8x128xf32>
    %1083 = vector.extract_strided_slice %1070 {offsets = [0, 4], sizes = [8, 1], strides = [1, 1]} : vector<8x128xf32> to vector<8x1xf32>
    %1084 = vector.broadcast %1083 : vector<8x1xf32> to vector<8x128xf32>
    %1085 = arith.mulf %1084, %32 : vector<8x128xf32>
    %1086 = arith.addf %1073, %1076 : vector<8x128xf32>
    %1087 = arith.addf %1079, %1082 : vector<8x128xf32>
    %1088 = arith.addf %1086, %1087 : vector<8x128xf32>
    %1089 = arith.addf %1088, %1085 : vector<8x128xf32>
    %1090 = vector.extract_strided_slice %1089 {offsets = [0, 0], sizes = [1, 128], strides = [1, 1]} : vector<8x128xf32> to vector<1x128xf32>
    %1091 = vector.broadcast %1090 : vector<1x128xf32> to vector<8x128xf32>
    %1092 = arith.mulf %5, %1091 : vector<8x128xf32>
    %1093 = vector.extract_strided_slice %1089 {offsets = [1, 0], sizes = [1, 128], strides = [1, 1]} : vector<8x128xf32> to vector<1x128xf32>
    %1094 = vector.broadcast %1093 : vector<1x128xf32> to vector<8x128xf32>
    %1095 = arith.mulf %8, %1094 : vector<8x128xf32>
    %1096 = vector.extract_strided_slice %1089 {offsets = [2, 0], sizes = [1, 128], strides = [1, 1]} : vector<8x128xf32> to vector<1x128xf32>
    %1097 = vector.broadcast %1096 : vector<1x128xf32> to vector<8x128xf32>
    %1098 = arith.mulf %11, %1097 : vector<8x128xf32>
    %1099 = arith.addf %38, %1092 : vector<8x128xf32>
    %1100 = arith.addf %1095, %1098 : vector<8x128xf32>
    %1101 = arith.addf %1099, %1100 : vector<8x128xf32>
    %1102 = vector.broadcast %cst_5 : f32 to vector<8x128xf32>
    %1103 = arith.mulf %1102, %1101 : vector<8x128xf32>
    %1104 = arith.addf %939, %1103 : vector<8x128xf32>
    %1105 = vector.extract_strided_slice %1104 {offsets = [0, 0], sizes = [8, 1], strides = [1, 1]} : vector<8x128xf32> to vector<8x1xf32>
    %1106 = vector.broadcast %1105 : vector<8x1xf32> to vector<8x128xf32>
    %1107 = arith.mulf %1106, %14 : vector<8x128xf32>
    %1108 = vector.extract_strided_slice %1104 {offsets = [0, 1], sizes = [8, 1], strides = [1, 1]} : vector<8x128xf32> to vector<8x1xf32>
    %1109 = vector.broadcast %1108 : vector<8x1xf32> to vector<8x128xf32>
    %1110 = arith.mulf %1109, %17 : vector<8x128xf32>
    %1111 = arith.addf %1107, %1110 : vector<8x128xf32>
    %1112 = vector.extract_strided_slice %1111 {offsets = [0, 0], sizes = [1, 128], strides = [1, 1]} : vector<8x128xf32> to vector<1x128xf32>
    %1113 = vector.broadcast %1112 : vector<1x128xf32> to vector<8x128xf32>
    %1114 = arith.mulf %5, %1113 : vector<8x128xf32>
    %1115 = vector.extract_strided_slice %1111 {offsets = [1, 0], sizes = [1, 128], strides = [1, 1]} : vector<8x128xf32> to vector<1x128xf32>
    %1116 = vector.broadcast %1115 : vector<1x128xf32> to vector<8x128xf32>
    %1117 = arith.mulf %8, %1116 : vector<8x128xf32>
    %1118 = vector.extract_strided_slice %1111 {offsets = [2, 0], sizes = [1, 128], strides = [1, 1]} : vector<8x128xf32> to vector<1x128xf32>
    %1119 = vector.broadcast %1118 : vector<1x128xf32> to vector<8x128xf32>
    %1120 = arith.mulf %11, %1119 : vector<8x128xf32>
    %1121 = arith.addf %35, %1114 : vector<8x128xf32>
    %1122 = arith.addf %1117, %1120 : vector<8x128xf32>
    %1123 = arith.addf %1121, %1122 : vector<8x128xf32>
    %cst_30 = arith.constant 0.000000e+00 : f32
    %1124 = vector.broadcast %cst_30 : f32 to vector<8x128xf32>
    %1125 = arith.maximumf %1123, %1124 : vector<8x128xf32>
    %1126 = vector.extract_strided_slice %1125 {offsets = [0, 0], sizes = [8, 1], strides = [1, 1]} : vector<8x128xf32> to vector<8x1xf32>
    %1127 = vector.broadcast %1126 : vector<8x1xf32> to vector<8x128xf32>
    %1128 = arith.mulf %1127, %20 : vector<8x128xf32>
    %1129 = vector.extract_strided_slice %1125 {offsets = [0, 1], sizes = [8, 1], strides = [1, 1]} : vector<8x128xf32> to vector<8x1xf32>
    %1130 = vector.broadcast %1129 : vector<8x1xf32> to vector<8x128xf32>
    %1131 = arith.mulf %1130, %23 : vector<8x128xf32>
    %1132 = vector.extract_strided_slice %1125 {offsets = [0, 2], sizes = [8, 1], strides = [1, 1]} : vector<8x128xf32> to vector<8x1xf32>
    %1133 = vector.broadcast %1132 : vector<8x1xf32> to vector<8x128xf32>
    %1134 = arith.mulf %1133, %26 : vector<8x128xf32>
    %1135 = vector.extract_strided_slice %1125 {offsets = [0, 3], sizes = [8, 1], strides = [1, 1]} : vector<8x128xf32> to vector<8x1xf32>
    %1136 = vector.broadcast %1135 : vector<8x1xf32> to vector<8x128xf32>
    %1137 = arith.mulf %1136, %29 : vector<8x128xf32>
    %1138 = vector.extract_strided_slice %1125 {offsets = [0, 4], sizes = [8, 1], strides = [1, 1]} : vector<8x128xf32> to vector<8x1xf32>
    %1139 = vector.broadcast %1138 : vector<8x1xf32> to vector<8x128xf32>
    %1140 = arith.mulf %1139, %32 : vector<8x128xf32>
    %1141 = arith.addf %1128, %1131 : vector<8x128xf32>
    %1142 = arith.addf %1134, %1137 : vector<8x128xf32>
    %1143 = arith.addf %1141, %1142 : vector<8x128xf32>
    %1144 = arith.addf %1143, %1140 : vector<8x128xf32>
    %1145 = vector.extract_strided_slice %1144 {offsets = [0, 0], sizes = [1, 128], strides = [1, 1]} : vector<8x128xf32> to vector<1x128xf32>
    %1146 = vector.broadcast %1145 : vector<1x128xf32> to vector<8x128xf32>
    %1147 = arith.mulf %5, %1146 : vector<8x128xf32>
    %1148 = vector.extract_strided_slice %1144 {offsets = [1, 0], sizes = [1, 128], strides = [1, 1]} : vector<8x128xf32> to vector<1x128xf32>
    %1149 = vector.broadcast %1148 : vector<1x128xf32> to vector<8x128xf32>
    %1150 = arith.mulf %8, %1149 : vector<8x128xf32>
    %1151 = vector.extract_strided_slice %1144 {offsets = [2, 0], sizes = [1, 128], strides = [1, 1]} : vector<8x128xf32> to vector<1x128xf32>
    %1152 = vector.broadcast %1151 : vector<1x128xf32> to vector<8x128xf32>
    %1153 = arith.mulf %11, %1152 : vector<8x128xf32>
    %1154 = arith.addf %38, %1147 : vector<8x128xf32>
    %1155 = arith.addf %1150, %1153 : vector<8x128xf32>
    %1156 = arith.addf %1154, %1155 : vector<8x128xf32>
    %1157 = arith.addf %991, %1156 : vector<8x128xf32>
    %1158 = arith.addf %1046, %1101 : vector<8x128xf32>
    %cst_31 = arith.constant 2.000000e+00 : f32
    %1159 = vector.broadcast %cst_31 : f32 to vector<8x128xf32>
    %1160 = arith.mulf %1159, %1158 : vector<8x128xf32>
    %1161 = arith.addf %1157, %1160 : vector<8x128xf32>
    %1162 = vector.broadcast %cst_6 : f32 to vector<8x128xf32>
    %1163 = arith.mulf %1162, %1161 : vector<8x128xf32>
    %1164 = arith.addf %939, %1163 : vector<8x128xf32>
    %c5_i32 = arith.constant 5 : i32
    %1165 = vector.extract_strided_slice %1164 {offsets = [0, 0], sizes = [8, 1], strides = [1, 1]} : vector<8x128xf32> to vector<8x1xf32>
    %1166 = vector.broadcast %1165 : vector<8x1xf32> to vector<8x128xf32>
    %1167 = arith.mulf %1166, %14 : vector<8x128xf32>
    %1168 = vector.extract_strided_slice %1164 {offsets = [0, 1], sizes = [8, 1], strides = [1, 1]} : vector<8x128xf32> to vector<8x1xf32>
    %1169 = vector.broadcast %1168 : vector<8x1xf32> to vector<8x128xf32>
    %1170 = arith.mulf %1169, %17 : vector<8x128xf32>
    %1171 = arith.addf %1167, %1170 : vector<8x128xf32>
    %1172 = vector.extract_strided_slice %1171 {offsets = [0, 0], sizes = [1, 128], strides = [1, 1]} : vector<8x128xf32> to vector<1x128xf32>
    %1173 = vector.broadcast %1172 : vector<1x128xf32> to vector<8x128xf32>
    %1174 = arith.mulf %5, %1173 : vector<8x128xf32>
    %1175 = vector.extract_strided_slice %1171 {offsets = [1, 0], sizes = [1, 128], strides = [1, 1]} : vector<8x128xf32> to vector<1x128xf32>
    %1176 = vector.broadcast %1175 : vector<1x128xf32> to vector<8x128xf32>
    %1177 = arith.mulf %8, %1176 : vector<8x128xf32>
    %1178 = vector.extract_strided_slice %1171 {offsets = [2, 0], sizes = [1, 128], strides = [1, 1]} : vector<8x128xf32> to vector<1x128xf32>
    %1179 = vector.broadcast %1178 : vector<1x128xf32> to vector<8x128xf32>
    %1180 = arith.mulf %11, %1179 : vector<8x128xf32>
    %1181 = arith.addf %35, %1174 : vector<8x128xf32>
    %1182 = arith.addf %1177, %1180 : vector<8x128xf32>
    %1183 = arith.addf %1181, %1182 : vector<8x128xf32>
    %cst_32 = arith.constant 0.000000e+00 : f32
    %1184 = vector.broadcast %cst_32 : f32 to vector<8x128xf32>
    %1185 = arith.maximumf %1183, %1184 : vector<8x128xf32>
    %1186 = vector.extract_strided_slice %1185 {offsets = [0, 0], sizes = [8, 1], strides = [1, 1]} : vector<8x128xf32> to vector<8x1xf32>
    %1187 = vector.broadcast %1186 : vector<8x1xf32> to vector<8x128xf32>
    %1188 = arith.mulf %1187, %20 : vector<8x128xf32>
    %1189 = vector.extract_strided_slice %1185 {offsets = [0, 1], sizes = [8, 1], strides = [1, 1]} : vector<8x128xf32> to vector<8x1xf32>
    %1190 = vector.broadcast %1189 : vector<8x1xf32> to vector<8x128xf32>
    %1191 = arith.mulf %1190, %23 : vector<8x128xf32>
    %1192 = vector.extract_strided_slice %1185 {offsets = [0, 2], sizes = [8, 1], strides = [1, 1]} : vector<8x128xf32> to vector<8x1xf32>
    %1193 = vector.broadcast %1192 : vector<8x1xf32> to vector<8x128xf32>
    %1194 = arith.mulf %1193, %26 : vector<8x128xf32>
    %1195 = vector.extract_strided_slice %1185 {offsets = [0, 3], sizes = [8, 1], strides = [1, 1]} : vector<8x128xf32> to vector<8x1xf32>
    %1196 = vector.broadcast %1195 : vector<8x1xf32> to vector<8x128xf32>
    %1197 = arith.mulf %1196, %29 : vector<8x128xf32>
    %1198 = vector.extract_strided_slice %1185 {offsets = [0, 4], sizes = [8, 1], strides = [1, 1]} : vector<8x128xf32> to vector<8x1xf32>
    %1199 = vector.broadcast %1198 : vector<8x1xf32> to vector<8x128xf32>
    %1200 = arith.mulf %1199, %32 : vector<8x128xf32>
    %1201 = arith.addf %1188, %1191 : vector<8x128xf32>
    %1202 = arith.addf %1194, %1197 : vector<8x128xf32>
    %1203 = arith.addf %1201, %1202 : vector<8x128xf32>
    %1204 = arith.addf %1203, %1200 : vector<8x128xf32>
    %1205 = vector.extract_strided_slice %1204 {offsets = [0, 0], sizes = [1, 128], strides = [1, 1]} : vector<8x128xf32> to vector<1x128xf32>
    %1206 = vector.broadcast %1205 : vector<1x128xf32> to vector<8x128xf32>
    %1207 = arith.mulf %5, %1206 : vector<8x128xf32>
    %1208 = vector.extract_strided_slice %1204 {offsets = [1, 0], sizes = [1, 128], strides = [1, 1]} : vector<8x128xf32> to vector<1x128xf32>
    %1209 = vector.broadcast %1208 : vector<1x128xf32> to vector<8x128xf32>
    %1210 = arith.mulf %8, %1209 : vector<8x128xf32>
    %1211 = vector.extract_strided_slice %1204 {offsets = [2, 0], sizes = [1, 128], strides = [1, 1]} : vector<8x128xf32> to vector<1x128xf32>
    %1212 = vector.broadcast %1211 : vector<1x128xf32> to vector<8x128xf32>
    %1213 = arith.mulf %11, %1212 : vector<8x128xf32>
    %1214 = arith.addf %38, %1207 : vector<8x128xf32>
    %1215 = arith.addf %1210, %1213 : vector<8x128xf32>
    %1216 = arith.addf %1214, %1215 : vector<8x128xf32>
    %1217 = vector.broadcast %cst : f32 to vector<8x128xf32>
    %1218 = arith.mulf %1217, %1216 : vector<8x128xf32>
    %1219 = arith.addf %1164, %1218 : vector<8x128xf32>
    %1220 = vector.extract_strided_slice %1219 {offsets = [0, 0], sizes = [8, 1], strides = [1, 1]} : vector<8x128xf32> to vector<8x1xf32>
    %1221 = vector.broadcast %1220 : vector<8x1xf32> to vector<8x128xf32>
    %1222 = arith.mulf %1221, %14 : vector<8x128xf32>
    %1223 = vector.extract_strided_slice %1219 {offsets = [0, 1], sizes = [8, 1], strides = [1, 1]} : vector<8x128xf32> to vector<8x1xf32>
    %1224 = vector.broadcast %1223 : vector<8x1xf32> to vector<8x128xf32>
    %1225 = arith.mulf %1224, %17 : vector<8x128xf32>
    %1226 = arith.addf %1222, %1225 : vector<8x128xf32>
    %1227 = vector.extract_strided_slice %1226 {offsets = [0, 0], sizes = [1, 128], strides = [1, 1]} : vector<8x128xf32> to vector<1x128xf32>
    %1228 = vector.broadcast %1227 : vector<1x128xf32> to vector<8x128xf32>
    %1229 = arith.mulf %5, %1228 : vector<8x128xf32>
    %1230 = vector.extract_strided_slice %1226 {offsets = [1, 0], sizes = [1, 128], strides = [1, 1]} : vector<8x128xf32> to vector<1x128xf32>
    %1231 = vector.broadcast %1230 : vector<1x128xf32> to vector<8x128xf32>
    %1232 = arith.mulf %8, %1231 : vector<8x128xf32>
    %1233 = vector.extract_strided_slice %1226 {offsets = [2, 0], sizes = [1, 128], strides = [1, 1]} : vector<8x128xf32> to vector<1x128xf32>
    %1234 = vector.broadcast %1233 : vector<1x128xf32> to vector<8x128xf32>
    %1235 = arith.mulf %11, %1234 : vector<8x128xf32>
    %1236 = arith.addf %35, %1229 : vector<8x128xf32>
    %1237 = arith.addf %1232, %1235 : vector<8x128xf32>
    %1238 = arith.addf %1236, %1237 : vector<8x128xf32>
    %cst_33 = arith.constant 0.000000e+00 : f32
    %1239 = vector.broadcast %cst_33 : f32 to vector<8x128xf32>
    %1240 = arith.maximumf %1238, %1239 : vector<8x128xf32>
    %1241 = vector.extract_strided_slice %1240 {offsets = [0, 0], sizes = [8, 1], strides = [1, 1]} : vector<8x128xf32> to vector<8x1xf32>
    %1242 = vector.broadcast %1241 : vector<8x1xf32> to vector<8x128xf32>
    %1243 = arith.mulf %1242, %20 : vector<8x128xf32>
    %1244 = vector.extract_strided_slice %1240 {offsets = [0, 1], sizes = [8, 1], strides = [1, 1]} : vector<8x128xf32> to vector<8x1xf32>
    %1245 = vector.broadcast %1244 : vector<8x1xf32> to vector<8x128xf32>
    %1246 = arith.mulf %1245, %23 : vector<8x128xf32>
    %1247 = vector.extract_strided_slice %1240 {offsets = [0, 2], sizes = [8, 1], strides = [1, 1]} : vector<8x128xf32> to vector<8x1xf32>
    %1248 = vector.broadcast %1247 : vector<8x1xf32> to vector<8x128xf32>
    %1249 = arith.mulf %1248, %26 : vector<8x128xf32>
    %1250 = vector.extract_strided_slice %1240 {offsets = [0, 3], sizes = [8, 1], strides = [1, 1]} : vector<8x128xf32> to vector<8x1xf32>
    %1251 = vector.broadcast %1250 : vector<8x1xf32> to vector<8x128xf32>
    %1252 = arith.mulf %1251, %29 : vector<8x128xf32>
    %1253 = vector.extract_strided_slice %1240 {offsets = [0, 4], sizes = [8, 1], strides = [1, 1]} : vector<8x128xf32> to vector<8x1xf32>
    %1254 = vector.broadcast %1253 : vector<8x1xf32> to vector<8x128xf32>
    %1255 = arith.mulf %1254, %32 : vector<8x128xf32>
    %1256 = arith.addf %1243, %1246 : vector<8x128xf32>
    %1257 = arith.addf %1249, %1252 : vector<8x128xf32>
    %1258 = arith.addf %1256, %1257 : vector<8x128xf32>
    %1259 = arith.addf %1258, %1255 : vector<8x128xf32>
    %1260 = vector.extract_strided_slice %1259 {offsets = [0, 0], sizes = [1, 128], strides = [1, 1]} : vector<8x128xf32> to vector<1x128xf32>
    %1261 = vector.broadcast %1260 : vector<1x128xf32> to vector<8x128xf32>
    %1262 = arith.mulf %5, %1261 : vector<8x128xf32>
    %1263 = vector.extract_strided_slice %1259 {offsets = [1, 0], sizes = [1, 128], strides = [1, 1]} : vector<8x128xf32> to vector<1x128xf32>
    %1264 = vector.broadcast %1263 : vector<1x128xf32> to vector<8x128xf32>
    %1265 = arith.mulf %8, %1264 : vector<8x128xf32>
    %1266 = vector.extract_strided_slice %1259 {offsets = [2, 0], sizes = [1, 128], strides = [1, 1]} : vector<8x128xf32> to vector<1x128xf32>
    %1267 = vector.broadcast %1266 : vector<1x128xf32> to vector<8x128xf32>
    %1268 = arith.mulf %11, %1267 : vector<8x128xf32>
    %1269 = arith.addf %38, %1262 : vector<8x128xf32>
    %1270 = arith.addf %1265, %1268 : vector<8x128xf32>
    %1271 = arith.addf %1269, %1270 : vector<8x128xf32>
    %1272 = vector.broadcast %cst : f32 to vector<8x128xf32>
    %1273 = arith.mulf %1272, %1271 : vector<8x128xf32>
    %1274 = arith.addf %1164, %1273 : vector<8x128xf32>
    %1275 = vector.extract_strided_slice %1274 {offsets = [0, 0], sizes = [8, 1], strides = [1, 1]} : vector<8x128xf32> to vector<8x1xf32>
    %1276 = vector.broadcast %1275 : vector<8x1xf32> to vector<8x128xf32>
    %1277 = arith.mulf %1276, %14 : vector<8x128xf32>
    %1278 = vector.extract_strided_slice %1274 {offsets = [0, 1], sizes = [8, 1], strides = [1, 1]} : vector<8x128xf32> to vector<8x1xf32>
    %1279 = vector.broadcast %1278 : vector<8x1xf32> to vector<8x128xf32>
    %1280 = arith.mulf %1279, %17 : vector<8x128xf32>
    %1281 = arith.addf %1277, %1280 : vector<8x128xf32>
    %1282 = vector.extract_strided_slice %1281 {offsets = [0, 0], sizes = [1, 128], strides = [1, 1]} : vector<8x128xf32> to vector<1x128xf32>
    %1283 = vector.broadcast %1282 : vector<1x128xf32> to vector<8x128xf32>
    %1284 = arith.mulf %5, %1283 : vector<8x128xf32>
    %1285 = vector.extract_strided_slice %1281 {offsets = [1, 0], sizes = [1, 128], strides = [1, 1]} : vector<8x128xf32> to vector<1x128xf32>
    %1286 = vector.broadcast %1285 : vector<1x128xf32> to vector<8x128xf32>
    %1287 = arith.mulf %8, %1286 : vector<8x128xf32>
    %1288 = vector.extract_strided_slice %1281 {offsets = [2, 0], sizes = [1, 128], strides = [1, 1]} : vector<8x128xf32> to vector<1x128xf32>
    %1289 = vector.broadcast %1288 : vector<1x128xf32> to vector<8x128xf32>
    %1290 = arith.mulf %11, %1289 : vector<8x128xf32>
    %1291 = arith.addf %35, %1284 : vector<8x128xf32>
    %1292 = arith.addf %1287, %1290 : vector<8x128xf32>
    %1293 = arith.addf %1291, %1292 : vector<8x128xf32>
    %cst_34 = arith.constant 0.000000e+00 : f32
    %1294 = vector.broadcast %cst_34 : f32 to vector<8x128xf32>
    %1295 = arith.maximumf %1293, %1294 : vector<8x128xf32>
    %1296 = vector.extract_strided_slice %1295 {offsets = [0, 0], sizes = [8, 1], strides = [1, 1]} : vector<8x128xf32> to vector<8x1xf32>
    %1297 = vector.broadcast %1296 : vector<8x1xf32> to vector<8x128xf32>
    %1298 = arith.mulf %1297, %20 : vector<8x128xf32>
    %1299 = vector.extract_strided_slice %1295 {offsets = [0, 1], sizes = [8, 1], strides = [1, 1]} : vector<8x128xf32> to vector<8x1xf32>
    %1300 = vector.broadcast %1299 : vector<8x1xf32> to vector<8x128xf32>
    %1301 = arith.mulf %1300, %23 : vector<8x128xf32>
    %1302 = vector.extract_strided_slice %1295 {offsets = [0, 2], sizes = [8, 1], strides = [1, 1]} : vector<8x128xf32> to vector<8x1xf32>
    %1303 = vector.broadcast %1302 : vector<8x1xf32> to vector<8x128xf32>
    %1304 = arith.mulf %1303, %26 : vector<8x128xf32>
    %1305 = vector.extract_strided_slice %1295 {offsets = [0, 3], sizes = [8, 1], strides = [1, 1]} : vector<8x128xf32> to vector<8x1xf32>
    %1306 = vector.broadcast %1305 : vector<8x1xf32> to vector<8x128xf32>
    %1307 = arith.mulf %1306, %29 : vector<8x128xf32>
    %1308 = vector.extract_strided_slice %1295 {offsets = [0, 4], sizes = [8, 1], strides = [1, 1]} : vector<8x128xf32> to vector<8x1xf32>
    %1309 = vector.broadcast %1308 : vector<8x1xf32> to vector<8x128xf32>
    %1310 = arith.mulf %1309, %32 : vector<8x128xf32>
    %1311 = arith.addf %1298, %1301 : vector<8x128xf32>
    %1312 = arith.addf %1304, %1307 : vector<8x128xf32>
    %1313 = arith.addf %1311, %1312 : vector<8x128xf32>
    %1314 = arith.addf %1313, %1310 : vector<8x128xf32>
    %1315 = vector.extract_strided_slice %1314 {offsets = [0, 0], sizes = [1, 128], strides = [1, 1]} : vector<8x128xf32> to vector<1x128xf32>
    %1316 = vector.broadcast %1315 : vector<1x128xf32> to vector<8x128xf32>
    %1317 = arith.mulf %5, %1316 : vector<8x128xf32>
    %1318 = vector.extract_strided_slice %1314 {offsets = [1, 0], sizes = [1, 128], strides = [1, 1]} : vector<8x128xf32> to vector<1x128xf32>
    %1319 = vector.broadcast %1318 : vector<1x128xf32> to vector<8x128xf32>
    %1320 = arith.mulf %8, %1319 : vector<8x128xf32>
    %1321 = vector.extract_strided_slice %1314 {offsets = [2, 0], sizes = [1, 128], strides = [1, 1]} : vector<8x128xf32> to vector<1x128xf32>
    %1322 = vector.broadcast %1321 : vector<1x128xf32> to vector<8x128xf32>
    %1323 = arith.mulf %11, %1322 : vector<8x128xf32>
    %1324 = arith.addf %38, %1317 : vector<8x128xf32>
    %1325 = arith.addf %1320, %1323 : vector<8x128xf32>
    %1326 = arith.addf %1324, %1325 : vector<8x128xf32>
    %1327 = vector.broadcast %cst_5 : f32 to vector<8x128xf32>
    %1328 = arith.mulf %1327, %1326 : vector<8x128xf32>
    %1329 = arith.addf %1164, %1328 : vector<8x128xf32>
    %1330 = vector.extract_strided_slice %1329 {offsets = [0, 0], sizes = [8, 1], strides = [1, 1]} : vector<8x128xf32> to vector<8x1xf32>
    %1331 = vector.broadcast %1330 : vector<8x1xf32> to vector<8x128xf32>
    %1332 = arith.mulf %1331, %14 : vector<8x128xf32>
    %1333 = vector.extract_strided_slice %1329 {offsets = [0, 1], sizes = [8, 1], strides = [1, 1]} : vector<8x128xf32> to vector<8x1xf32>
    %1334 = vector.broadcast %1333 : vector<8x1xf32> to vector<8x128xf32>
    %1335 = arith.mulf %1334, %17 : vector<8x128xf32>
    %1336 = arith.addf %1332, %1335 : vector<8x128xf32>
    %1337 = vector.extract_strided_slice %1336 {offsets = [0, 0], sizes = [1, 128], strides = [1, 1]} : vector<8x128xf32> to vector<1x128xf32>
    %1338 = vector.broadcast %1337 : vector<1x128xf32> to vector<8x128xf32>
    %1339 = arith.mulf %5, %1338 : vector<8x128xf32>
    %1340 = vector.extract_strided_slice %1336 {offsets = [1, 0], sizes = [1, 128], strides = [1, 1]} : vector<8x128xf32> to vector<1x128xf32>
    %1341 = vector.broadcast %1340 : vector<1x128xf32> to vector<8x128xf32>
    %1342 = arith.mulf %8, %1341 : vector<8x128xf32>
    %1343 = vector.extract_strided_slice %1336 {offsets = [2, 0], sizes = [1, 128], strides = [1, 1]} : vector<8x128xf32> to vector<1x128xf32>
    %1344 = vector.broadcast %1343 : vector<1x128xf32> to vector<8x128xf32>
    %1345 = arith.mulf %11, %1344 : vector<8x128xf32>
    %1346 = arith.addf %35, %1339 : vector<8x128xf32>
    %1347 = arith.addf %1342, %1345 : vector<8x128xf32>
    %1348 = arith.addf %1346, %1347 : vector<8x128xf32>
    %cst_35 = arith.constant 0.000000e+00 : f32
    %1349 = vector.broadcast %cst_35 : f32 to vector<8x128xf32>
    %1350 = arith.maximumf %1348, %1349 : vector<8x128xf32>
    %1351 = vector.extract_strided_slice %1350 {offsets = [0, 0], sizes = [8, 1], strides = [1, 1]} : vector<8x128xf32> to vector<8x1xf32>
    %1352 = vector.broadcast %1351 : vector<8x1xf32> to vector<8x128xf32>
    %1353 = arith.mulf %1352, %20 : vector<8x128xf32>
    %1354 = vector.extract_strided_slice %1350 {offsets = [0, 1], sizes = [8, 1], strides = [1, 1]} : vector<8x128xf32> to vector<8x1xf32>
    %1355 = vector.broadcast %1354 : vector<8x1xf32> to vector<8x128xf32>
    %1356 = arith.mulf %1355, %23 : vector<8x128xf32>
    %1357 = vector.extract_strided_slice %1350 {offsets = [0, 2], sizes = [8, 1], strides = [1, 1]} : vector<8x128xf32> to vector<8x1xf32>
    %1358 = vector.broadcast %1357 : vector<8x1xf32> to vector<8x128xf32>
    %1359 = arith.mulf %1358, %26 : vector<8x128xf32>
    %1360 = vector.extract_strided_slice %1350 {offsets = [0, 3], sizes = [8, 1], strides = [1, 1]} : vector<8x128xf32> to vector<8x1xf32>
    %1361 = vector.broadcast %1360 : vector<8x1xf32> to vector<8x128xf32>
    %1362 = arith.mulf %1361, %29 : vector<8x128xf32>
    %1363 = vector.extract_strided_slice %1350 {offsets = [0, 4], sizes = [8, 1], strides = [1, 1]} : vector<8x128xf32> to vector<8x1xf32>
    %1364 = vector.broadcast %1363 : vector<8x1xf32> to vector<8x128xf32>
    %1365 = arith.mulf %1364, %32 : vector<8x128xf32>
    %1366 = arith.addf %1353, %1356 : vector<8x128xf32>
    %1367 = arith.addf %1359, %1362 : vector<8x128xf32>
    %1368 = arith.addf %1366, %1367 : vector<8x128xf32>
    %1369 = arith.addf %1368, %1365 : vector<8x128xf32>
    %1370 = vector.extract_strided_slice %1369 {offsets = [0, 0], sizes = [1, 128], strides = [1, 1]} : vector<8x128xf32> to vector<1x128xf32>
    %1371 = vector.broadcast %1370 : vector<1x128xf32> to vector<8x128xf32>
    %1372 = arith.mulf %5, %1371 : vector<8x128xf32>
    %1373 = vector.extract_strided_slice %1369 {offsets = [1, 0], sizes = [1, 128], strides = [1, 1]} : vector<8x128xf32> to vector<1x128xf32>
    %1374 = vector.broadcast %1373 : vector<1x128xf32> to vector<8x128xf32>
    %1375 = arith.mulf %8, %1374 : vector<8x128xf32>
    %1376 = vector.extract_strided_slice %1369 {offsets = [2, 0], sizes = [1, 128], strides = [1, 1]} : vector<8x128xf32> to vector<1x128xf32>
    %1377 = vector.broadcast %1376 : vector<1x128xf32> to vector<8x128xf32>
    %1378 = arith.mulf %11, %1377 : vector<8x128xf32>
    %1379 = arith.addf %38, %1372 : vector<8x128xf32>
    %1380 = arith.addf %1375, %1378 : vector<8x128xf32>
    %1381 = arith.addf %1379, %1380 : vector<8x128xf32>
    %1382 = arith.addf %1216, %1381 : vector<8x128xf32>
    %1383 = arith.addf %1271, %1326 : vector<8x128xf32>
    %cst_36 = arith.constant 2.000000e+00 : f32
    %1384 = vector.broadcast %cst_36 : f32 to vector<8x128xf32>
    %1385 = arith.mulf %1384, %1383 : vector<8x128xf32>
    %1386 = arith.addf %1382, %1385 : vector<8x128xf32>
    %1387 = vector.broadcast %cst_6 : f32 to vector<8x128xf32>
    %1388 = arith.mulf %1387, %1386 : vector<8x128xf32>
    %1389 = arith.addf %1164, %1388 : vector<8x128xf32>
    %c6_i32 = arith.constant 6 : i32
    %1390 = vector.extract_strided_slice %1389 {offsets = [0, 0], sizes = [8, 1], strides = [1, 1]} : vector<8x128xf32> to vector<8x1xf32>
    %1391 = vector.broadcast %1390 : vector<8x1xf32> to vector<8x128xf32>
    %1392 = arith.mulf %1391, %14 : vector<8x128xf32>
    %1393 = vector.extract_strided_slice %1389 {offsets = [0, 1], sizes = [8, 1], strides = [1, 1]} : vector<8x128xf32> to vector<8x1xf32>
    %1394 = vector.broadcast %1393 : vector<8x1xf32> to vector<8x128xf32>
    %1395 = arith.mulf %1394, %17 : vector<8x128xf32>
    %1396 = arith.addf %1392, %1395 : vector<8x128xf32>
    %1397 = vector.extract_strided_slice %1396 {offsets = [0, 0], sizes = [1, 128], strides = [1, 1]} : vector<8x128xf32> to vector<1x128xf32>
    %1398 = vector.broadcast %1397 : vector<1x128xf32> to vector<8x128xf32>
    %1399 = arith.mulf %5, %1398 : vector<8x128xf32>
    %1400 = vector.extract_strided_slice %1396 {offsets = [1, 0], sizes = [1, 128], strides = [1, 1]} : vector<8x128xf32> to vector<1x128xf32>
    %1401 = vector.broadcast %1400 : vector<1x128xf32> to vector<8x128xf32>
    %1402 = arith.mulf %8, %1401 : vector<8x128xf32>
    %1403 = vector.extract_strided_slice %1396 {offsets = [2, 0], sizes = [1, 128], strides = [1, 1]} : vector<8x128xf32> to vector<1x128xf32>
    %1404 = vector.broadcast %1403 : vector<1x128xf32> to vector<8x128xf32>
    %1405 = arith.mulf %11, %1404 : vector<8x128xf32>
    %1406 = arith.addf %35, %1399 : vector<8x128xf32>
    %1407 = arith.addf %1402, %1405 : vector<8x128xf32>
    %1408 = arith.addf %1406, %1407 : vector<8x128xf32>
    %cst_37 = arith.constant 0.000000e+00 : f32
    %1409 = vector.broadcast %cst_37 : f32 to vector<8x128xf32>
    %1410 = arith.maximumf %1408, %1409 : vector<8x128xf32>
    %1411 = vector.extract_strided_slice %1410 {offsets = [0, 0], sizes = [8, 1], strides = [1, 1]} : vector<8x128xf32> to vector<8x1xf32>
    %1412 = vector.broadcast %1411 : vector<8x1xf32> to vector<8x128xf32>
    %1413 = arith.mulf %1412, %20 : vector<8x128xf32>
    %1414 = vector.extract_strided_slice %1410 {offsets = [0, 1], sizes = [8, 1], strides = [1, 1]} : vector<8x128xf32> to vector<8x1xf32>
    %1415 = vector.broadcast %1414 : vector<8x1xf32> to vector<8x128xf32>
    %1416 = arith.mulf %1415, %23 : vector<8x128xf32>
    %1417 = vector.extract_strided_slice %1410 {offsets = [0, 2], sizes = [8, 1], strides = [1, 1]} : vector<8x128xf32> to vector<8x1xf32>
    %1418 = vector.broadcast %1417 : vector<8x1xf32> to vector<8x128xf32>
    %1419 = arith.mulf %1418, %26 : vector<8x128xf32>
    %1420 = vector.extract_strided_slice %1410 {offsets = [0, 3], sizes = [8, 1], strides = [1, 1]} : vector<8x128xf32> to vector<8x1xf32>
    %1421 = vector.broadcast %1420 : vector<8x1xf32> to vector<8x128xf32>
    %1422 = arith.mulf %1421, %29 : vector<8x128xf32>
    %1423 = vector.extract_strided_slice %1410 {offsets = [0, 4], sizes = [8, 1], strides = [1, 1]} : vector<8x128xf32> to vector<8x1xf32>
    %1424 = vector.broadcast %1423 : vector<8x1xf32> to vector<8x128xf32>
    %1425 = arith.mulf %1424, %32 : vector<8x128xf32>
    %1426 = arith.addf %1413, %1416 : vector<8x128xf32>
    %1427 = arith.addf %1419, %1422 : vector<8x128xf32>
    %1428 = arith.addf %1426, %1427 : vector<8x128xf32>
    %1429 = arith.addf %1428, %1425 : vector<8x128xf32>
    %1430 = vector.extract_strided_slice %1429 {offsets = [0, 0], sizes = [1, 128], strides = [1, 1]} : vector<8x128xf32> to vector<1x128xf32>
    %1431 = vector.broadcast %1430 : vector<1x128xf32> to vector<8x128xf32>
    %1432 = arith.mulf %5, %1431 : vector<8x128xf32>
    %1433 = vector.extract_strided_slice %1429 {offsets = [1, 0], sizes = [1, 128], strides = [1, 1]} : vector<8x128xf32> to vector<1x128xf32>
    %1434 = vector.broadcast %1433 : vector<1x128xf32> to vector<8x128xf32>
    %1435 = arith.mulf %8, %1434 : vector<8x128xf32>
    %1436 = vector.extract_strided_slice %1429 {offsets = [2, 0], sizes = [1, 128], strides = [1, 1]} : vector<8x128xf32> to vector<1x128xf32>
    %1437 = vector.broadcast %1436 : vector<1x128xf32> to vector<8x128xf32>
    %1438 = arith.mulf %11, %1437 : vector<8x128xf32>
    %1439 = arith.addf %38, %1432 : vector<8x128xf32>
    %1440 = arith.addf %1435, %1438 : vector<8x128xf32>
    %1441 = arith.addf %1439, %1440 : vector<8x128xf32>
    %1442 = vector.broadcast %cst : f32 to vector<8x128xf32>
    %1443 = arith.mulf %1442, %1441 : vector<8x128xf32>
    %1444 = arith.addf %1389, %1443 : vector<8x128xf32>
    %1445 = vector.extract_strided_slice %1444 {offsets = [0, 0], sizes = [8, 1], strides = [1, 1]} : vector<8x128xf32> to vector<8x1xf32>
    %1446 = vector.broadcast %1445 : vector<8x1xf32> to vector<8x128xf32>
    %1447 = arith.mulf %1446, %14 : vector<8x128xf32>
    %1448 = vector.extract_strided_slice %1444 {offsets = [0, 1], sizes = [8, 1], strides = [1, 1]} : vector<8x128xf32> to vector<8x1xf32>
    %1449 = vector.broadcast %1448 : vector<8x1xf32> to vector<8x128xf32>
    %1450 = arith.mulf %1449, %17 : vector<8x128xf32>
    %1451 = arith.addf %1447, %1450 : vector<8x128xf32>
    %1452 = vector.extract_strided_slice %1451 {offsets = [0, 0], sizes = [1, 128], strides = [1, 1]} : vector<8x128xf32> to vector<1x128xf32>
    %1453 = vector.broadcast %1452 : vector<1x128xf32> to vector<8x128xf32>
    %1454 = arith.mulf %5, %1453 : vector<8x128xf32>
    %1455 = vector.extract_strided_slice %1451 {offsets = [1, 0], sizes = [1, 128], strides = [1, 1]} : vector<8x128xf32> to vector<1x128xf32>
    %1456 = vector.broadcast %1455 : vector<1x128xf32> to vector<8x128xf32>
    %1457 = arith.mulf %8, %1456 : vector<8x128xf32>
    %1458 = vector.extract_strided_slice %1451 {offsets = [2, 0], sizes = [1, 128], strides = [1, 1]} : vector<8x128xf32> to vector<1x128xf32>
    %1459 = vector.broadcast %1458 : vector<1x128xf32> to vector<8x128xf32>
    %1460 = arith.mulf %11, %1459 : vector<8x128xf32>
    %1461 = arith.addf %35, %1454 : vector<8x128xf32>
    %1462 = arith.addf %1457, %1460 : vector<8x128xf32>
    %1463 = arith.addf %1461, %1462 : vector<8x128xf32>
    %cst_38 = arith.constant 0.000000e+00 : f32
    %1464 = vector.broadcast %cst_38 : f32 to vector<8x128xf32>
    %1465 = arith.maximumf %1463, %1464 : vector<8x128xf32>
    %1466 = vector.extract_strided_slice %1465 {offsets = [0, 0], sizes = [8, 1], strides = [1, 1]} : vector<8x128xf32> to vector<8x1xf32>
    %1467 = vector.broadcast %1466 : vector<8x1xf32> to vector<8x128xf32>
    %1468 = arith.mulf %1467, %20 : vector<8x128xf32>
    %1469 = vector.extract_strided_slice %1465 {offsets = [0, 1], sizes = [8, 1], strides = [1, 1]} : vector<8x128xf32> to vector<8x1xf32>
    %1470 = vector.broadcast %1469 : vector<8x1xf32> to vector<8x128xf32>
    %1471 = arith.mulf %1470, %23 : vector<8x128xf32>
    %1472 = vector.extract_strided_slice %1465 {offsets = [0, 2], sizes = [8, 1], strides = [1, 1]} : vector<8x128xf32> to vector<8x1xf32>
    %1473 = vector.broadcast %1472 : vector<8x1xf32> to vector<8x128xf32>
    %1474 = arith.mulf %1473, %26 : vector<8x128xf32>
    %1475 = vector.extract_strided_slice %1465 {offsets = [0, 3], sizes = [8, 1], strides = [1, 1]} : vector<8x128xf32> to vector<8x1xf32>
    %1476 = vector.broadcast %1475 : vector<8x1xf32> to vector<8x128xf32>
    %1477 = arith.mulf %1476, %29 : vector<8x128xf32>
    %1478 = vector.extract_strided_slice %1465 {offsets = [0, 4], sizes = [8, 1], strides = [1, 1]} : vector<8x128xf32> to vector<8x1xf32>
    %1479 = vector.broadcast %1478 : vector<8x1xf32> to vector<8x128xf32>
    %1480 = arith.mulf %1479, %32 : vector<8x128xf32>
    %1481 = arith.addf %1468, %1471 : vector<8x128xf32>
    %1482 = arith.addf %1474, %1477 : vector<8x128xf32>
    %1483 = arith.addf %1481, %1482 : vector<8x128xf32>
    %1484 = arith.addf %1483, %1480 : vector<8x128xf32>
    %1485 = vector.extract_strided_slice %1484 {offsets = [0, 0], sizes = [1, 128], strides = [1, 1]} : vector<8x128xf32> to vector<1x128xf32>
    %1486 = vector.broadcast %1485 : vector<1x128xf32> to vector<8x128xf32>
    %1487 = arith.mulf %5, %1486 : vector<8x128xf32>
    %1488 = vector.extract_strided_slice %1484 {offsets = [1, 0], sizes = [1, 128], strides = [1, 1]} : vector<8x128xf32> to vector<1x128xf32>
    %1489 = vector.broadcast %1488 : vector<1x128xf32> to vector<8x128xf32>
    %1490 = arith.mulf %8, %1489 : vector<8x128xf32>
    %1491 = vector.extract_strided_slice %1484 {offsets = [2, 0], sizes = [1, 128], strides = [1, 1]} : vector<8x128xf32> to vector<1x128xf32>
    %1492 = vector.broadcast %1491 : vector<1x128xf32> to vector<8x128xf32>
    %1493 = arith.mulf %11, %1492 : vector<8x128xf32>
    %1494 = arith.addf %38, %1487 : vector<8x128xf32>
    %1495 = arith.addf %1490, %1493 : vector<8x128xf32>
    %1496 = arith.addf %1494, %1495 : vector<8x128xf32>
    %1497 = vector.broadcast %cst : f32 to vector<8x128xf32>
    %1498 = arith.mulf %1497, %1496 : vector<8x128xf32>
    %1499 = arith.addf %1389, %1498 : vector<8x128xf32>
    %1500 = vector.extract_strided_slice %1499 {offsets = [0, 0], sizes = [8, 1], strides = [1, 1]} : vector<8x128xf32> to vector<8x1xf32>
    %1501 = vector.broadcast %1500 : vector<8x1xf32> to vector<8x128xf32>
    %1502 = arith.mulf %1501, %14 : vector<8x128xf32>
    %1503 = vector.extract_strided_slice %1499 {offsets = [0, 1], sizes = [8, 1], strides = [1, 1]} : vector<8x128xf32> to vector<8x1xf32>
    %1504 = vector.broadcast %1503 : vector<8x1xf32> to vector<8x128xf32>
    %1505 = arith.mulf %1504, %17 : vector<8x128xf32>
    %1506 = arith.addf %1502, %1505 : vector<8x128xf32>
    %1507 = vector.extract_strided_slice %1506 {offsets = [0, 0], sizes = [1, 128], strides = [1, 1]} : vector<8x128xf32> to vector<1x128xf32>
    %1508 = vector.broadcast %1507 : vector<1x128xf32> to vector<8x128xf32>
    %1509 = arith.mulf %5, %1508 : vector<8x128xf32>
    %1510 = vector.extract_strided_slice %1506 {offsets = [1, 0], sizes = [1, 128], strides = [1, 1]} : vector<8x128xf32> to vector<1x128xf32>
    %1511 = vector.broadcast %1510 : vector<1x128xf32> to vector<8x128xf32>
    %1512 = arith.mulf %8, %1511 : vector<8x128xf32>
    %1513 = vector.extract_strided_slice %1506 {offsets = [2, 0], sizes = [1, 128], strides = [1, 1]} : vector<8x128xf32> to vector<1x128xf32>
    %1514 = vector.broadcast %1513 : vector<1x128xf32> to vector<8x128xf32>
    %1515 = arith.mulf %11, %1514 : vector<8x128xf32>
    %1516 = arith.addf %35, %1509 : vector<8x128xf32>
    %1517 = arith.addf %1512, %1515 : vector<8x128xf32>
    %1518 = arith.addf %1516, %1517 : vector<8x128xf32>
    %cst_39 = arith.constant 0.000000e+00 : f32
    %1519 = vector.broadcast %cst_39 : f32 to vector<8x128xf32>
    %1520 = arith.maximumf %1518, %1519 : vector<8x128xf32>
    %1521 = vector.extract_strided_slice %1520 {offsets = [0, 0], sizes = [8, 1], strides = [1, 1]} : vector<8x128xf32> to vector<8x1xf32>
    %1522 = vector.broadcast %1521 : vector<8x1xf32> to vector<8x128xf32>
    %1523 = arith.mulf %1522, %20 : vector<8x128xf32>
    %1524 = vector.extract_strided_slice %1520 {offsets = [0, 1], sizes = [8, 1], strides = [1, 1]} : vector<8x128xf32> to vector<8x1xf32>
    %1525 = vector.broadcast %1524 : vector<8x1xf32> to vector<8x128xf32>
    %1526 = arith.mulf %1525, %23 : vector<8x128xf32>
    %1527 = vector.extract_strided_slice %1520 {offsets = [0, 2], sizes = [8, 1], strides = [1, 1]} : vector<8x128xf32> to vector<8x1xf32>
    %1528 = vector.broadcast %1527 : vector<8x1xf32> to vector<8x128xf32>
    %1529 = arith.mulf %1528, %26 : vector<8x128xf32>
    %1530 = vector.extract_strided_slice %1520 {offsets = [0, 3], sizes = [8, 1], strides = [1, 1]} : vector<8x128xf32> to vector<8x1xf32>
    %1531 = vector.broadcast %1530 : vector<8x1xf32> to vector<8x128xf32>
    %1532 = arith.mulf %1531, %29 : vector<8x128xf32>
    %1533 = vector.extract_strided_slice %1520 {offsets = [0, 4], sizes = [8, 1], strides = [1, 1]} : vector<8x128xf32> to vector<8x1xf32>
    %1534 = vector.broadcast %1533 : vector<8x1xf32> to vector<8x128xf32>
    %1535 = arith.mulf %1534, %32 : vector<8x128xf32>
    %1536 = arith.addf %1523, %1526 : vector<8x128xf32>
    %1537 = arith.addf %1529, %1532 : vector<8x128xf32>
    %1538 = arith.addf %1536, %1537 : vector<8x128xf32>
    %1539 = arith.addf %1538, %1535 : vector<8x128xf32>
    %1540 = vector.extract_strided_slice %1539 {offsets = [0, 0], sizes = [1, 128], strides = [1, 1]} : vector<8x128xf32> to vector<1x128xf32>
    %1541 = vector.broadcast %1540 : vector<1x128xf32> to vector<8x128xf32>
    %1542 = arith.mulf %5, %1541 : vector<8x128xf32>
    %1543 = vector.extract_strided_slice %1539 {offsets = [1, 0], sizes = [1, 128], strides = [1, 1]} : vector<8x128xf32> to vector<1x128xf32>
    %1544 = vector.broadcast %1543 : vector<1x128xf32> to vector<8x128xf32>
    %1545 = arith.mulf %8, %1544 : vector<8x128xf32>
    %1546 = vector.extract_strided_slice %1539 {offsets = [2, 0], sizes = [1, 128], strides = [1, 1]} : vector<8x128xf32> to vector<1x128xf32>
    %1547 = vector.broadcast %1546 : vector<1x128xf32> to vector<8x128xf32>
    %1548 = arith.mulf %11, %1547 : vector<8x128xf32>
    %1549 = arith.addf %38, %1542 : vector<8x128xf32>
    %1550 = arith.addf %1545, %1548 : vector<8x128xf32>
    %1551 = arith.addf %1549, %1550 : vector<8x128xf32>
    %1552 = vector.broadcast %cst_5 : f32 to vector<8x128xf32>
    %1553 = arith.mulf %1552, %1551 : vector<8x128xf32>
    %1554 = arith.addf %1389, %1553 : vector<8x128xf32>
    %1555 = vector.extract_strided_slice %1554 {offsets = [0, 0], sizes = [8, 1], strides = [1, 1]} : vector<8x128xf32> to vector<8x1xf32>
    %1556 = vector.broadcast %1555 : vector<8x1xf32> to vector<8x128xf32>
    %1557 = arith.mulf %1556, %14 : vector<8x128xf32>
    %1558 = vector.extract_strided_slice %1554 {offsets = [0, 1], sizes = [8, 1], strides = [1, 1]} : vector<8x128xf32> to vector<8x1xf32>
    %1559 = vector.broadcast %1558 : vector<8x1xf32> to vector<8x128xf32>
    %1560 = arith.mulf %1559, %17 : vector<8x128xf32>
    %1561 = arith.addf %1557, %1560 : vector<8x128xf32>
    %1562 = vector.extract_strided_slice %1561 {offsets = [0, 0], sizes = [1, 128], strides = [1, 1]} : vector<8x128xf32> to vector<1x128xf32>
    %1563 = vector.broadcast %1562 : vector<1x128xf32> to vector<8x128xf32>
    %1564 = arith.mulf %5, %1563 : vector<8x128xf32>
    %1565 = vector.extract_strided_slice %1561 {offsets = [1, 0], sizes = [1, 128], strides = [1, 1]} : vector<8x128xf32> to vector<1x128xf32>
    %1566 = vector.broadcast %1565 : vector<1x128xf32> to vector<8x128xf32>
    %1567 = arith.mulf %8, %1566 : vector<8x128xf32>
    %1568 = vector.extract_strided_slice %1561 {offsets = [2, 0], sizes = [1, 128], strides = [1, 1]} : vector<8x128xf32> to vector<1x128xf32>
    %1569 = vector.broadcast %1568 : vector<1x128xf32> to vector<8x128xf32>
    %1570 = arith.mulf %11, %1569 : vector<8x128xf32>
    %1571 = arith.addf %35, %1564 : vector<8x128xf32>
    %1572 = arith.addf %1567, %1570 : vector<8x128xf32>
    %1573 = arith.addf %1571, %1572 : vector<8x128xf32>
    %cst_40 = arith.constant 0.000000e+00 : f32
    %1574 = vector.broadcast %cst_40 : f32 to vector<8x128xf32>
    %1575 = arith.maximumf %1573, %1574 : vector<8x128xf32>
    %1576 = vector.extract_strided_slice %1575 {offsets = [0, 0], sizes = [8, 1], strides = [1, 1]} : vector<8x128xf32> to vector<8x1xf32>
    %1577 = vector.broadcast %1576 : vector<8x1xf32> to vector<8x128xf32>
    %1578 = arith.mulf %1577, %20 : vector<8x128xf32>
    %1579 = vector.extract_strided_slice %1575 {offsets = [0, 1], sizes = [8, 1], strides = [1, 1]} : vector<8x128xf32> to vector<8x1xf32>
    %1580 = vector.broadcast %1579 : vector<8x1xf32> to vector<8x128xf32>
    %1581 = arith.mulf %1580, %23 : vector<8x128xf32>
    %1582 = vector.extract_strided_slice %1575 {offsets = [0, 2], sizes = [8, 1], strides = [1, 1]} : vector<8x128xf32> to vector<8x1xf32>
    %1583 = vector.broadcast %1582 : vector<8x1xf32> to vector<8x128xf32>
    %1584 = arith.mulf %1583, %26 : vector<8x128xf32>
    %1585 = vector.extract_strided_slice %1575 {offsets = [0, 3], sizes = [8, 1], strides = [1, 1]} : vector<8x128xf32> to vector<8x1xf32>
    %1586 = vector.broadcast %1585 : vector<8x1xf32> to vector<8x128xf32>
    %1587 = arith.mulf %1586, %29 : vector<8x128xf32>
    %1588 = vector.extract_strided_slice %1575 {offsets = [0, 4], sizes = [8, 1], strides = [1, 1]} : vector<8x128xf32> to vector<8x1xf32>
    %1589 = vector.broadcast %1588 : vector<8x1xf32> to vector<8x128xf32>
    %1590 = arith.mulf %1589, %32 : vector<8x128xf32>
    %1591 = arith.addf %1578, %1581 : vector<8x128xf32>
    %1592 = arith.addf %1584, %1587 : vector<8x128xf32>
    %1593 = arith.addf %1591, %1592 : vector<8x128xf32>
    %1594 = arith.addf %1593, %1590 : vector<8x128xf32>
    %1595 = vector.extract_strided_slice %1594 {offsets = [0, 0], sizes = [1, 128], strides = [1, 1]} : vector<8x128xf32> to vector<1x128xf32>
    %1596 = vector.broadcast %1595 : vector<1x128xf32> to vector<8x128xf32>
    %1597 = arith.mulf %5, %1596 : vector<8x128xf32>
    %1598 = vector.extract_strided_slice %1594 {offsets = [1, 0], sizes = [1, 128], strides = [1, 1]} : vector<8x128xf32> to vector<1x128xf32>
    %1599 = vector.broadcast %1598 : vector<1x128xf32> to vector<8x128xf32>
    %1600 = arith.mulf %8, %1599 : vector<8x128xf32>
    %1601 = vector.extract_strided_slice %1594 {offsets = [2, 0], sizes = [1, 128], strides = [1, 1]} : vector<8x128xf32> to vector<1x128xf32>
    %1602 = vector.broadcast %1601 : vector<1x128xf32> to vector<8x128xf32>
    %1603 = arith.mulf %11, %1602 : vector<8x128xf32>
    %1604 = arith.addf %38, %1597 : vector<8x128xf32>
    %1605 = arith.addf %1600, %1603 : vector<8x128xf32>
    %1606 = arith.addf %1604, %1605 : vector<8x128xf32>
    %1607 = arith.addf %1441, %1606 : vector<8x128xf32>
    %1608 = arith.addf %1496, %1551 : vector<8x128xf32>
    %cst_41 = arith.constant 2.000000e+00 : f32
    %1609 = vector.broadcast %cst_41 : f32 to vector<8x128xf32>
    %1610 = arith.mulf %1609, %1608 : vector<8x128xf32>
    %1611 = arith.addf %1607, %1610 : vector<8x128xf32>
    %1612 = vector.broadcast %cst_6 : f32 to vector<8x128xf32>
    %1613 = arith.mulf %1612, %1611 : vector<8x128xf32>
    %1614 = arith.addf %1389, %1613 : vector<8x128xf32>
    %c7_i32 = arith.constant 7 : i32
    %1615 = vector.extract_strided_slice %1614 {offsets = [0, 0], sizes = [8, 1], strides = [1, 1]} : vector<8x128xf32> to vector<8x1xf32>
    %1616 = vector.broadcast %1615 : vector<8x1xf32> to vector<8x128xf32>
    %1617 = arith.mulf %1616, %14 : vector<8x128xf32>
    %1618 = vector.extract_strided_slice %1614 {offsets = [0, 1], sizes = [8, 1], strides = [1, 1]} : vector<8x128xf32> to vector<8x1xf32>
    %1619 = vector.broadcast %1618 : vector<8x1xf32> to vector<8x128xf32>
    %1620 = arith.mulf %1619, %17 : vector<8x128xf32>
    %1621 = arith.addf %1617, %1620 : vector<8x128xf32>
    %1622 = vector.extract_strided_slice %1621 {offsets = [0, 0], sizes = [1, 128], strides = [1, 1]} : vector<8x128xf32> to vector<1x128xf32>
    %1623 = vector.broadcast %1622 : vector<1x128xf32> to vector<8x128xf32>
    %1624 = arith.mulf %5, %1623 : vector<8x128xf32>
    %1625 = vector.extract_strided_slice %1621 {offsets = [1, 0], sizes = [1, 128], strides = [1, 1]} : vector<8x128xf32> to vector<1x128xf32>
    %1626 = vector.broadcast %1625 : vector<1x128xf32> to vector<8x128xf32>
    %1627 = arith.mulf %8, %1626 : vector<8x128xf32>
    %1628 = vector.extract_strided_slice %1621 {offsets = [2, 0], sizes = [1, 128], strides = [1, 1]} : vector<8x128xf32> to vector<1x128xf32>
    %1629 = vector.broadcast %1628 : vector<1x128xf32> to vector<8x128xf32>
    %1630 = arith.mulf %11, %1629 : vector<8x128xf32>
    %1631 = arith.addf %35, %1624 : vector<8x128xf32>
    %1632 = arith.addf %1627, %1630 : vector<8x128xf32>
    %1633 = arith.addf %1631, %1632 : vector<8x128xf32>
    %cst_42 = arith.constant 0.000000e+00 : f32
    %1634 = vector.broadcast %cst_42 : f32 to vector<8x128xf32>
    %1635 = arith.maximumf %1633, %1634 : vector<8x128xf32>
    %1636 = vector.extract_strided_slice %1635 {offsets = [0, 0], sizes = [8, 1], strides = [1, 1]} : vector<8x128xf32> to vector<8x1xf32>
    %1637 = vector.broadcast %1636 : vector<8x1xf32> to vector<8x128xf32>
    %1638 = arith.mulf %1637, %20 : vector<8x128xf32>
    %1639 = vector.extract_strided_slice %1635 {offsets = [0, 1], sizes = [8, 1], strides = [1, 1]} : vector<8x128xf32> to vector<8x1xf32>
    %1640 = vector.broadcast %1639 : vector<8x1xf32> to vector<8x128xf32>
    %1641 = arith.mulf %1640, %23 : vector<8x128xf32>
    %1642 = vector.extract_strided_slice %1635 {offsets = [0, 2], sizes = [8, 1], strides = [1, 1]} : vector<8x128xf32> to vector<8x1xf32>
    %1643 = vector.broadcast %1642 : vector<8x1xf32> to vector<8x128xf32>
    %1644 = arith.mulf %1643, %26 : vector<8x128xf32>
    %1645 = vector.extract_strided_slice %1635 {offsets = [0, 3], sizes = [8, 1], strides = [1, 1]} : vector<8x128xf32> to vector<8x1xf32>
    %1646 = vector.broadcast %1645 : vector<8x1xf32> to vector<8x128xf32>
    %1647 = arith.mulf %1646, %29 : vector<8x128xf32>
    %1648 = vector.extract_strided_slice %1635 {offsets = [0, 4], sizes = [8, 1], strides = [1, 1]} : vector<8x128xf32> to vector<8x1xf32>
    %1649 = vector.broadcast %1648 : vector<8x1xf32> to vector<8x128xf32>
    %1650 = arith.mulf %1649, %32 : vector<8x128xf32>
    %1651 = arith.addf %1638, %1641 : vector<8x128xf32>
    %1652 = arith.addf %1644, %1647 : vector<8x128xf32>
    %1653 = arith.addf %1651, %1652 : vector<8x128xf32>
    %1654 = arith.addf %1653, %1650 : vector<8x128xf32>
    %1655 = vector.extract_strided_slice %1654 {offsets = [0, 0], sizes = [1, 128], strides = [1, 1]} : vector<8x128xf32> to vector<1x128xf32>
    %1656 = vector.broadcast %1655 : vector<1x128xf32> to vector<8x128xf32>
    %1657 = arith.mulf %5, %1656 : vector<8x128xf32>
    %1658 = vector.extract_strided_slice %1654 {offsets = [1, 0], sizes = [1, 128], strides = [1, 1]} : vector<8x128xf32> to vector<1x128xf32>
    %1659 = vector.broadcast %1658 : vector<1x128xf32> to vector<8x128xf32>
    %1660 = arith.mulf %8, %1659 : vector<8x128xf32>
    %1661 = vector.extract_strided_slice %1654 {offsets = [2, 0], sizes = [1, 128], strides = [1, 1]} : vector<8x128xf32> to vector<1x128xf32>
    %1662 = vector.broadcast %1661 : vector<1x128xf32> to vector<8x128xf32>
    %1663 = arith.mulf %11, %1662 : vector<8x128xf32>
    %1664 = arith.addf %38, %1657 : vector<8x128xf32>
    %1665 = arith.addf %1660, %1663 : vector<8x128xf32>
    %1666 = arith.addf %1664, %1665 : vector<8x128xf32>
    %1667 = vector.broadcast %cst : f32 to vector<8x128xf32>
    %1668 = arith.mulf %1667, %1666 : vector<8x128xf32>
    %1669 = arith.addf %1614, %1668 : vector<8x128xf32>
    %1670 = vector.extract_strided_slice %1669 {offsets = [0, 0], sizes = [8, 1], strides = [1, 1]} : vector<8x128xf32> to vector<8x1xf32>
    %1671 = vector.broadcast %1670 : vector<8x1xf32> to vector<8x128xf32>
    %1672 = arith.mulf %1671, %14 : vector<8x128xf32>
    %1673 = vector.extract_strided_slice %1669 {offsets = [0, 1], sizes = [8, 1], strides = [1, 1]} : vector<8x128xf32> to vector<8x1xf32>
    %1674 = vector.broadcast %1673 : vector<8x1xf32> to vector<8x128xf32>
    %1675 = arith.mulf %1674, %17 : vector<8x128xf32>
    %1676 = arith.addf %1672, %1675 : vector<8x128xf32>
    %1677 = vector.extract_strided_slice %1676 {offsets = [0, 0], sizes = [1, 128], strides = [1, 1]} : vector<8x128xf32> to vector<1x128xf32>
    %1678 = vector.broadcast %1677 : vector<1x128xf32> to vector<8x128xf32>
    %1679 = arith.mulf %5, %1678 : vector<8x128xf32>
    %1680 = vector.extract_strided_slice %1676 {offsets = [1, 0], sizes = [1, 128], strides = [1, 1]} : vector<8x128xf32> to vector<1x128xf32>
    %1681 = vector.broadcast %1680 : vector<1x128xf32> to vector<8x128xf32>
    %1682 = arith.mulf %8, %1681 : vector<8x128xf32>
    %1683 = vector.extract_strided_slice %1676 {offsets = [2, 0], sizes = [1, 128], strides = [1, 1]} : vector<8x128xf32> to vector<1x128xf32>
    %1684 = vector.broadcast %1683 : vector<1x128xf32> to vector<8x128xf32>
    %1685 = arith.mulf %11, %1684 : vector<8x128xf32>
    %1686 = arith.addf %35, %1679 : vector<8x128xf32>
    %1687 = arith.addf %1682, %1685 : vector<8x128xf32>
    %1688 = arith.addf %1686, %1687 : vector<8x128xf32>
    %cst_43 = arith.constant 0.000000e+00 : f32
    %1689 = vector.broadcast %cst_43 : f32 to vector<8x128xf32>
    %1690 = arith.maximumf %1688, %1689 : vector<8x128xf32>
    %1691 = vector.extract_strided_slice %1690 {offsets = [0, 0], sizes = [8, 1], strides = [1, 1]} : vector<8x128xf32> to vector<8x1xf32>
    %1692 = vector.broadcast %1691 : vector<8x1xf32> to vector<8x128xf32>
    %1693 = arith.mulf %1692, %20 : vector<8x128xf32>
    %1694 = vector.extract_strided_slice %1690 {offsets = [0, 1], sizes = [8, 1], strides = [1, 1]} : vector<8x128xf32> to vector<8x1xf32>
    %1695 = vector.broadcast %1694 : vector<8x1xf32> to vector<8x128xf32>
    %1696 = arith.mulf %1695, %23 : vector<8x128xf32>
    %1697 = vector.extract_strided_slice %1690 {offsets = [0, 2], sizes = [8, 1], strides = [1, 1]} : vector<8x128xf32> to vector<8x1xf32>
    %1698 = vector.broadcast %1697 : vector<8x1xf32> to vector<8x128xf32>
    %1699 = arith.mulf %1698, %26 : vector<8x128xf32>
    %1700 = vector.extract_strided_slice %1690 {offsets = [0, 3], sizes = [8, 1], strides = [1, 1]} : vector<8x128xf32> to vector<8x1xf32>
    %1701 = vector.broadcast %1700 : vector<8x1xf32> to vector<8x128xf32>
    %1702 = arith.mulf %1701, %29 : vector<8x128xf32>
    %1703 = vector.extract_strided_slice %1690 {offsets = [0, 4], sizes = [8, 1], strides = [1, 1]} : vector<8x128xf32> to vector<8x1xf32>
    %1704 = vector.broadcast %1703 : vector<8x1xf32> to vector<8x128xf32>
    %1705 = arith.mulf %1704, %32 : vector<8x128xf32>
    %1706 = arith.addf %1693, %1696 : vector<8x128xf32>
    %1707 = arith.addf %1699, %1702 : vector<8x128xf32>
    %1708 = arith.addf %1706, %1707 : vector<8x128xf32>
    %1709 = arith.addf %1708, %1705 : vector<8x128xf32>
    %1710 = vector.extract_strided_slice %1709 {offsets = [0, 0], sizes = [1, 128], strides = [1, 1]} : vector<8x128xf32> to vector<1x128xf32>
    %1711 = vector.broadcast %1710 : vector<1x128xf32> to vector<8x128xf32>
    %1712 = arith.mulf %5, %1711 : vector<8x128xf32>
    %1713 = vector.extract_strided_slice %1709 {offsets = [1, 0], sizes = [1, 128], strides = [1, 1]} : vector<8x128xf32> to vector<1x128xf32>
    %1714 = vector.broadcast %1713 : vector<1x128xf32> to vector<8x128xf32>
    %1715 = arith.mulf %8, %1714 : vector<8x128xf32>
    %1716 = vector.extract_strided_slice %1709 {offsets = [2, 0], sizes = [1, 128], strides = [1, 1]} : vector<8x128xf32> to vector<1x128xf32>
    %1717 = vector.broadcast %1716 : vector<1x128xf32> to vector<8x128xf32>
    %1718 = arith.mulf %11, %1717 : vector<8x128xf32>
    %1719 = arith.addf %38, %1712 : vector<8x128xf32>
    %1720 = arith.addf %1715, %1718 : vector<8x128xf32>
    %1721 = arith.addf %1719, %1720 : vector<8x128xf32>
    %1722 = vector.broadcast %cst : f32 to vector<8x128xf32>
    %1723 = arith.mulf %1722, %1721 : vector<8x128xf32>
    %1724 = arith.addf %1614, %1723 : vector<8x128xf32>
    %1725 = vector.extract_strided_slice %1724 {offsets = [0, 0], sizes = [8, 1], strides = [1, 1]} : vector<8x128xf32> to vector<8x1xf32>
    %1726 = vector.broadcast %1725 : vector<8x1xf32> to vector<8x128xf32>
    %1727 = arith.mulf %1726, %14 : vector<8x128xf32>
    %1728 = vector.extract_strided_slice %1724 {offsets = [0, 1], sizes = [8, 1], strides = [1, 1]} : vector<8x128xf32> to vector<8x1xf32>
    %1729 = vector.broadcast %1728 : vector<8x1xf32> to vector<8x128xf32>
    %1730 = arith.mulf %1729, %17 : vector<8x128xf32>
    %1731 = arith.addf %1727, %1730 : vector<8x128xf32>
    %1732 = vector.extract_strided_slice %1731 {offsets = [0, 0], sizes = [1, 128], strides = [1, 1]} : vector<8x128xf32> to vector<1x128xf32>
    %1733 = vector.broadcast %1732 : vector<1x128xf32> to vector<8x128xf32>
    %1734 = arith.mulf %5, %1733 : vector<8x128xf32>
    %1735 = vector.extract_strided_slice %1731 {offsets = [1, 0], sizes = [1, 128], strides = [1, 1]} : vector<8x128xf32> to vector<1x128xf32>
    %1736 = vector.broadcast %1735 : vector<1x128xf32> to vector<8x128xf32>
    %1737 = arith.mulf %8, %1736 : vector<8x128xf32>
    %1738 = vector.extract_strided_slice %1731 {offsets = [2, 0], sizes = [1, 128], strides = [1, 1]} : vector<8x128xf32> to vector<1x128xf32>
    %1739 = vector.broadcast %1738 : vector<1x128xf32> to vector<8x128xf32>
    %1740 = arith.mulf %11, %1739 : vector<8x128xf32>
    %1741 = arith.addf %35, %1734 : vector<8x128xf32>
    %1742 = arith.addf %1737, %1740 : vector<8x128xf32>
    %1743 = arith.addf %1741, %1742 : vector<8x128xf32>
    %cst_44 = arith.constant 0.000000e+00 : f32
    %1744 = vector.broadcast %cst_44 : f32 to vector<8x128xf32>
    %1745 = arith.maximumf %1743, %1744 : vector<8x128xf32>
    %1746 = vector.extract_strided_slice %1745 {offsets = [0, 0], sizes = [8, 1], strides = [1, 1]} : vector<8x128xf32> to vector<8x1xf32>
    %1747 = vector.broadcast %1746 : vector<8x1xf32> to vector<8x128xf32>
    %1748 = arith.mulf %1747, %20 : vector<8x128xf32>
    %1749 = vector.extract_strided_slice %1745 {offsets = [0, 1], sizes = [8, 1], strides = [1, 1]} : vector<8x128xf32> to vector<8x1xf32>
    %1750 = vector.broadcast %1749 : vector<8x1xf32> to vector<8x128xf32>
    %1751 = arith.mulf %1750, %23 : vector<8x128xf32>
    %1752 = vector.extract_strided_slice %1745 {offsets = [0, 2], sizes = [8, 1], strides = [1, 1]} : vector<8x128xf32> to vector<8x1xf32>
    %1753 = vector.broadcast %1752 : vector<8x1xf32> to vector<8x128xf32>
    %1754 = arith.mulf %1753, %26 : vector<8x128xf32>
    %1755 = vector.extract_strided_slice %1745 {offsets = [0, 3], sizes = [8, 1], strides = [1, 1]} : vector<8x128xf32> to vector<8x1xf32>
    %1756 = vector.broadcast %1755 : vector<8x1xf32> to vector<8x128xf32>
    %1757 = arith.mulf %1756, %29 : vector<8x128xf32>
    %1758 = vector.extract_strided_slice %1745 {offsets = [0, 4], sizes = [8, 1], strides = [1, 1]} : vector<8x128xf32> to vector<8x1xf32>
    %1759 = vector.broadcast %1758 : vector<8x1xf32> to vector<8x128xf32>
    %1760 = arith.mulf %1759, %32 : vector<8x128xf32>
    %1761 = arith.addf %1748, %1751 : vector<8x128xf32>
    %1762 = arith.addf %1754, %1757 : vector<8x128xf32>
    %1763 = arith.addf %1761, %1762 : vector<8x128xf32>
    %1764 = arith.addf %1763, %1760 : vector<8x128xf32>
    %1765 = vector.extract_strided_slice %1764 {offsets = [0, 0], sizes = [1, 128], strides = [1, 1]} : vector<8x128xf32> to vector<1x128xf32>
    %1766 = vector.broadcast %1765 : vector<1x128xf32> to vector<8x128xf32>
    %1767 = arith.mulf %5, %1766 : vector<8x128xf32>
    %1768 = vector.extract_strided_slice %1764 {offsets = [1, 0], sizes = [1, 128], strides = [1, 1]} : vector<8x128xf32> to vector<1x128xf32>
    %1769 = vector.broadcast %1768 : vector<1x128xf32> to vector<8x128xf32>
    %1770 = arith.mulf %8, %1769 : vector<8x128xf32>
    %1771 = vector.extract_strided_slice %1764 {offsets = [2, 0], sizes = [1, 128], strides = [1, 1]} : vector<8x128xf32> to vector<1x128xf32>
    %1772 = vector.broadcast %1771 : vector<1x128xf32> to vector<8x128xf32>
    %1773 = arith.mulf %11, %1772 : vector<8x128xf32>
    %1774 = arith.addf %38, %1767 : vector<8x128xf32>
    %1775 = arith.addf %1770, %1773 : vector<8x128xf32>
    %1776 = arith.addf %1774, %1775 : vector<8x128xf32>
    %1777 = vector.broadcast %cst_5 : f32 to vector<8x128xf32>
    %1778 = arith.mulf %1777, %1776 : vector<8x128xf32>
    %1779 = arith.addf %1614, %1778 : vector<8x128xf32>
    %1780 = vector.extract_strided_slice %1779 {offsets = [0, 0], sizes = [8, 1], strides = [1, 1]} : vector<8x128xf32> to vector<8x1xf32>
    %1781 = vector.broadcast %1780 : vector<8x1xf32> to vector<8x128xf32>
    %1782 = arith.mulf %1781, %14 : vector<8x128xf32>
    %1783 = vector.extract_strided_slice %1779 {offsets = [0, 1], sizes = [8, 1], strides = [1, 1]} : vector<8x128xf32> to vector<8x1xf32>
    %1784 = vector.broadcast %1783 : vector<8x1xf32> to vector<8x128xf32>
    %1785 = arith.mulf %1784, %17 : vector<8x128xf32>
    %1786 = arith.addf %1782, %1785 : vector<8x128xf32>
    %1787 = vector.extract_strided_slice %1786 {offsets = [0, 0], sizes = [1, 128], strides = [1, 1]} : vector<8x128xf32> to vector<1x128xf32>
    %1788 = vector.broadcast %1787 : vector<1x128xf32> to vector<8x128xf32>
    %1789 = arith.mulf %5, %1788 : vector<8x128xf32>
    %1790 = vector.extract_strided_slice %1786 {offsets = [1, 0], sizes = [1, 128], strides = [1, 1]} : vector<8x128xf32> to vector<1x128xf32>
    %1791 = vector.broadcast %1790 : vector<1x128xf32> to vector<8x128xf32>
    %1792 = arith.mulf %8, %1791 : vector<8x128xf32>
    %1793 = vector.extract_strided_slice %1786 {offsets = [2, 0], sizes = [1, 128], strides = [1, 1]} : vector<8x128xf32> to vector<1x128xf32>
    %1794 = vector.broadcast %1793 : vector<1x128xf32> to vector<8x128xf32>
    %1795 = arith.mulf %11, %1794 : vector<8x128xf32>
    %1796 = arith.addf %35, %1789 : vector<8x128xf32>
    %1797 = arith.addf %1792, %1795 : vector<8x128xf32>
    %1798 = arith.addf %1796, %1797 : vector<8x128xf32>
    %cst_45 = arith.constant 0.000000e+00 : f32
    %1799 = vector.broadcast %cst_45 : f32 to vector<8x128xf32>
    %1800 = arith.maximumf %1798, %1799 : vector<8x128xf32>
    %1801 = vector.extract_strided_slice %1800 {offsets = [0, 0], sizes = [8, 1], strides = [1, 1]} : vector<8x128xf32> to vector<8x1xf32>
    %1802 = vector.broadcast %1801 : vector<8x1xf32> to vector<8x128xf32>
    %1803 = arith.mulf %1802, %20 : vector<8x128xf32>
    %1804 = vector.extract_strided_slice %1800 {offsets = [0, 1], sizes = [8, 1], strides = [1, 1]} : vector<8x128xf32> to vector<8x1xf32>
    %1805 = vector.broadcast %1804 : vector<8x1xf32> to vector<8x128xf32>
    %1806 = arith.mulf %1805, %23 : vector<8x128xf32>
    %1807 = vector.extract_strided_slice %1800 {offsets = [0, 2], sizes = [8, 1], strides = [1, 1]} : vector<8x128xf32> to vector<8x1xf32>
    %1808 = vector.broadcast %1807 : vector<8x1xf32> to vector<8x128xf32>
    %1809 = arith.mulf %1808, %26 : vector<8x128xf32>
    %1810 = vector.extract_strided_slice %1800 {offsets = [0, 3], sizes = [8, 1], strides = [1, 1]} : vector<8x128xf32> to vector<8x1xf32>
    %1811 = vector.broadcast %1810 : vector<8x1xf32> to vector<8x128xf32>
    %1812 = arith.mulf %1811, %29 : vector<8x128xf32>
    %1813 = vector.extract_strided_slice %1800 {offsets = [0, 4], sizes = [8, 1], strides = [1, 1]} : vector<8x128xf32> to vector<8x1xf32>
    %1814 = vector.broadcast %1813 : vector<8x1xf32> to vector<8x128xf32>
    %1815 = arith.mulf %1814, %32 : vector<8x128xf32>
    %1816 = arith.addf %1803, %1806 : vector<8x128xf32>
    %1817 = arith.addf %1809, %1812 : vector<8x128xf32>
    %1818 = arith.addf %1816, %1817 : vector<8x128xf32>
    %1819 = arith.addf %1818, %1815 : vector<8x128xf32>
    %1820 = vector.extract_strided_slice %1819 {offsets = [0, 0], sizes = [1, 128], strides = [1, 1]} : vector<8x128xf32> to vector<1x128xf32>
    %1821 = vector.broadcast %1820 : vector<1x128xf32> to vector<8x128xf32>
    %1822 = arith.mulf %5, %1821 : vector<8x128xf32>
    %1823 = vector.extract_strided_slice %1819 {offsets = [1, 0], sizes = [1, 128], strides = [1, 1]} : vector<8x128xf32> to vector<1x128xf32>
    %1824 = vector.broadcast %1823 : vector<1x128xf32> to vector<8x128xf32>
    %1825 = arith.mulf %8, %1824 : vector<8x128xf32>
    %1826 = vector.extract_strided_slice %1819 {offsets = [2, 0], sizes = [1, 128], strides = [1, 1]} : vector<8x128xf32> to vector<1x128xf32>
    %1827 = vector.broadcast %1826 : vector<1x128xf32> to vector<8x128xf32>
    %1828 = arith.mulf %11, %1827 : vector<8x128xf32>
    %1829 = arith.addf %38, %1822 : vector<8x128xf32>
    %1830 = arith.addf %1825, %1828 : vector<8x128xf32>
    %1831 = arith.addf %1829, %1830 : vector<8x128xf32>
    %1832 = arith.addf %1666, %1831 : vector<8x128xf32>
    %1833 = arith.addf %1721, %1776 : vector<8x128xf32>
    %cst_46 = arith.constant 2.000000e+00 : f32
    %1834 = vector.broadcast %cst_46 : f32 to vector<8x128xf32>
    %1835 = arith.mulf %1834, %1833 : vector<8x128xf32>
    %1836 = arith.addf %1832, %1835 : vector<8x128xf32>
    %1837 = vector.broadcast %cst_6 : f32 to vector<8x128xf32>
    %1838 = arith.mulf %1837, %1836 : vector<8x128xf32>
    %1839 = arith.addf %1614, %1838 : vector<8x128xf32>
    %c0_47 = arith.constant 0 : index
    %c0_48 = arith.constant 0 : index
    %1840 = vector.load %arg2[%c0_47, %c0_48] : memref<8x128xf32, #tpu.memory_space<vmem>>, vector<8x128xf32>
    tpu.vector_store %arg2[%c0_47, %c0_48], %1839 {strides = array<i32>} : memref<8x128xf32, #tpu.memory_space<vmem>>, vector<8x128xf32>,
    return
  }
}

</mosaic_0001>

<bundles_post_ra>
// kernel: gnode_forward.1
= control target key start
LH: loop header
LB: loop body
LE: loop exit
PB: predicated region body
PF: predicated region fallthrough
CT: control target
= control target key end

     0   :  { %7 = vsyncpa [#allocation3], 0  ;;  %s2347_s12 = smov [#allocation2]   ;;  %s2348_s14 = smov 128   ;;  %s3217_s0 = inlined_call_operand.vmem [shape: f32[8,128], index: 0, kind: input, shape index: {}]   ;;  %s3218_s1 = inlined_call_operand.hbm [shape: f32[24,128], index: 1, kind: input, shape index: {}]   ;;  %s3219_s2 = inlined_call_operand.vmem [shape: f32[8,128], index: 2, kind: output, shape index: {}]  }
   0x1   :  { %s14_s11 = sshll.u32 %s3218_s1, 4  ;;  %s16_s13 = sshll.u32 %s2347_s12, 4  ;;  %s15_s11 = int_to_ptr.hbm [resolvable:$true] %s14_s11  ;;  %s17_s13 = int_to_ptr.vmem [resolvable:$true] %s16_s13 }
   0x2   :  { %s2349_s15 = smov 8  }
   0x3   :  { %22 = dma.hbm_to_vmem [thread:$0]  %s15_s11, 384, %s17_s13, [#allocation3], %s2348_s14, %s2348_s14, %s2349_s15  }
   0x4   :  { %2345 = dma.done.wait [#allocation3], 384  }
   0x5   :  { %2346 = vsyncadd [#allocation3], 4294966912  ;;  %v2350_v0 = vmov 0   ;;  %v2351_v1 = vmov 2   ;;  %v2379_v2 = vld [vmem:[%s3217_s0] sm:$0xff]  ;;  %v2352_v4 = vmov 1  }
   0x6   :  { %2115 = vset.pattern.permute.xlu0 %v2350_v0  ;;  %2117 = vset.pattern.permute.xlu1 %v2350_v0  ;;  %v27_v3 = vld [vmem:[#allocation2] sm:$0xff]  ;;  %v2353_v5 = vmov 3   ;;  %v28_v7 = vld [vmem:[#allocation2 + $0x8] sm:$0xff]  ;;  %v2354_v28 = vmov 4   ;;  %v29_v30 = vld [vmem:[#allocation2 + $0x10] sm:$0xff] }
   0x7   :  { %2119 = vset.pattern.permute.xlu2 %v2351_v1  ;;  %55 = vperm.xlu0 %2115, %v2379_v2   ;;  %v2389_v9 = vperm.slane %v28_v7, 0  ;;  %v2391_v10 = vperm.slane %v28_v7, 1  ;;  %v2399_v17 = vperm.slane %v28_v7, 7  ;;  %v2410_v31 = vperm.slane %v29_v30, 1 }
   0x8   :  { %32 = vperm.xlu1 %2117, %v27_v3   ;;  %40 = vperm.xlu2 %2119, %v27_v3   ;;  %v2412_v32 = vperm.slane %v29_v30, 3  ;;  %v2414_v33 = vperm.slane %v29_v30, 0  ;;  %v2416_v34 = vperm.slane %v29_v30, 2  ;;  %v2422_v42 = vperm.slane %v29_v30, 4 }
   0x9   :  { %v2425_v49 = vperm.slane %v29_v30, 7 }
   0xf   :  { %2116 = vset.pattern.permute.xlu0 %v2352_v4 }
  0x10   :  { %60 = vperm.xlu0 %2116, %v2379_v2   ;;  %2118 = vset.pattern.permute.xlu1 %v2352_v4 }
  0x11   :  { %36 = vperm.xlu1 %2118, %v27_v3   ;;  %2120 = vset.pattern.permute.xlu2 %v2350_v0 }
  0x18   :  { %2122 = vset.pattern.permute.xlu0 %v2353_v5 }
  0x62   :  { %v2395_v15 = vpop.permute.xlu2 %40 }
  0x79   :  { %v56_v6 = vpop.permute.xlu0 %55 }
  0x7a   :  { %v2387_v8 = vpop.permute.xlu1 %32  ;;  %v58_v12 = vmul.f32 %v56_v6, %v2389_v9 }
  0x82   :  { %v61_v11 = vpop.permute.xlu0 %60 }
  0x83   :  { %v63_v13 = vmul.f32 %v61_v11, %v2391_v10  ;;  %v2397_v16 = vpop.permute.xlu1 %36 }
  0x85   :  { %v64_v14 = vadd.f32 %v63_v13, %v58_v12 }
  0x87   :  { %v65_v18 = vperm.slane %v64_v14, 0  ;;  %v67_v19 = vperm.slane %v64_v14, 1  ;;  %v69_v20 = vperm.slane %v64_v14, 2 }
  0x89   :  { %v66_v21 = vmul.f32 %v65_v18, %v2387_v8  ;;  %v68_v22 = vmul.f32 %v67_v19, %v2397_v16  ;;  %v70_v23 = vmul.f32 %v69_v20, %v2395_v15 }
  0x8b   :  { %v71_v24 = vadd.f32 %v66_v21, %v2399_v17  ;;  %v72_v25 = vadd.f32 %v70_v23, %v68_v22 }
  0x8d   :  { %v73_v26 = vadd.f32 %v72_v25, %v71_v24 }
  0x8f   :  { %v74_v27 = vmax.f32 %v73_v26, 0.0 }
  0x91   :  { %92 = vperm.xlu0 %2122, %v74_v27   ;;  %82 = vperm.xlu1 %2118, %v74_v27  }
  0x92   :  { %77 = vperm.xlu2 %2120, %v74_v27  }
  0x99   :  { %2123 = vset.pattern.permute.xlu1 %v2354_v28  ;;  %2126 = vset.pattern.permute.xlu0 %v2352_v4 }
  0x9a   :  { %2121 = vset.pattern.permute.xlu2 %v2351_v1  ;;  %97 = vperm.xlu1 %2123, %v74_v27  }
  0x9b   :  { %87 = vperm.xlu2 %2121, %v74_v27  }
  0xa2   :  { %2125 = vset.pattern.permute.xlu1 %v2352_v4 }
  0xa3   :  { %2124 = vset.pattern.permute.xlu2 %v2350_v0 }
  0xec   :  { %v78_v29 = vpop.permute.xlu2 %77 }
  0xed   :  { %v80_v40 = vmul.f32 %v78_v29, %v2414_v33 }
  0xf5   :  { %v88_v37 = vpop.permute.xlu2 %87 }
  0xf6   :  { %v90_v41 = vmul.f32 %v88_v37, %v2416_v34 }
 0x103   :  { %v93_v35 = vpop.permute.xlu0 %92  ;;  %v83_v36 = vpop.permute.xlu1 %82 }
 0x104   :  { %v95_v38 = vmul.f32 %v93_v35, %v2412_v32  ;;  %v85_v39 = vmul.f32 %v83_v36, %v2410_v31 }
 0x106   :  { %v102_v43 = vadd.f32 %v95_v38, %v90_v41  ;;  %v101_v44 = vadd.f32 %v85_v39, %v80_v40 }
 0x108   :  { %v103_v47 = vadd.f32 %v102_v43, %v101_v44 }
 0x10c   :  { %v98_v45 = vpop.permute.xlu1 %97 }
 0x10d   :  { %v100_v46 = vmul.f32 %v98_v45, %v2422_v42 }
 0x10f   :  { %v104_v48 = vadd.f32 %v103_v47, %v100_v46 }
 0x111   :  { %v105_v50 = vperm.slane %v104_v48, 0  ;;  %v107_v51 = vperm.slane %v104_v48, 1  ;;  %v109_v52 = vperm.slane %v104_v48, 2 }
 0x113   :  { %v106_v53 = vmul.f32 %v105_v50, %v2387_v8  ;;  %v108_v54 = vmul.f32 %v107_v51, %v2397_v16  ;;  %v110_v55 = vmul.f32 %v109_v52, %v2395_v15 }
 0x115   :  { %v111_v56 = vadd.f32 %v106_v53, %v2425_v49  ;;  %v112_v57 = vadd.f32 %v110_v55, %v108_v54 }
 0x117   :  { %v2431_v58 = vadd.f32 %v112_v57, %v111_v56 }
 0x119   :  { %v114_v59 = vmul.f32 0.0625, %v2431_v58 }
 0x11b   :  { %v115_v60 = vadd.f32 %v114_v59, %v2379_v2 }
 0x11d   :  { %123 = vperm.xlu1 %2125, %v115_v60   ;;  %118 = vperm.xlu2 %2124, %v115_v60  }
 0x125   :  { %2127 = vset.pattern.permute.xlu1 %v2351_v1 }
 0x177   :  { %v119_v61 = vpop.permute.xlu2 %118 }
 0x178   :  { %v121_v63 = vmul.f32 %v119_v61, %v2389_v9 }
 0x18f   :  { %v124_v62 = vpop.permute.xlu1 %123 }
 0x190   :  { %v126_v3 = vmul.f32 %v124_v62, %v2391_v10 }
 0x192   :  { %v127_v6 = vadd.f32 %v126_v3, %v121_v63 }
 0x194   :  { %v128_v7 = vperm.slane %v127_v6, 0  ;;  %v130_v11 = vperm.slane %v127_v6, 1  ;;  %v132_v12 = vperm.slane %v127_v6, 2 }
 0x196   :  { %v129_v13 = vmul.f32 %v128_v7, %v2387_v8  ;;  %v131_v14 = vmul.f32 %v130_v11, %v2397_v16  ;;  %v133_v18 = vmul.f32 %v132_v12, %v2395_v15 }
 0x198   :  { %v134_v19 = vadd.f32 %v129_v13, %v2399_v17  ;;  %v135_v20 = vadd.f32 %v133_v18, %v131_v14 }
 0x19a   :  { %v136_v21 = vadd.f32 %v135_v20, %v134_v19 }
 0x19c   :  { %v137_v22 = vmax.f32 %v136_v21, 0.0 }
 0x19e   :  { %150 = vperm.xlu1 %2127, %v137_v22   ;;  %145 = vperm.xlu0 %2126, %v137_v22  }
 0x19f   :  { %140 = vperm.xlu2 %2124, %v137_v22  }
 0x1a6   :  { %2129 = vset.pattern.permute.xlu1 %v2354_v28 }
 0x1a7   :  { %2128 = vset.pattern.permute.xlu2 %v2353_v5  ;;  %160 = vperm.xlu1 %2129, %v137_v22  }
 0x1a8   :  { %155 = vperm.xlu2 %2128, %v137_v22  }
 0x1af   :  { %2131 = vset.pattern.permute.xlu1 %v2350_v0 }
 0x1b0   :  { %2130 = vset.pattern.permute.xlu2 %v2350_v0 }
 0x1f9   :  { %v141_v23 = vpop.permute.xlu2 %140 }
 0x1fa   :  { %v143_v30 = vmul.f32 %v141_v23, %v2414_v33 }
 0x202   :  { %v156_v26 = vpop.permute.xlu2 %155 }
 0x203   :  { %v158_v35 = vmul.f32 %v156_v26, %v2412_v32 }
 0x210   :  { %v151_v24 = vpop.permute.xlu1 %150  ;;  %v146_v25 = vpop.permute.xlu0 %145 }
 0x211   :  { %v153_v27 = vmul.f32 %v151_v24, %v2416_v34  ;;  %v148_v29 = vmul.f32 %v146_v25, %v2410_v31 }
 0x213   :  { %v165_v36 = vadd.f32 %v158_v35, %v153_v27  ;;  %v164_v37 = vadd.f32 %v148_v29, %v143_v30 }
 0x215   :  { %v166_v40 = vadd.f32 %v165_v36, %v164_v37 }
 0x219   :  { %v161_v38 = vpop.permute.xlu1 %160 }
 0x21a   :  { %v163_v39 = vmul.f32 %v161_v38, %v2422_v42 }
 0x21c   :  { %v167_v41 = vadd.f32 %v166_v40, %v163_v39 }
 0x21e   :  { %v168_v43 = vperm.slane %v167_v41, 0  ;;  %v170_v44 = vperm.slane %v167_v41, 1  ;;  %v172_v45 = vperm.slane %v167_v41, 2 }
 0x220   :  { %v169_v46 = vmul.f32 %v168_v43, %v2387_v8  ;;  %v171_v47 = vmul.f32 %v170_v44, %v2397_v16  ;;  %v173_v48 = vmul.f32 %v172_v45, %v2395_v15 }
 0x222   :  { %v174_v50 = vadd.f32 %v169_v46, %v2425_v49  ;;  %v175_v51 = vadd.f32 %v173_v48, %v171_v47 }
 0x224   :  { %v2455_v52 = vadd.f32 %v175_v51, %v174_v50 }
 0x226   :  { %v177_v53 = vmul.f32 0.0625, %v2455_v52 }
 0x228   :  { %v178_v54 = vadd.f32 %v177_v53, %v2379_v2 }
 0x22a   :  { %186 = vperm.xlu0 %2126, %v178_v54   ;;  %181 = vperm.xlu2 %2130, %v178_v54  }
 0x232   :  { %2133 = vset.pattern.permute.xlu0 %v2351_v1  ;;  %2132 = vset.pattern.permute.xlu2 %v2352_v4 }
 0x284   :  { %v182_v55 = vpop.permute.xlu2 %181 }
 0x285   :  { %v184_v57 = vmul.f32 %v182_v55, %v2389_v9 }
 0x29c   :  { %v187_v56 = vpop.permute.xlu0 %186 }
 0x29d   :  { %v189_v59 = vmul.f32 %v187_v56, %v2391_v10 }
 0x29f   :  { %v190_v60 = vadd.f32 %v189_v59, %v184_v57 }
 0x2a1   :  { %v191_v61 = vperm.slane %v190_v60, 0  ;;  %v193_v62 = vperm.slane %v190_v60, 1  ;;  %v195_v63 = vperm.slane %v190_v60, 2 }
 0x2a3   :  { %v192_v3 = vmul.f32 %v191_v61, %v2387_v8  ;;  %v194_v6 = vmul.f32 %v193_v62, %v2397_v16  ;;  %v196_v7 = vmul.f32 %v195_v63, %v2395_v15 }
 0x2a5   :  { %v197_v11 = vadd.f32 %v192_v3, %v2399_v17  ;;  %v198_v12 = vadd.f32 %v196_v7, %v194_v6 }
 0x2a7   :  { %v199_v13 = vadd.f32 %v198_v12, %v197_v11 }
 0x2a9   :  { %v200_v14 = vmax.f32 %v199_v13, 0.0 }
 0x2ab   :  { %213 = vperm.xlu0 %2133, %v200_v14   ;;  %208 = vperm.xlu2 %2132, %v200_v14  }
 0x2ac   :  { %203 = vperm.xlu1 %2131, %v200_v14  }
 0x2b3   :  { %2135 = vset.pattern.permute.xlu2 %v2354_v28  ;;  %2138 = vset.pattern.permute.xlu0 %v2350_v0 }
 0x2b4   :  { %2134 = vset.pattern.permute.xlu1 %v2353_v5  ;;  %223 = vperm.xlu2 %2135, %v200_v14  }
 0x2b5   :  { %218 = vperm.xlu1 %2134, %v200_v14  }
 0x2bc   :  { %2137 = vset.pattern.permute.xlu2 %v2352_v4 }
 0x2bd   :  { %2136 = vset.pattern.permute.xlu1 %v2350_v0 }
 0x305   :  { %v209_v19 = vpop.permute.xlu2 %208 }
 0x306   :  { %v211_v23 = vmul.f32 %v209_v19, %v2410_v31 }
 0x30e   :  { %v224_v26 = vpop.permute.xlu2 %223 }
 0x30f   :  { %v226_v30 = vmul.f32 %v224_v26, %v2422_v42 }
 0x31d   :  { %v214_v20 = vpop.permute.xlu0 %213 }
 0x31e   :  { %v204_v18 = vpop.permute.xlu1 %203  ;;  %v216_v24 = vmul.f32 %v214_v20, %v2416_v34 }
 0x31f   :  { %v206_v21 = vmul.f32 %v204_v18, %v2414_v33 }
 0x321   :  { %v227_v27 = vadd.f32 %v211_v23, %v206_v21 }
 0x327   :  { %v219_v22 = vpop.permute.xlu1 %218 }
 0x328   :  { %v221_v25 = vmul.f32 %v219_v22, %v2412_v32 }
 0x32a   :  { %v228_v29 = vadd.f32 %v221_v25, %v216_v24 }
 0x32c   :  { %v229_v35 = vadd.f32 %v228_v29, %v227_v27 }
 0x32e   :  { %v230_v36 = vadd.f32 %v229_v35, %v226_v30 }
 0x330   :  { %v231_v37 = vperm.slane %v230_v36, 0  ;;  %v233_v38 = vperm.slane %v230_v36, 1  ;;  %v235_v39 = vperm.slane %v230_v36, 2 }
 0x332   :  { %v232_v40 = vmul.f32 %v231_v37, %v2387_v8  ;;  %v234_v41 = vmul.f32 %v233_v38, %v2397_v16  ;;  %v236_v43 = vmul.f32 %v235_v39, %v2395_v15 }
 0x334   :  { %v237_v44 = vadd.f32 %v232_v40, %v2425_v49  ;;  %v238_v45 = vadd.f32 %v236_v43, %v234_v41 }
 0x336   :  { %v239_v46 = vadd.f32 %v238_v45, %v237_v44 }
 0x338   :  { %v240_v47 = vmul.f32 0.125, %v239_v46  ;;  %v304_v39 = vadd.f32 %v239_v46, %v2455_v52 }
 0x33a   :  { %v241_v48 = vadd.f32 %v240_v47, %v2379_v2  ;;  %v305_v44 = vmul.f32 2.0, %v304_v39 }
 0x33c   :  { %249 = vperm.xlu2 %2137, %v241_v48   ;;  %244 = vperm.xlu1 %2136, %v241_v48  }
 0x344   :  { %2140 = vset.pattern.permute.xlu2 %v2351_v1  ;;  %2139 = vset.pattern.permute.xlu1 %v2352_v4 }
 0x396   :  { %v250_v50 = vpop.permute.xlu2 %249 }
 0x397   :  { %v252_v53 = vmul.f32 %v250_v50, %v2391_v10 }
 0x3ae   :  { %v245_v51 = vpop.permute.xlu1 %244 }
 0x3af   :  { %v247_v54 = vmul.f32 %v245_v51, %v2389_v9 }
 0x3b1   :  { %v253_v55 = vadd.f32 %v252_v53, %v247_v54 }
 0x3b3   :  { %v254_v56 = vperm.slane %v253_v55, 0  ;;  %v256_v57 = vperm.slane %v253_v55, 1  ;;  %v258_v59 = vperm.slane %v253_v55, 2 }
 0x3b5   :  { %v255_v60 = vmul.f32 %v254_v56, %v2387_v8  ;;  %v257_v61 = vmul.f32 %v256_v57, %v2397_v16  ;;  %v259_v62 = vmul.f32 %v258_v59, %v2395_v15 }
 0x3b7   :  { %v260_v63 = vadd.f32 %v255_v60, %v2399_v17  ;;  %v261_v3 = vadd.f32 %v259_v62, %v257_v61 }
 0x3b9   :  { %v262_v6 = vadd.f32 %v261_v3, %v260_v63 }
 0x3bb   :  { %v263_v7 = vmax.f32 %v262_v6, 0.0 }
 0x3bd   :  { %276 = vperm.xlu2 %2140, %v263_v7   ;;  %271 = vperm.xlu1 %2139, %v263_v7  }
 0x3be   :  { %266 = vperm.xlu0 %2138, %v263_v7  }
 0x3c5   :  { %2142 = vset.pattern.permute.xlu2 %v2354_v28  ;;  %2141 = vset.pattern.permute.xlu1 %v2353_v5 }
 0x3c6   :  { %286 = vperm.xlu2 %2142, %v263_v7   ;;  %281 = vperm.xlu1 %2141, %v263_v7  }
 0x3ce   :  { %2143 = vset.pattern.permute.xlu1 %v2352_v4  ;;  %2144 = vset.pattern.permute.xlu2 %v2350_v0 }
 0x417   :  { %v277_v12 = vpop.permute.xlu2 %276 }
 0x418   :  { %v279_v20 = vmul.f32 %v277_v12, %v2416_v34 }
 0x420   :  { %v287_v22 = vpop.permute.xlu2 %286 }
 0x421   :  { %v289_v25 = vmul.f32 %v287_v22, %v2422_v42 }
 0x42f   :  { %v272_v11 = vpop.permute.xlu1 %271 }
 0x430   :  { %v267_v13 = vpop.permute.xlu0 %266  ;;  %v274_v14 = vmul.f32 %v272_v11, %v2410_v31 }
 0x431   :  { %v269_v18 = vmul.f32 %v267_v13, %v2414_v33 }
 0x433   :  { %v290_v23 = vadd.f32 %v274_v14, %v269_v18 }
 0x438   :  { %v282_v19 = vpop.permute.xlu1 %281 }
 0x439   :  { %v284_v21 = vmul.f32 %v282_v19, %v2412_v32 }
 0x43b   :  { %v291_v24 = vadd.f32 %v284_v21, %v279_v20 }
 0x43d   :  { %v292_v26 = vadd.f32 %v291_v24, %v290_v23 }
 0x43f   :  { %v293_v27 = vadd.f32 %v292_v26, %v289_v25 }
 0x441   :  { %v294_v29 = vperm.slane %v293_v27, 0  ;;  %v296_v30 = vperm.slane %v293_v27, 1  ;;  %v298_v35 = vperm.slane %v293_v27, 2 }
 0x443   :  { %v295_v36 = vmul.f32 %v294_v29, %v2387_v8  ;;  %v297_v37 = vmul.f32 %v296_v30, %v2397_v16  ;;  %v299_v38 = vmul.f32 %v298_v35, %v2395_v15 }
 0x445   :  { %v300_v40 = vadd.f32 %v295_v36, %v2425_v49  ;;  %v301_v41 = vadd.f32 %v299_v38, %v297_v37 }
 0x447   :  { %v302_v43 = vadd.f32 %v301_v41, %v300_v40 }
 0x449   :  { %v303_v45 = vadd.f32 %v302_v43, %v2431_v58 }
 0x44b   :  { %v306_v47 = vadd.f32 %v305_v44, %v303_v45 }
 0x44d   :  { %v307_v48 = vmul.f32 0.020833334, %v306_v47 }
 0x44f   :  { %v2506_v50 = vadd.f32 %v307_v48, %v2379_v2 }
 0x451   :  { %316 = vperm.xlu1 %2143, %v2506_v50   ;;  %311 = vperm.xlu0 %2138, %v2506_v50  }
 0x459   :  { %2146 = vset.pattern.permute.xlu1 %v2351_v1  ;;  %2145 = vset.pattern.permute.xlu0 %v2352_v4 }
 0x4c3   :  { %v317_v52 = vpop.permute.xlu1 %316  ;;  %v312_v46 = vpop.permute.xlu0 %311 }
 0x4c4   :  { %v319_v51 = vmul.f32 %v317_v52, %v2391_v10  ;;  %v314_v53 = vmul.f32 %v312_v46, %v2389_v9 }
 0x4c6   :  { %v320_v58 = vadd.f32 %v319_v51, %v314_v53 }
 0x4c8   :  { %v321_v54 = vperm.slane %v320_v58, 0  ;;  %v323_v55 = vperm.slane %v320_v58, 1  ;;  %v325_v56 = vperm.slane %v320_v58, 2 }
 0x4ca   :  { %v322_v2 = vmul.f32 %v321_v54, %v2387_v8  ;;  %v324_v57 = vmul.f32 %v323_v55, %v2397_v16  ;;  %v326_v59 = vmul.f32 %v325_v56, %v2395_v15 }
 0x4cc   :  { %v327_v60 = vadd.f32 %v322_v2, %v2399_v17  ;;  %v328_v61 = vadd.f32 %v326_v59, %v324_v57 }
 0x4ce   :  { %v329_v62 = vadd.f32 %v328_v61, %v327_v60 }
 0x4d0   :  { %v330_v63 = vmax.f32 %v329_v62, 0.0 }
 0x4d2   :  { %343 = vperm.xlu1 %2146, %v330_v63   ;;  %338 = vperm.xlu0 %2145, %v330_v63  }
 0x4d3   :  { %333 = vperm.xlu2 %2144, %v330_v63  }
 0x4da   :  { %2148 = vset.pattern.permute.xlu1 %v2354_v28 }
 0x4db   :  { %2147 = vset.pattern.permute.xlu2 %v2353_v5  ;;  %353 = vperm.xlu1 %2148, %v330_v63  }
 0x4dc   :  { %348 = vperm.xlu2 %2147, %v330_v63  }
 0x4e3   :  { %2150 = vset.pattern.permute.xlu1 %v2350_v0 }
 0x4e4   :  { %2149 = vset.pattern.permute.xlu2 %v2350_v0 }
 0x52d   :  { %v334_v3 = vpop.permute.xlu2 %333 }
 0x52e   :  { %v336_v14 = vmul.f32 %v334_v3, %v2414_v33 }
 0x536   :  { %v349_v11 = vpop.permute.xlu2 %348 }
 0x537   :  { %v351_v18 = vmul.f32 %v349_v11, %v2412_v32 }
 0x544   :  { %v344_v6 = vpop.permute.xlu1 %343  ;;  %v339_v7 = vpop.permute.xlu0 %338 }
 0x545   :  { %v346_v12 = vmul.f32 %v344_v6, %v2416_v34  ;;  %v341_v13 = vmul.f32 %v339_v7, %v2410_v31 }
 0x547   :  { %v358_v19 = vadd.f32 %v351_v18, %v346_v12  ;;  %v357_v20 = vadd.f32 %v341_v13, %v336_v14 }
 0x549   :  { %v359_v22 = vadd.f32 %v358_v19, %v357_v20 }
 0x54d   :  { %v354_v21 = vpop.permute.xlu1 %353 }
 0x54e   :  { %v356_v23 = vmul.f32 %v354_v21, %v2422_v42 }
 0x550   :  { %v360_v24 = vadd.f32 %v359_v22, %v356_v23 }
 0x552   :  { %v361_v25 = vperm.slane %v360_v24, 0  ;;  %v363_v26 = vperm.slane %v360_v24, 1  ;;  %v365_v27 = vperm.slane %v360_v24, 2 }
 0x554   :  { %v362_v29 = vmul.f32 %v361_v25, %v2387_v8  ;;  %v364_v30 = vmul.f32 %v363_v26, %v2397_v16  ;;  %v366_v35 = vmul.f32 %v365_v27, %v2395_v15 }
 0x556   :  { %v367_v36 = vadd.f32 %v362_v29, %v2425_v49  ;;  %v368_v37 = vadd.f32 %v366_v35, %v364_v30 }
 0x558   :  { %v2531_v38 = vadd.f32 %v368_v37, %v367_v36 }
 0x55a   :  { %v370_v39 = vmul.f32 0.0625, %v2531_v38 }
 0x55c   :  { %v371_v40 = vadd.f32 %v370_v39, %v2506_v50 }
 0x55e   :  { %379 = vperm.xlu0 %2145, %v371_v40   ;;  %374 = vperm.xlu2 %2149, %v371_v40  }
 0x566   :  { %2152 = vset.pattern.permute.xlu0 %v2351_v1  ;;  %2151 = vset.pattern.permute.xlu2 %v2352_v4 }
 0x5b8   :  { %v375_v41 = vpop.permute.xlu2 %374 }
 0x5b9   :  { %v377_v44 = vmul.f32 %v375_v41, %v2389_v9 }
 0x5d0   :  { %v380_v43 = vpop.permute.xlu0 %379 }
 0x5d1   :  { %v382_v45 = vmul.f32 %v380_v43, %v2391_v10 }
 0x5d3   :  { %v383_v47 = vadd.f32 %v382_v45, %v377_v44 }
 0x5d5   :  { %v384_v48 = vperm.slane %v383_v47, 0  ;;  %v386_v52 = vperm.slane %v383_v47, 1  ;;  %v388_v46 = vperm.slane %v383_v47, 2 }
 0x5d7   :  { %v385_v51 = vmul.f32 %v384_v48, %v2387_v8  ;;  %v387_v53 = vmul.f32 %v386_v52, %v2397_v16  ;;  %v389_v58 = vmul.f32 %v388_v46, %v2395_v15 }
 0x5d9   :  { %v390_v54 = vadd.f32 %v385_v51, %v2399_v17  ;;  %v391_v55 = vadd.f32 %v389_v58, %v387_v53 }
 0x5db   :  { %v392_v56 = vadd.f32 %v391_v55, %v390_v54 }
 0x5dd   :  { %v393_v2 = vmax.f32 %v392_v56, 0.0 }
 0x5df   :  { %406 = vperm.xlu0 %2152, %v393_v2   ;;  %401 = vperm.xlu2 %2151, %v393_v2  }
 0x5e0   :  { %396 = vperm.xlu1 %2150, %v393_v2  }
 0x5e7   :  { %2154 = vset.pattern.permute.xlu2 %v2354_v28  ;;  %2157 = vset.pattern.permute.xlu0 %v2350_v0 }
 0x5e8   :  { %2153 = vset.pattern.permute.xlu1 %v2353_v5  ;;  %416 = vperm.xlu2 %2154, %v393_v2  }
 0x5e9   :  { %411 = vperm.xlu1 %2153, %v393_v2  }
 0x5f0   :  { %2156 = vset.pattern.permute.xlu2 %v2352_v4 }
 0x5f1   :  { %2155 = vset.pattern.permute.xlu1 %v2350_v0 }
 0x639   :  { %v402_v59 = vpop.permute.xlu2 %401 }
 0x63a   :  { %v404_v63 = vmul.f32 %v402_v59, %v2410_v31 }
 0x642   :  { %v417_v7 = vpop.permute.xlu2 %416 }
 0x643   :  { %v419_v13 = vmul.f32 %v417_v7, %v2422_v42 }
 0x651   :  { %v407_v60 = vpop.permute.xlu0 %406 }
 0x652   :  { %v397_v57 = vpop.permute.xlu1 %396  ;;  %v409_v3 = vmul.f32 %v407_v60, %v2416_v34 }
 0x653   :  { %v399_v61 = vmul.f32 %v397_v57, %v2414_v33 }
 0x655   :  { %v420_v11 = vadd.f32 %v404_v63, %v399_v61 }
 0x65b   :  { %v412_v62 = vpop.permute.xlu1 %411 }
 0x65c   :  { %v414_v6 = vmul.f32 %v412_v62, %v2412_v32 }
 0x65e   :  { %v421_v12 = vadd.f32 %v414_v6, %v409_v3 }
 0x660   :  { %v422_v14 = vadd.f32 %v421_v12, %v420_v11 }
 0x662   :  { %v423_v18 = vadd.f32 %v422_v14, %v419_v13 }
 0x664   :  { %v424_v19 = vperm.slane %v423_v18, 0  ;;  %v426_v20 = vperm.slane %v423_v18, 1  ;;  %v428_v21 = vperm.slane %v423_v18, 2 }
 0x666   :  { %v425_v22 = vmul.f32 %v424_v19, %v2387_v8  ;;  %v427_v23 = vmul.f32 %v426_v20, %v2397_v16  ;;  %v429_v24 = vmul.f32 %v428_v21, %v2395_v15 }
 0x668   :  { %v430_v25 = vadd.f32 %v425_v22, %v2425_v49  ;;  %v431_v26 = vadd.f32 %v429_v24, %v427_v23 }
 0x66a   :  { %v2557_v27 = vadd.f32 %v431_v26, %v430_v25 }
 0x66c   :  { %v433_v29 = vmul.f32 0.0625, %v2557_v27 }
 0x66e   :  { %v434_v30 = vadd.f32 %v433_v29, %v2506_v50 }
 0x670   :  { %442 = vperm.xlu2 %2156, %v434_v30   ;;  %437 = vperm.xlu1 %2155, %v434_v30  }
 0x678   :  { %2159 = vset.pattern.permute.xlu2 %v2351_v1  ;;  %2158 = vset.pattern.permute.xlu1 %v2352_v4 }
 0x6ca   :  { %v443_v35 = vpop.permute.xlu2 %442 }
 0x6cb   :  { %v445_v37 = vmul.f32 %v443_v35, %v2391_v10 }
 0x6e2   :  { %v438_v36 = vpop.permute.xlu1 %437 }
 0x6e3   :  { %v440_v39 = vmul.f32 %v438_v36, %v2389_v9 }
 0x6e5   :  { %v446_v40 = vadd.f32 %v445_v37, %v440_v39 }
 0x6e7   :  { %v447_v41 = vperm.slane %v446_v40, 0  ;;  %v449_v43 = vperm.slane %v446_v40, 1  ;;  %v451_v44 = vperm.slane %v446_v40, 2 }
 0x6e9   :  { %v448_v45 = vmul.f32 %v447_v41, %v2387_v8  ;;  %v450_v47 = vmul.f32 %v449_v43, %v2397_v16  ;;  %v452_v48 = vmul.f32 %v451_v44, %v2395_v15 }
 0x6eb   :  { %v453_v52 = vadd.f32 %v448_v45, %v2399_v17  ;;  %v454_v46 = vadd.f32 %v452_v48, %v450_v47 }
 0x6ed   :  { %v455_v51 = vadd.f32 %v454_v46, %v453_v52 }
 0x6ef   :  { %v456_v53 = vmax.f32 %v455_v51, 0.0 }
 0x6f1   :  { %469 = vperm.xlu2 %2159, %v456_v53   ;;  %464 = vperm.xlu1 %2158, %v456_v53  }
 0x6f2   :  { %459 = vperm.xlu0 %2157, %v456_v53  }
 0x6f9   :  { %2161 = vset.pattern.permute.xlu2 %v2354_v28  ;;  %2160 = vset.pattern.permute.xlu1 %v2353_v5 }
 0x6fa   :  { %479 = vperm.xlu2 %2161, %v456_v53   ;;  %474 = vperm.xlu1 %2160, %v456_v53  }
 0x702   :  { %2162 = vset.pattern.permute.xlu1 %v2352_v4  ;;  %2163 = vset.pattern.permute.xlu2 %v2350_v0 }
 0x74b   :  { %v470_v54 = vpop.permute.xlu2 %469 }
 0x74c   :  { %v472_v59 = vmul.f32 %v470_v54, %v2416_v34 }
 0x754   :  { %v480_v61 = vpop.permute.xlu2 %479 }
 0x755   :  { %v482_v3 = vmul.f32 %v480_v61, %v2422_v42 }
 0x763   :  { %v465_v58 = vpop.permute.xlu1 %464 }
 0x764   :  { %v460_v55 = vpop.permute.xlu0 %459  ;;  %v467_v56 = vmul.f32 %v465_v58, %v2410_v31 }
 0x765   :  { %v462_v2 = vmul.f32 %v460_v55, %v2414_v33 }
 0x767   :  { %v483_v62 = vadd.f32 %v467_v56, %v462_v2 }
 0x76c   :  { %v475_v57 = vpop.permute.xlu1 %474 }
 0x76d   :  { %v477_v60 = vmul.f32 %v475_v57, %v2412_v32 }
 0x76f   :  { %v484_v63 = vadd.f32 %v477_v60, %v472_v59 }
 0x771   :  { %v485_v6 = vadd.f32 %v484_v63, %v483_v62 }
 0x773   :  { %v486_v7 = vadd.f32 %v485_v6, %v482_v3 }
 0x775   :  { %v487_v11 = vperm.slane %v486_v7, 0  ;;  %v489_v12 = vperm.slane %v486_v7, 1  ;;  %v491_v13 = vperm.slane %v486_v7, 2 }
 0x777   :  { %v488_v14 = vmul.f32 %v487_v11, %v2387_v8  ;;  %v490_v18 = vmul.f32 %v489_v12, %v2397_v16  ;;  %v492_v19 = vmul.f32 %v491_v13, %v2395_v15 }
 0x779   :  { %v493_v20 = vadd.f32 %v488_v14, %v2425_v49  ;;  %v494_v21 = vadd.f32 %v492_v19, %v490_v18 }
 0x77b   :  { %v495_v22 = vadd.f32 %v494_v21, %v493_v20 }
 0x77d   :  { %v496_v23 = vmul.f32 0.125, %v495_v22  ;;  %v560_v13 = vadd.f32 %v495_v22, %v2557_v27 }
 0x77f   :  { %v497_v24 = vadd.f32 %v496_v23, %v2506_v50  ;;  %v561_v20 = vmul.f32 2.0, %v560_v13 }
 0x781   :  { %505 = vperm.xlu1 %2162, %v497_v24   ;;  %500 = vperm.xlu0 %2157, %v497_v24  }
 0x789   :  { %2165 = vset.pattern.permute.xlu1 %v2351_v1  ;;  %2164 = vset.pattern.permute.xlu0 %v2352_v4 }
 0x7f3   :  { %v506_v25 = vpop.permute.xlu1 %505  ;;  %v501_v26 = vpop.permute.xlu0 %500 }
 0x7f4   :  { %v508_v29 = vmul.f32 %v506_v25, %v2391_v10  ;;  %v503_v30 = vmul.f32 %v501_v26, %v2389_v9 }
 0x7f6   :  { %v509_v35 = vadd.f32 %v508_v29, %v503_v30 }
 0x7f8   :  { %v510_v36 = vperm.slane %v509_v35, 0  ;;  %v512_v37 = vperm.slane %v509_v35, 1  ;;  %v514_v39 = vperm.slane %v509_v35, 2 }
 0x7fa   :  { %v511_v40 = vmul.f32 %v510_v36, %v2387_v8  ;;  %v513_v41 = vmul.f32 %v512_v37, %v2397_v16  ;;  %v515_v43 = vmul.f32 %v514_v39, %v2395_v15 }
 0x7fc   :  { %v516_v44 = vadd.f32 %v511_v40, %v2399_v17  ;;  %v517_v45 = vadd.f32 %v515_v43, %v513_v41 }
 0x7fe   :  { %v518_v47 = vadd.f32 %v517_v45, %v516_v44 }
 0x800   :  { %v519_v48 = vmax.f32 %v518_v47, 0.0 }
 0x802   :  { %532 = vperm.xlu1 %2165, %v519_v48   ;;  %527 = vperm.xlu0 %2164, %v519_v48  }
 0x803   :  { %522 = vperm.xlu2 %2163, %v519_v48  }
 0x80a   :  { %2167 = vset.pattern.permute.xlu1 %v2354_v28 }
 0x80b   :  { %2166 = vset.pattern.permute.xlu2 %v2353_v5  ;;  %542 = vperm.xlu1 %2167, %v519_v48  }
 0x80c   :  { %537 = vperm.xlu2 %2166, %v519_v48  }
 0x813   :  { %2169 = vset.pattern.permute.xlu1 %v2350_v0 }
 0x814   :  { %2168 = vset.pattern.permute.xlu2 %v2350_v0 }
 0x85d   :  { %v523_v52 = vpop.permute.xlu2 %522 }
 0x85e   :  { %v525_v55 = vmul.f32 %v523_v52, %v2414_v33 }
 0x866   :  { %v538_v53 = vpop.permute.xlu2 %537 }
 0x867   :  { %v540_v56 = vmul.f32 %v538_v53, %v2412_v32 }
 0x874   :  { %v533_v46 = vpop.permute.xlu1 %532  ;;  %v528_v51 = vpop.permute.xlu0 %527 }
 0x875   :  { %v535_v58 = vmul.f32 %v533_v46, %v2416_v34  ;;  %v530_v54 = vmul.f32 %v528_v51, %v2410_v31 }
 0x877   :  { %v547_v2 = vadd.f32 %v540_v56, %v535_v58  ;;  %v546_v57 = vadd.f32 %v530_v54, %v525_v55 }
 0x879   :  { %v548_v60 = vadd.f32 %v547_v2, %v546_v57 }
 0x87d   :  { %v543_v59 = vpop.permute.xlu1 %542 }
 0x87e   :  { %v545_v61 = vmul.f32 %v543_v59, %v2422_v42 }
 0x880   :  { %v549_v62 = vadd.f32 %v548_v60, %v545_v61 }
 0x882   :  { %v550_v63 = vperm.slane %v549_v62, 0  ;;  %v552_v3 = vperm.slane %v549_v62, 1  ;;  %v554_v6 = vperm.slane %v549_v62, 2 }
 0x884   :  { %v551_v7 = vmul.f32 %v550_v63, %v2387_v8  ;;  %v553_v11 = vmul.f32 %v552_v3, %v2397_v16  ;;  %v555_v12 = vmul.f32 %v554_v6, %v2395_v15 }
 0x886   :  { %v556_v14 = vadd.f32 %v551_v7, %v2425_v49  ;;  %v557_v18 = vadd.f32 %v555_v12, %v553_v11 }
 0x888   :  { %v558_v19 = vadd.f32 %v557_v18, %v556_v14 }
 0x88a   :  { %v559_v21 = vadd.f32 %v558_v19, %v2531_v38 }
 0x88c   :  { %v562_v23 = vadd.f32 %v561_v20, %v559_v21 }
 0x88e   :  { %v563_v24 = vmul.f32 0.020833334, %v562_v23 }
 0x890   :  { %v2607_v25 = vadd.f32 %v563_v24, %v2506_v50 }
 0x892   :  { %572 = vperm.xlu0 %2164, %v2607_v25   ;;  %567 = vperm.xlu2 %2168, %v2607_v25  }
 0x89a   :  { %2171 = vset.pattern.permute.xlu0 %v2351_v1  ;;  %2170 = vset.pattern.permute.xlu2 %v2352_v4 }
 0x8ec   :  { %v568_v27 = vpop.permute.xlu2 %567 }
 0x8ed   :  { %v570_v26 = vmul.f32 %v568_v27, %v2389_v9 }
 0x904   :  { %v573_v22 = vpop.permute.xlu0 %572 }
 0x905   :  { %v575_v29 = vmul.f32 %v573_v22, %v2391_v10 }
 0x907   :  { %v576_v38 = vadd.f32 %v575_v29, %v570_v26 }
 0x909   :  { %v577_v30 = vperm.slane %v576_v38, 0  ;;  %v579_v35 = vperm.slane %v576_v38, 1  ;;  %v581_v36 = vperm.slane %v576_v38, 2 }
 0x90b   :  { %v578_v50 = vmul.f32 %v577_v30, %v2387_v8  ;;  %v580_v37 = vmul.f32 %v579_v35, %v2397_v16  ;;  %v582_v39 = vmul.f32 %v581_v36, %v2395_v15 }
 0x90d   :  { %v583_v40 = vadd.f32 %v578_v50, %v2399_v17  ;;  %v584_v41 = vadd.f32 %v582_v39, %v580_v37 }
 0x90f   :  { %v585_v43 = vadd.f32 %v584_v41, %v583_v40 }
 0x911   :  { %v586_v44 = vmax.f32 %v585_v43, 0.0 }
 0x913   :  { %599 = vperm.xlu0 %2171, %v586_v44   ;;  %594 = vperm.xlu2 %2170, %v586_v44  }
 0x914   :  { %589 = vperm.xlu1 %2169, %v586_v44  }
 0x91b   :  { %2173 = vset.pattern.permute.xlu2 %v2354_v28  ;;  %2176 = vset.pattern.permute.xlu0 %v2350_v0 }
 0x91c   :  { %2172 = vset.pattern.permute.xlu1 %v2353_v5  ;;  %609 = vperm.xlu2 %2173, %v586_v44  }
 0x91d   :  { %604 = vperm.xlu1 %2172, %v586_v44  }
 0x924   :  { %2175 = vset.pattern.permute.xlu2 %v2352_v4 }
 0x925   :  { %2174 = vset.pattern.permute.xlu1 %v2350_v0 }
 0x96d   :  { %v595_v47 = vpop.permute.xlu2 %594 }
 0x96e   :  { %v597_v51 = vmul.f32 %v595_v47, %v2410_v31 }
 0x976   :  { %v610_v54 = vpop.permute.xlu2 %609 }
 0x977   :  { %v612_v2 = vmul.f32 %v610_v54, %v2422_v42 }
 0x985   :  { %v600_v48 = vpop.permute.xlu0 %599 }
 0x986   :  { %v590_v45 = vpop.permute.xlu1 %589  ;;  %v602_v53 = vmul.f32 %v600_v48, %v2416_v34 }
 0x987   :  { %v592_v52 = vmul.f32 %v590_v45, %v2414_v33 }
 0x989   :  { %v613_v55 = vadd.f32 %v597_v51, %v592_v52 }
 0x98f   :  { %v605_v46 = vpop.permute.xlu1 %604 }
 0x990   :  { %v607_v58 = vmul.f32 %v605_v46, %v2412_v32 }
 0x992   :  { %v614_v56 = vadd.f32 %v607_v58, %v602_v53 }
 0x994   :  { %v615_v57 = vadd.f32 %v614_v56, %v613_v55 }
 0x996   :  { %v616_v59 = vadd.f32 %v615_v57, %v612_v2 }
 0x998   :  { %v617_v60 = vperm.slane %v616_v59, 0  ;;  %v619_v61 = vperm.slane %v616_v59, 1  ;;  %v621_v62 = vperm.slane %v616_v59, 2 }
 0x99a   :  { %v618_v63 = vmul.f32 %v617_v60, %v2387_v8  ;;  %v620_v3 = vmul.f32 %v619_v61, %v2397_v16  ;;  %v622_v6 = vmul.f32 %v621_v62, %v2395_v15 }
 0x99c   :  { %v623_v7 = vadd.f32 %v618_v63, %v2425_v49  ;;  %v624_v11 = vadd.f32 %v622_v6, %v620_v3 }
 0x99e   :  { %v2633_v12 = vadd.f32 %v624_v11, %v623_v7 }
 0x9a0   :  { %v626_v13 = vmul.f32 0.0625, %v2633_v12 }
 0x9a2   :  { %v627_v14 = vadd.f32 %v626_v13, %v2607_v25 }
 0x9a4   :  { %635 = vperm.xlu2 %2175, %v627_v14   ;;  %630 = vperm.xlu1 %2174, %v627_v14  }
 0x9ac   :  { %2178 = vset.pattern.permute.xlu2 %v2351_v1  ;;  %2177 = vset.pattern.permute.xlu1 %v2352_v4 }
 0x9fe   :  { %v636_v18 = vpop.permute.xlu2 %635 }
 0x9ff   :  { %v638_v20 = vmul.f32 %v636_v18, %v2391_v10 }
 0xa16   :  { %v631_v19 = vpop.permute.xlu1 %630 }
 0xa17   :  { %v633_v21 = vmul.f32 %v631_v19, %v2389_v9 }
 0xa19   :  { %v639_v23 = vadd.f32 %v638_v20, %v633_v21 }
 0xa1b   :  { %v640_v24 = vperm.slane %v639_v23, 0  ;;  %v642_v27 = vperm.slane %v639_v23, 1  ;;  %v644_v22 = vperm.slane %v639_v23, 2 }
 0xa1d   :  { %v641_v26 = vmul.f32 %v640_v24, %v2387_v8  ;;  %v643_v29 = vmul.f32 %v642_v27, %v2397_v16  ;;  %v645_v38 = vmul.f32 %v644_v22, %v2395_v15 }
 0xa1f   :  { %v646_v30 = vadd.f32 %v641_v26, %v2399_v17  ;;  %v647_v35 = vadd.f32 %v645_v38, %v643_v29 }
 0xa21   :  { %v648_v36 = vadd.f32 %v647_v35, %v646_v30 }
 0xa23   :  { %v649_v50 = vmax.f32 %v648_v36, 0.0 }
 0xa25   :  { %662 = vperm.xlu2 %2178, %v649_v50   ;;  %657 = vperm.xlu1 %2177, %v649_v50  }
 0xa26   :  { %652 = vperm.xlu0 %2176, %v649_v50  }
 0xa2d   :  { %2180 = vset.pattern.permute.xlu2 %v2354_v28  ;;  %2179 = vset.pattern.permute.xlu1 %v2353_v5 }
 0xa2e   :  { %672 = vperm.xlu2 %2180, %v649_v50   ;;  %667 = vperm.xlu1 %2179, %v649_v50  }
 0xa36   :  { %2181 = vset.pattern.permute.xlu1 %v2352_v4  ;;  %2182 = vset.pattern.permute.xlu2 %v2350_v0 }
 0xa7f   :  { %v663_v39 = vpop.permute.xlu2 %662 }
 0xa80   :  { %v665_v45 = vmul.f32 %v663_v39, %v2416_v34 }
 0xa88   :  { %v673_v48 = vpop.permute.xlu2 %672 }
 0xa89   :  { %v675_v51 = vmul.f32 %v673_v48, %v2422_v42 }
 0xa97   :  { %v658_v37 = vpop.permute.xlu1 %657 }
 0xa98   :  { %v653_v40 = vpop.permute.xlu0 %652  ;;  %v660_v41 = vmul.f32 %v658_v37, %v2410_v31 }
 0xa99   :  { %v655_v43 = vmul.f32 %v653_v40, %v2414_v33 }
 0xa9b   :  { %v676_v52 = vadd.f32 %v660_v41, %v655_v43 }
 0xaa0   :  { %v668_v44 = vpop.permute.xlu1 %667 }
 0xaa1   :  { %v670_v47 = vmul.f32 %v668_v44, %v2412_v32 }
 0xaa3   :  { %v677_v46 = vadd.f32 %v670_v47, %v665_v45 }
 0xaa5   :  { %v678_v53 = vadd.f32 %v677_v46, %v676_v52 }
 0xaa7   :  { %v679_v58 = vadd.f32 %v678_v53, %v675_v51 }
 0xaa9   :  { %v680_v54 = vperm.slane %v679_v58, 0  ;;  %v682_v55 = vperm.slane %v679_v58, 1  ;;  %v684_v56 = vperm.slane %v679_v58, 2 }
 0xaab   :  { %v681_v2 = vmul.f32 %v680_v54, %v2387_v8  ;;  %v683_v57 = vmul.f32 %v682_v55, %v2397_v16  ;;  %v685_v59 = vmul.f32 %v684_v56, %v2395_v15 }
 0xaad   :  { %v686_v60 = vadd.f32 %v681_v2, %v2425_v49  ;;  %v687_v61 = vadd.f32 %v685_v59, %v683_v57 }
 0xaaf   :  { %v2658_v62 = vadd.f32 %v687_v61, %v686_v60 }
 0xab1   :  { %v689_v63 = vmul.f32 0.0625, %v2658_v62 }
 0xab3   :  { %v690_v3 = vadd.f32 %v689_v63, %v2607_v25 }
 0xab5   :  { %698 = vperm.xlu1 %2181, %v690_v3   ;;  %693 = vperm.xlu0 %2176, %v690_v3  }
 0xabd   :  { %2184 = vset.pattern.permute.xlu1 %v2351_v1  ;;  %2183 = vset.pattern.permute.xlu0 %v2352_v4 }
 0xb27   :  { %v699_v6 = vpop.permute.xlu1 %698  ;;  %v694_v7 = vpop.permute.xlu0 %693 }
 0xb28   :  { %v701_v11 = vmul.f32 %v699_v6, %v2391_v10  ;;  %v696_v13 = vmul.f32 %v694_v7, %v2389_v9 }
 0xb2a   :  { %v702_v14 = vadd.f32 %v701_v11, %v696_v13 }
 0xb2c   :  { %v703_v18 = vperm.slane %v702_v14, 0  ;;  %v705_v19 = vperm.slane %v702_v14, 1  ;;  %v707_v20 = vperm.slane %v702_v14, 2 }
 0xb2e   :  { %v704_v21 = vmul.f32 %v703_v18, %v2387_v8  ;;  %v706_v23 = vmul.f32 %v705_v19, %v2397_v16  ;;  %v708_v24 = vmul.f32 %v707_v20, %v2395_v15 }
 0xb30   :  { %v709_v27 = vadd.f32 %v704_v21, %v2399_v17  ;;  %v710_v22 = vadd.f32 %v708_v24, %v706_v23 }
 0xb32   :  { %v711_v26 = vadd.f32 %v710_v22, %v709_v27 }
 0xb34   :  { %v712_v29 = vmax.f32 %v711_v26, 0.0 }
 0xb36   :  { %725 = vperm.xlu1 %2184, %v712_v29   ;;  %720 = vperm.xlu0 %2183, %v712_v29  }
 0xb37   :  { %715 = vperm.xlu2 %2182, %v712_v29  }
 0xb3e   :  { %2186 = vset.pattern.permute.xlu1 %v2354_v28 }
 0xb3f   :  { %2185 = vset.pattern.permute.xlu2 %v2353_v5  ;;  %735 = vperm.xlu1 %2186, %v712_v29  }
 0xb40   :  { %730 = vperm.xlu2 %2185, %v712_v29  }
 0xb47   :  { %2188 = vset.pattern.permute.xlu1 %v2350_v0 }
 0xb48   :  { %2187 = vset.pattern.permute.xlu2 %v2350_v0 }
 0xb91   :  { %v716_v38 = vpop.permute.xlu2 %715 }
 0xb92   :  { %v718_v39 = vmul.f32 %v716_v38, %v2414_v33 }
 0xb9a   :  { %v731_v36 = vpop.permute.xlu2 %730 }
 0xb9b   :  { %v733_v40 = vmul.f32 %v731_v36, %v2412_v32 }
 0xba8   :  { %v726_v30 = vpop.permute.xlu1 %725  ;;  %v721_v35 = vpop.permute.xlu0 %720 }
 0xba9   :  { %v728_v50 = vmul.f32 %v726_v30, %v2416_v34  ;;  %v723_v37 = vmul.f32 %v721_v35, %v2410_v31 }
 0xbab   :  { %v740_v41 = vadd.f32 %v733_v40, %v728_v50  ;;  %v739_v43 = vadd.f32 %v723_v37, %v718_v39 }
 0xbad   :  { %v741_v45 = vadd.f32 %v740_v41, %v739_v43 }
 0xbb1   :  { %v736_v44 = vpop.permute.xlu1 %735 }
 0xbb2   :  { %v738_v47 = vmul.f32 %v736_v44, %v2422_v42 }
 0xbb4   :  { %v742_v48 = vadd.f32 %v741_v45, %v738_v47 }
 0xbb6   :  { %v743_v52 = vperm.slane %v742_v48, 0  ;;  %v745_v46 = vperm.slane %v742_v48, 1  ;;  %v747_v51 = vperm.slane %v742_v48, 2 }
 0xbb8   :  { %v744_v53 = vmul.f32 %v743_v52, %v2387_v8  ;;  %v746_v58 = vmul.f32 %v745_v46, %v2397_v16  ;;  %v748_v54 = vmul.f32 %v747_v51, %v2395_v15 }
 0xbba   :  { %v749_v55 = vadd.f32 %v744_v53, %v2425_v49  ;;  %v750_v56 = vadd.f32 %v748_v54, %v746_v58 }
 0xbbc   :  { %v751_v2 = vadd.f32 %v750_v56, %v749_v55 }
 0xbbe   :  { %v752_v57 = vmul.f32 0.125, %v751_v2  ;;  %v816_v51 = vadd.f32 %v751_v2, %v2658_v62 }
 0xbc0   :  { %v753_v59 = vadd.f32 %v752_v57, %v2607_v25  ;;  %v817_v55 = vmul.f32 2.0, %v816_v51 }
 0xbc2   :  { %761 = vperm.xlu0 %2183, %v753_v59   ;;  %756 = vperm.xlu2 %2187, %v753_v59  }
 0xbca   :  { %2190 = vset.pattern.permute.xlu0 %v2351_v1  ;;  %2189 = vset.pattern.permute.xlu2 %v2352_v4 }
 0xc1c   :  { %v757_v60 = vpop.permute.xlu2 %756 }
 0xc1d   :  { %v759_v63 = vmul.f32 %v757_v60, %v2389_v9 }
 0xc34   :  { %v762_v61 = vpop.permute.xlu0 %761 }
 0xc35   :  { %v764_v3 = vmul.f32 %v762_v61, %v2391_v10 }
 0xc37   :  { %v765_v6 = vadd.f32 %v764_v3, %v759_v63 }
 0xc39   :  { %v766_v7 = vperm.slane %v765_v6, 0  ;;  %v768_v11 = vperm.slane %v765_v6, 1  ;;  %v770_v13 = vperm.slane %v765_v6, 2 }
 0xc3b   :  { %v767_v14 = vmul.f32 %v766_v7, %v2387_v8  ;;  %v769_v18 = vmul.f32 %v768_v11, %v2397_v16  ;;  %v771_v19 = vmul.f32 %v770_v13, %v2395_v15 }
 0xc3d   :  { %v772_v20 = vadd.f32 %v767_v14, %v2399_v17  ;;  %v773_v21 = vadd.f32 %v771_v19, %v769_v18 }
 0xc3f   :  { %v774_v23 = vadd.f32 %v773_v21, %v772_v20 }
 0xc41   :  { %v775_v24 = vmax.f32 %v774_v23, 0.0 }
 0xc43   :  { %788 = vperm.xlu0 %2190, %v775_v24   ;;  %783 = vperm.xlu2 %2189, %v775_v24  }
 0xc44   :  { %778 = vperm.xlu1 %2188, %v775_v24  }
 0xc4b   :  { %2192 = vset.pattern.permute.xlu2 %v2354_v28  ;;  %2195 = vset.pattern.permute.xlu0 %v2350_v0 }
 0xc4c   :  { %2191 = vset.pattern.permute.xlu1 %v2353_v5  ;;  %798 = vperm.xlu2 %2192, %v775_v24  }
 0xc4d   :  { %793 = vperm.xlu1 %2191, %v775_v24  }
 0xc54   :  { %2194 = vset.pattern.permute.xlu2 %v2352_v4 }
 0xc55   :  { %2193 = vset.pattern.permute.xlu1 %v2350_v0 }
 0xc9d   :  { %v784_v22 = vpop.permute.xlu2 %783 }
 0xc9e   :  { %v786_v30 = vmul.f32 %v784_v22, %v2410_v31 }
 0xca6   :  { %v799_v50 = vpop.permute.xlu2 %798 }
 0xca7   :  { %v801_v40 = vmul.f32 %v799_v50, %v2422_v42 }
 0xcb5   :  { %v789_v26 = vpop.permute.xlu0 %788 }
 0xcb6   :  { %v779_v27 = vpop.permute.xlu1 %778  ;;  %v791_v35 = vmul.f32 %v789_v26, %v2416_v34 }
 0xcb7   :  { %v781_v29 = vmul.f32 %v779_v27, %v2414_v33 }
 0xcb9   :  { %v802_v37 = vadd.f32 %v786_v30, %v781_v29 }
 0xcbf   :  { %v794_v38 = vpop.permute.xlu1 %793 }
 0xcc0   :  { %v796_v36 = vmul.f32 %v794_v38, %v2412_v32 }
 0xcc2   :  { %v803_v39 = vadd.f32 %v796_v36, %v791_v35 }
 0xcc4   :  { %v804_v41 = vadd.f32 %v803_v39, %v802_v37 }
 0xcc6   :  { %v805_v43 = vadd.f32 %v804_v41, %v801_v40 }
 0xcc8   :  { %v806_v44 = vperm.slane %v805_v43, 0  ;;  %v808_v45 = vperm.slane %v805_v43, 1  ;;  %v810_v47 = vperm.slane %v805_v43, 2 }
 0xcca   :  { %v807_v48 = vmul.f32 %v806_v44, %v2387_v8  ;;  %v809_v52 = vmul.f32 %v808_v45, %v2397_v16  ;;  %v811_v46 = vmul.f32 %v810_v47, %v2395_v15 }
 0xccc   :  { %v812_v53 = vadd.f32 %v807_v48, %v2425_v49  ;;  %v813_v58 = vadd.f32 %v811_v46, %v809_v52 }
 0xcce   :  { %v814_v54 = vadd.f32 %v813_v58, %v812_v53 }
 0xcd0   :  { %v815_v56 = vadd.f32 %v814_v54, %v2633_v12 }
 0xcd2   :  { %v818_v57 = vadd.f32 %v817_v55, %v815_v56 }
 0xcd4   :  { %v819_v59 = vmul.f32 0.020833334, %v818_v57 }
 0xcd6   :  { %v2709_v60 = vadd.f32 %v819_v59, %v2607_v25 }
 0xcd8   :  { %828 = vperm.xlu2 %2194, %v2709_v60   ;;  %823 = vperm.xlu1 %2193, %v2709_v60  }
 0xce0   :  { %2197 = vset.pattern.permute.xlu2 %v2351_v1  ;;  %2196 = vset.pattern.permute.xlu1 %v2352_v4 }
 0xd32   :  { %v829_v62 = vpop.permute.xlu2 %828 }
 0xd33   :  { %v831_v61 = vmul.f32 %v829_v62, %v2391_v10 }
 0xd4a   :  { %v824_v2 = vpop.permute.xlu1 %823 }
 0xd4b   :  { %v826_v63 = vmul.f32 %v824_v2, %v2389_v9 }
 0xd4d   :  { %v832_v12 = vadd.f32 %v831_v61, %v826_v63 }
 0xd4f   :  { %v833_v3 = vperm.slane %v832_v12, 0  ;;  %v835_v6 = vperm.slane %v832_v12, 1  ;;  %v837_v7 = vperm.slane %v832_v12, 2 }
 0xd51   :  { %v834_v25 = vmul.f32 %v833_v3, %v2387_v8  ;;  %v836_v11 = vmul.f32 %v835_v6, %v2397_v16  ;;  %v838_v13 = vmul.f32 %v837_v7, %v2395_v15 }
 0xd53   :  { %v839_v14 = vadd.f32 %v834_v25, %v2399_v17  ;;  %v840_v18 = vadd.f32 %v838_v13, %v836_v11 }
 0xd55   :  { %v841_v19 = vadd.f32 %v840_v18, %v839_v14 }
 0xd57   :  { %v842_v20 = vmax.f32 %v841_v19, 0.0 }
 0xd59   :  { %855 = vperm.xlu2 %2197, %v842_v20   ;;  %850 = vperm.xlu1 %2196, %v842_v20  }
 0xd5a   :  { %845 = vperm.xlu0 %2195, %v842_v20  }
 0xd61   :  { %2199 = vset.pattern.permute.xlu2 %v2354_v28  ;;  %2198 = vset.pattern.permute.xlu1 %v2353_v5 }
 0xd62   :  { %865 = vperm.xlu2 %2199, %v842_v20   ;;  %860 = vperm.xlu1 %2198, %v842_v20  }
 0xd6a   :  { %2200 = vset.pattern.permute.xlu1 %v2352_v4  ;;  %2201 = vset.pattern.permute.xlu2 %v2350_v0 }
 0xdb3   :  { %v856_v23 = vpop.permute.xlu2 %855 }
 0xdb4   :  { %v858_v29 = vmul.f32 %v856_v23, %v2416_v34 }
 0xdbc   :  { %v866_v30 = vpop.permute.xlu2 %865 }
 0xdbd   :  { %v868_v50 = vmul.f32 %v866_v30, %v2422_v42 }
 0xdcb   :  { %v851_v21 = vpop.permute.xlu1 %850 }
 0xdcc   :  { %v846_v24 = vpop.permute.xlu0 %845  ;;  %v853_v27 = vmul.f32 %v851_v21, %v2410_v31 }
 0xdcd   :  { %v848_v22 = vmul.f32 %v846_v24, %v2414_v33 }
 0xdcf   :  { %v869_v35 = vadd.f32 %v853_v27, %v848_v22 }
 0xdd4   :  { %v861_v26 = vpop.permute.xlu1 %860 }
 0xdd5   :  { %v863_v38 = vmul.f32 %v861_v26, %v2412_v32 }
 0xdd7   :  { %v870_v36 = vadd.f32 %v863_v38, %v858_v29 }
 0xdd9   :  { %v871_v37 = vadd.f32 %v870_v36, %v869_v35 }
 0xddb   :  { %v872_v39 = vadd.f32 %v871_v37, %v868_v50 }
 0xddd   :  { %v873_v40 = vperm.slane %v872_v39, 0  ;;  %v875_v41 = vperm.slane %v872_v39, 1  ;;  %v877_v43 = vperm.slane %v872_v39, 2 }
 0xddf   :  { %v874_v44 = vmul.f32 %v873_v40, %v2387_v8  ;;  %v876_v45 = vmul.f32 %v875_v41, %v2397_v16  ;;  %v878_v47 = vmul.f32 %v877_v43, %v2395_v15 }
 0xde1   :  { %v879_v48 = vadd.f32 %v874_v44, %v2425_v49  ;;  %v880_v52 = vadd.f32 %v878_v47, %v876_v45 }
 0xde3   :  { %v2734_v46 = vadd.f32 %v880_v52, %v879_v48 }
 0xde5   :  { %v882_v51 = vmul.f32 0.0625, %v2734_v46 }
 0xde7   :  { %v883_v53 = vadd.f32 %v882_v51, %v2709_v60 }
 0xde9   :  { %891 = vperm.xlu1 %2200, %v883_v53   ;;  %886 = vperm.xlu0 %2195, %v883_v53  }
 0xdf1   :  { %2203 = vset.pattern.permute.xlu1 %v2351_v1  ;;  %2202 = vset.pattern.permute.xlu0 %v2352_v4 }
 0xe5b   :  { %v892_v58 = vpop.permute.xlu1 %891  ;;  %v887_v54 = vpop.permute.xlu0 %886 }
 0xe5c   :  { %v894_v55 = vmul.f32 %v892_v58, %v2391_v10  ;;  %v889_v56 = vmul.f32 %v887_v54, %v2389_v9 }
 0xe5e   :  { %v895_v57 = vadd.f32 %v894_v55, %v889_v56 }
 0xe60   :  { %v896_v59 = vperm.slane %v895_v57, 0  ;;  %v898_v62 = vperm.slane %v895_v57, 1  ;;  %v900_v2 = vperm.slane %v895_v57, 2 }
 0xe62   :  { %v897_v61 = vmul.f32 %v896_v59, %v2387_v8  ;;  %v899_v63 = vmul.f32 %v898_v62, %v2397_v16  ;;  %v901_v12 = vmul.f32 %v900_v2, %v2395_v15 }
 0xe64   :  { %v902_v3 = vadd.f32 %v897_v61, %v2399_v17  ;;  %v903_v6 = vadd.f32 %v901_v12, %v899_v63 }
 0xe66   :  { %v904_v7 = vadd.f32 %v903_v6, %v902_v3 }
 0xe68   :  { %v905_v25 = vmax.f32 %v904_v7, 0.0 }
 0xe6a   :  { %918 = vperm.xlu1 %2203, %v905_v25   ;;  %913 = vperm.xlu0 %2202, %v905_v25  }
 0xe6b   :  { %908 = vperm.xlu2 %2201, %v905_v25  }
 0xe72   :  { %2205 = vset.pattern.permute.xlu1 %v2354_v28 }
 0xe73   :  { %2204 = vset.pattern.permute.xlu2 %v2353_v5  ;;  %928 = vperm.xlu1 %2205, %v905_v25  }
 0xe74   :  { %923 = vperm.xlu2 %2204, %v905_v25  }
 0xe7b   :  { %2207 = vset.pattern.permute.xlu1 %v2350_v0 }
 0xe7c   :  { %2206 = vset.pattern.permute.xlu2 %v2350_v0 }
 0xec5   :  { %v909_v11 = vpop.permute.xlu2 %908 }
 0xec6   :  { %v911_v21 = vmul.f32 %v909_v11, %v2414_v33 }
 0xece   :  { %v924_v18 = vpop.permute.xlu2 %923 }
 0xecf   :  { %v926_v23 = vmul.f32 %v924_v18, %v2412_v32 }
 0xedc   :  { %v919_v13 = vpop.permute.xlu1 %918  ;;  %v914_v14 = vpop.permute.xlu0 %913 }
 0xedd   :  { %v921_v19 = vmul.f32 %v919_v13, %v2416_v34  ;;  %v916_v20 = vmul.f32 %v914_v14, %v2410_v31 }
 0xedf   :  { %v933_v24 = vadd.f32 %v926_v23, %v921_v19  ;;  %v932_v27 = vadd.f32 %v916_v20, %v911_v21 }
 0xee1   :  { %v934_v29 = vadd.f32 %v933_v24, %v932_v27 }
 0xee5   :  { %v929_v22 = vpop.permute.xlu1 %928 }
 0xee6   :  { %v931_v26 = vmul.f32 %v929_v22, %v2422_v42 }
 0xee8   :  { %v935_v38 = vadd.f32 %v934_v29, %v931_v26 }
 0xeea   :  { %v936_v30 = vperm.slane %v935_v38, 0  ;;  %v938_v35 = vperm.slane %v935_v38, 1  ;;  %v940_v36 = vperm.slane %v935_v38, 2 }
 0xeec   :  { %v937_v50 = vmul.f32 %v936_v30, %v2387_v8  ;;  %v939_v37 = vmul.f32 %v938_v35, %v2397_v16  ;;  %v941_v39 = vmul.f32 %v940_v36, %v2395_v15 }
 0xeee   :  { %v942_v40 = vadd.f32 %v937_v50, %v2425_v49  ;;  %v943_v41 = vadd.f32 %v941_v39, %v939_v37 }
 0xef0   :  { %v2759_v43 = vadd.f32 %v943_v41, %v942_v40 }
 0xef2   :  { %v945_v44 = vmul.f32 0.0625, %v2759_v43 }
 0xef4   :  { %v946_v45 = vadd.f32 %v945_v44, %v2709_v60 }
 0xef6   :  { %954 = vperm.xlu0 %2202, %v946_v45   ;;  %949 = vperm.xlu2 %2206, %v946_v45  }
 0xefe   :  { %2209 = vset.pattern.permute.xlu0 %v2351_v1  ;;  %2208 = vset.pattern.permute.xlu2 %v2352_v4 }
 0xf50   :  { %v950_v47 = vpop.permute.xlu2 %949 }
 0xf51   :  { %v952_v52 = vmul.f32 %v950_v47, %v2389_v9 }
 0xf68   :  { %v955_v48 = vpop.permute.xlu0 %954 }
 0xf69   :  { %v957_v51 = vmul.f32 %v955_v48, %v2391_v10 }
 0xf6b   :  { %v958_v53 = vadd.f32 %v957_v51, %v952_v52 }
 0xf6d   :  { %v959_v58 = vperm.slane %v958_v53, 0  ;;  %v961_v54 = vperm.slane %v958_v53, 1  ;;  %v963_v55 = vperm.slane %v958_v53, 2 }
 0xf6f   :  { %v960_v56 = vmul.f32 %v959_v58, %v2387_v8  ;;  %v962_v57 = vmul.f32 %v961_v54, %v2397_v16  ;;  %v964_v59 = vmul.f32 %v963_v55, %v2395_v15 }
 0xf71   :  { %v965_v62 = vadd.f32 %v960_v56, %v2399_v17  ;;  %v966_v2 = vadd.f32 %v964_v59, %v962_v57 }
 0xf73   :  { %v967_v61 = vadd.f32 %v966_v2, %v965_v62 }
 0xf75   :  { %v968_v63 = vmax.f32 %v967_v61, 0.0 }
 0xf77   :  { %981 = vperm.xlu0 %2209, %v968_v63   ;;  %976 = vperm.xlu2 %2208, %v968_v63  }
 0xf78   :  { %971 = vperm.xlu1 %2207, %v968_v63  }
 0xf7f   :  { %2211 = vset.pattern.permute.xlu2 %v2354_v28  ;;  %2214 = vset.pattern.permute.xlu0 %v2350_v0 }
 0xf80   :  { %2210 = vset.pattern.permute.xlu1 %v2353_v5  ;;  %991 = vperm.xlu2 %2211, %v968_v63  }
 0xf81   :  { %986 = vperm.xlu1 %2210, %v968_v63  }
 0xf88   :  { %2213 = vset.pattern.permute.xlu2 %v2352_v4 }
 0xf89   :  { %2212 = vset.pattern.permute.xlu1 %v2350_v0 }
 0xfd1   :  { %v977_v3 = vpop.permute.xlu2 %976 }
 0xfd2   :  { %v979_v11 = vmul.f32 %v977_v3, %v2410_v31 }
 0xfda   :  { %v992_v18 = vpop.permute.xlu2 %991 }
 0xfdb   :  { %v994_v21 = vmul.f32 %v992_v18, %v2422_v42 }
 0xfe9   :  { %v982_v6 = vpop.permute.xlu0 %981 }
 0xfea   :  { %v972_v12 = vpop.permute.xlu1 %971  ;;  %v984_v13 = vmul.f32 %v982_v6, %v2416_v34 }
 0xfeb   :  { %v974_v7 = vmul.f32 %v972_v12, %v2414_v33 }
 0xfed   :  { %v995_v19 = vadd.f32 %v979_v11, %v974_v7 }
 0xff3   :  { %v987_v25 = vpop.permute.xlu1 %986 }
 0xff4   :  { %v989_v14 = vmul.f32 %v987_v25, %v2412_v32 }
 0xff6   :  { %v996_v20 = vadd.f32 %v989_v14, %v984_v13 }
 0xff8   :  { %v997_v23 = vadd.f32 %v996_v20, %v995_v19 }
 0xffa   :  { %v998_v24 = vadd.f32 %v997_v23, %v994_v21 }
 0xffc   :  { %v999_v27 = vperm.slane %v998_v24, 0  ;;  %v1001_v22 = vperm.slane %v998_v24, 1  ;;  %v1003_v26 = vperm.slane %v998_v24, 2 }
 0xffe   :  { %v1000_v29 = vmul.f32 %v999_v27, %v2387_v8  ;;  %v1002_v38 = vmul.f32 %v1001_v22, %v2397_v16  ;;  %v1004_v30 = vmul.f32 %v1003_v26, %v2395_v15 }
0x1000   :  { %v1005_v35 = vadd.f32 %v1000_v29, %v2425_v49  ;;  %v1006_v36 = vadd.f32 %v1004_v30, %v1002_v38 }
0x1002   :  { %v1007_v50 = vadd.f32 %v1006_v36, %v1005_v35 }
0x1004   :  { %v1008_v37 = vmul.f32 0.125, %v1007_v50  ;;  %v1072_v26 = vadd.f32 %v1007_v50, %v2759_v43 }
0x1006   :  { %v1009_v39 = vadd.f32 %v1008_v37, %v2709_v60  ;;  %v1073_v35 = vmul.f32 2.0, %v1072_v26 }
0x1008   :  { %1017 = vperm.xlu2 %2213, %v1009_v39   ;;  %1012 = vperm.xlu1 %2212, %v1009_v39  }
0x1010   :  { %2216 = vset.pattern.permute.xlu2 %v2351_v1  ;;  %2215 = vset.pattern.permute.xlu1 %v2352_v4 }
0x1062   :  { %v1018_v40 = vpop.permute.xlu2 %1017 }
0x1063   :  { %v1020_v44 = vmul.f32 %v1018_v40, %v2391_v10 }
0x107a   :  { %v1013_v41 = vpop.permute.xlu1 %1012 }
0x107b   :  { %v1015_v45 = vmul.f32 %v1013_v41, %v2389_v9 }
0x107d   :  { %v1021_v47 = vadd.f32 %v1020_v44, %v1015_v45 }
0x107f   :  { %v1022_v48 = vperm.slane %v1021_v47, 0  ;;  %v1024_v52 = vperm.slane %v1021_v47, 1  ;;  %v1026_v51 = vperm.slane %v1021_v47, 2 }
0x1081   :  { %v1023_v53 = vmul.f32 %v1022_v48, %v2387_v8  ;;  %v1025_v58 = vmul.f32 %v1024_v52, %v2397_v16  ;;  %v1027_v54 = vmul.f32 %v1026_v51, %v2395_v15 }
0x1083   :  { %v1028_v55 = vadd.f32 %v1023_v53, %v2399_v17  ;;  %v1029_v56 = vadd.f32 %v1027_v54, %v1025_v58 }
0x1085   :  { %v1030_v57 = vadd.f32 %v1029_v56, %v1028_v55 }
0x1087   :  { %v1031_v59 = vmax.f32 %v1030_v57, 0.0 }
0x1089   :  { %1044 = vperm.xlu2 %2216, %v1031_v59   ;;  %1039 = vperm.xlu1 %2215, %v1031_v59  }
0x108a   :  { %1034 = vperm.xlu0 %2214, %v1031_v59  }
0x1091   :  { %2218 = vset.pattern.permute.xlu2 %v2354_v28  ;;  %2217 = vset.pattern.permute.xlu1 %v2353_v5 }
0x1092   :  { %1054 = vperm.xlu2 %2218, %v1031_v59   ;;  %1049 = vperm.xlu1 %2217, %v1031_v59  }
0x109a   :  { %2219 = vset.pattern.permute.xlu1 %v2352_v4  ;;  %2220 = vset.pattern.permute.xlu2 %v2350_v0 }
0x10e3   :  { %v1045_v2 = vpop.permute.xlu2 %1044 }
0x10e4   :  { %v1047_v6 = vmul.f32 %v1045_v2, %v2416_v34 }
0x10ec   :  { %v1055_v25 = vpop.permute.xlu2 %1054 }
0x10ed   :  { %v1057_v14 = vmul.f32 %v1055_v25, %v2422_v42 }
0x10fb   :  { %v1040_v62 = vpop.permute.xlu1 %1039 }
0x10fc   :  { %v1035_v61 = vpop.permute.xlu0 %1034  ;;  %v1042_v63 = vmul.f32 %v1040_v62, %v2410_v31 }
0x10fd   :  { %v1037_v12 = vmul.f32 %v1035_v61, %v2414_v33 }
0x10ff   :  { %v1058_v11 = vadd.f32 %v1042_v63, %v1037_v12 }
0x1104   :  { %v1050_v3 = vpop.permute.xlu1 %1049 }
0x1105   :  { %v1052_v7 = vmul.f32 %v1050_v3, %v2412_v32 }
0x1107   :  { %v1059_v13 = vadd.f32 %v1052_v7, %v1047_v6 }
0x1109   :  { %v1060_v18 = vadd.f32 %v1059_v13, %v1058_v11 }
0x110b   :  { %v1061_v19 = vadd.f32 %v1060_v18, %v1057_v14 }
0x110d   :  { %v1062_v20 = vperm.slane %v1061_v19, 0  ;;  %v1064_v21 = vperm.slane %v1061_v19, 1  ;;  %v1066_v23 = vperm.slane %v1061_v19, 2 }
0x110f   :  { %v1063_v24 = vmul.f32 %v1062_v20, %v2387_v8  ;;  %v1065_v27 = vmul.f32 %v1064_v21, %v2397_v16  ;;  %v1067_v22 = vmul.f32 %v1066_v23, %v2395_v15 }
0x1111   :  { %v1068_v29 = vadd.f32 %v1063_v24, %v2425_v49  ;;  %v1069_v38 = vadd.f32 %v1067_v22, %v1065_v27 }
0x1113   :  { %v1070_v30 = vadd.f32 %v1069_v38, %v1068_v29 }
0x1115   :  { %v1071_v36 = vadd.f32 %v1070_v30, %v2734_v46 }
0x1117   :  { %v1074_v37 = vadd.f32 %v1073_v35, %v1071_v36 }
0x1119   :  { %v1075_v39 = vmul.f32 0.020833334, %v1074_v37 }
0x111b   :  { %v2810_v40 = vadd.f32 %v1075_v39, %v2709_v60 }
0x111d   :  { %1084 = vperm.xlu1 %2219, %v2810_v40   ;;  %1079 = vperm.xlu0 %2214, %v2810_v40  }
0x1125   :  { %2222 = vset.pattern.permute.xlu1 %v2351_v1  ;;  %2221 = vset.pattern.permute.xlu0 %v2352_v4 }
0x118f   :  { %v1085_v43 = vpop.permute.xlu1 %1084  ;;  %v1080_v50 = vpop.permute.xlu0 %1079 }
0x1190   :  { %v1087_v41 = vmul.f32 %v1085_v43, %v2391_v10  ;;  %v1082_v44 = vmul.f32 %v1080_v50, %v2389_v9 }
0x1192   :  { %v1088_v46 = vadd.f32 %v1087_v41, %v1082_v44 }
0x1194   :  { %v1089_v45 = vperm.slane %v1088_v46, 0  ;;  %v1091_v47 = vperm.slane %v1088_v46, 1  ;;  %v1093_v48 = vperm.slane %v1088_v46, 2 }
0x1196   :  { %v1090_v60 = vmul.f32 %v1089_v45, %v2387_v8  ;;  %v1092_v52 = vmul.f32 %v1091_v47, %v2397_v16  ;;  %v1094_v51 = vmul.f32 %v1093_v48, %v2395_v15 }
0x1198   :  { %v1095_v53 = vadd.f32 %v1090_v60, %v2399_v17  ;;  %v1096_v58 = vadd.f32 %v1094_v51, %v1092_v52 }
0x119a   :  { %v1097_v54 = vadd.f32 %v1096_v58, %v1095_v53 }
0x119c   :  { %v1098_v55 = vmax.f32 %v1097_v54, 0.0 }
0x119e   :  { %1111 = vperm.xlu1 %2222, %v1098_v55   ;;  %1106 = vperm.xlu0 %2221, %v1098_v55  }
0x119f   :  { %1101 = vperm.xlu2 %2220, %v1098_v55  }
0x11a6   :  { %2224 = vset.pattern.permute.xlu1 %v2354_v28 }
0x11a7   :  { %2223 = vset.pattern.permute.xlu2 %v2353_v5  ;;  %1121 = vperm.xlu1 %2224, %v1098_v55  }
0x11a8   :  { %1116 = vperm.xlu2 %2223, %v1098_v55  }
0x11af   :  { %2226 = vset.pattern.permute.xlu1 %v2350_v0 }
0x11b0   :  { %2225 = vset.pattern.permute.xlu2 %v2350_v0 }
0x11f9   :  { %v1102_v56 = vpop.permute.xlu2 %1101 }
0x11fa   :  { %v1104_v63 = vmul.f32 %v1102_v56, %v2414_v33 }
0x1202   :  { %v1117_v62 = vpop.permute.xlu2 %1116 }
0x1203   :  { %v1119_v12 = vmul.f32 %v1117_v62, %v2412_v32 }
0x1210   :  { %v1112_v57 = vpop.permute.xlu1 %1111  ;;  %v1107_v59 = vpop.permute.xlu0 %1106 }
0x1211   :  { %v1114_v2 = vmul.f32 %v1112_v57, %v2416_v34  ;;  %v1109_v61 = vmul.f32 %v1107_v59, %v2410_v31 }
0x1213   :  { %v1126_v3 = vadd.f32 %v1119_v12, %v1114_v2  ;;  %v1125_v6 = vadd.f32 %v1109_v61, %v1104_v63 }
0x1215   :  { %v1127_v11 = vadd.f32 %v1126_v3, %v1125_v6 }
0x1219   :  { %v1122_v7 = vpop.permute.xlu1 %1121 }
0x121a   :  { %v1124_v25 = vmul.f32 %v1122_v7, %v2422_v42 }
0x121c   :  { %v1128_v13 = vadd.f32 %v1127_v11, %v1124_v25 }
0x121e   :  { %v1129_v14 = vperm.slane %v1128_v13, 0  ;;  %v1131_v18 = vperm.slane %v1128_v13, 1  ;;  %v1133_v19 = vperm.slane %v1128_v13, 2 }
0x1220   :  { %v1130_v20 = vmul.f32 %v1129_v14, %v2387_v8  ;;  %v1132_v21 = vmul.f32 %v1131_v18, %v2397_v16  ;;  %v1134_v23 = vmul.f32 %v1133_v19, %v2395_v15 }
0x1222   :  { %v1135_v24 = vadd.f32 %v1130_v20, %v2425_v49  ;;  %v1136_v27 = vadd.f32 %v1134_v23, %v1132_v21 }
0x1224   :  { %v2835_v22 = vadd.f32 %v1136_v27, %v1135_v24 }
0x1226   :  { %v1138_v26 = vmul.f32 0.0625, %v2835_v22 }
0x1228   :  { %v1139_v29 = vadd.f32 %v1138_v26, %v2810_v40 }
0x122a   :  { %1147 = vperm.xlu0 %2221, %v1139_v29   ;;  %1142 = vperm.xlu2 %2225, %v1139_v29  }
0x1232   :  { %2228 = vset.pattern.permute.xlu0 %v2351_v1  ;;  %2227 = vset.pattern.permute.xlu2 %v2352_v4 }
0x1284   :  { %v1143_v38 = vpop.permute.xlu2 %1142 }
0x1285   :  { %v1145_v35 = vmul.f32 %v1143_v38, %v2389_v9 }
0x129c   :  { %v1148_v30 = vpop.permute.xlu0 %1147 }
0x129d   :  { %v1150_v36 = vmul.f32 %v1148_v30, %v2391_v10 }
0x129f   :  { %v1151_v37 = vadd.f32 %v1150_v36, %v1145_v35 }
0x12a1   :  { %v1152_v39 = vperm.slane %v1151_v37, 0  ;;  %v1154_v43 = vperm.slane %v1151_v37, 1  ;;  %v1156_v50 = vperm.slane %v1151_v37, 2 }
0x12a3   :  { %v1153_v41 = vmul.f32 %v1152_v39, %v2387_v8  ;;  %v1155_v44 = vmul.f32 %v1154_v43, %v2397_v16  ;;  %v1157_v46 = vmul.f32 %v1156_v50, %v2395_v15 }
0x12a5   :  { %v1158_v45 = vadd.f32 %v1153_v41, %v2399_v17  ;;  %v1159_v47 = vadd.f32 %v1157_v46, %v1155_v44 }
0x12a7   :  { %v1160_v48 = vadd.f32 %v1159_v47, %v1158_v45 }
0x12a9   :  { %v1161_v60 = vmax.f32 %v1160_v48, 0.0 }
0x12ab   :  { %1174 = vperm.xlu0 %2228, %v1161_v60   ;;  %1169 = vperm.xlu2 %2227, %v1161_v60  }
0x12ac   :  { %1164 = vperm.xlu1 %2226, %v1161_v60  }
0x12b3   :  { %2230 = vset.pattern.permute.xlu2 %v2354_v28  ;;  %2233 = vset.pattern.permute.xlu0 %v2350_v0 }
0x12b4   :  { %2229 = vset.pattern.permute.xlu1 %v2353_v5  ;;  %1184 = vperm.xlu2 %2230, %v1161_v60  }
0x12b5   :  { %1179 = vperm.xlu1 %2229, %v1161_v60  }
0x12bc   :  { %2232 = vset.pattern.permute.xlu2 %v2352_v4 }
0x12bd   :  { %2231 = vset.pattern.permute.xlu1 %v2350_v0 }
0x1305   :  { %v1170_v51 = vpop.permute.xlu2 %1169 }
0x1306   :  { %v1172_v55 = vmul.f32 %v1170_v51, %v2410_v31 }
0x130e   :  { %v1185_v59 = vpop.permute.xlu2 %1184 }
0x130f   :  { %v1187_v61 = vmul.f32 %v1185_v59, %v2422_v42 }
0x131d   :  { %v1175_v53 = vpop.permute.xlu0 %1174 }
0x131e   :  { %v1165_v52 = vpop.permute.xlu1 %1164  ;;  %v1177_v56 = vmul.f32 %v1175_v53, %v2416_v34 }
0x131f   :  { %v1167_v58 = vmul.f32 %v1165_v52, %v2414_v33 }
0x1321   :  { %v1188_v62 = vadd.f32 %v1172_v55, %v1167_v58 }
0x1327   :  { %v1180_v54 = vpop.permute.xlu1 %1179 }
0x1328   :  { %v1182_v57 = vmul.f32 %v1180_v54, %v2412_v32 }
0x132a   :  { %v1189_v2 = vadd.f32 %v1182_v57, %v1177_v56 }
0x132c   :  { %v1190_v63 = vadd.f32 %v1189_v2, %v1188_v62 }
0x132e   :  { %v1191_v12 = vadd.f32 %v1190_v63, %v1187_v61 }
0x1330   :  { %v1192_v3 = vperm.slane %v1191_v12, 0  ;;  %v1194_v6 = vperm.slane %v1191_v12, 1  ;;  %v1196_v7 = vperm.slane %v1191_v12, 2 }
0x1332   :  { %v1193_v25 = vmul.f32 %v1192_v3, %v2387_v8  ;;  %v1195_v11 = vmul.f32 %v1194_v6, %v2397_v16  ;;  %v1197_v13 = vmul.f32 %v1196_v7, %v2395_v15 }
0x1334   :  { %v1198_v14 = vadd.f32 %v1193_v25, %v2425_v49  ;;  %v1199_v18 = vadd.f32 %v1197_v13, %v1195_v11 }
0x1336   :  { %v2861_v19 = vadd.f32 %v1199_v18, %v1198_v14 }
0x1338   :  { %v1201_v20 = vmul.f32 0.0625, %v2861_v19 }
0x133a   :  { %v1202_v21 = vadd.f32 %v1201_v20, %v2810_v40 }
0x133c   :  { %1210 = vperm.xlu2 %2232, %v1202_v21   ;;  %1205 = vperm.xlu1 %2231, %v1202_v21  }
0x1344   :  { %2235 = vset.pattern.permute.xlu2 %v2351_v1  ;;  %2234 = vset.pattern.permute.xlu1 %v2352_v4 }
0x1396   :  { %v1211_v23 = vpop.permute.xlu2 %1210 }
0x1397   :  { %v1213_v27 = vmul.f32 %v1211_v23, %v2391_v10 }
0x13ae   :  { %v1206_v24 = vpop.permute.xlu1 %1205 }
0x13af   :  { %v1208_v26 = vmul.f32 %v1206_v24, %v2389_v9 }
0x13b1   :  { %v1214_v29 = vadd.f32 %v1213_v27, %v1208_v26 }
0x13b3   :  { %v1215_v38 = vperm.slane %v1214_v29, 0  ;;  %v1217_v30 = vperm.slane %v1214_v29, 1  ;;  %v1219_v35 = vperm.slane %v1214_v29, 2 }
0x13b5   :  { %v1216_v36 = vmul.f32 %v1215_v38, %v2387_v8  ;;  %v1218_v37 = vmul.f32 %v1217_v30, %v2397_v16  ;;  %v1220_v39 = vmul.f32 %v1219_v35, %v2395_v15 }
0x13b7   :  { %v1221_v43 = vadd.f32 %v1216_v36, %v2399_v17  ;;  %v1222_v50 = vadd.f32 %v1220_v39, %v1218_v37 }
0x13b9   :  { %v1223_v41 = vadd.f32 %v1222_v50, %v1221_v43 }
0x13bb   :  { %v1224_v44 = vmax.f32 %v1223_v41, 0.0 }
0x13bd   :  { %1237 = vperm.xlu2 %2235, %v1224_v44   ;;  %1232 = vperm.xlu1 %2234, %v1224_v44  }
0x13be   :  { %1227 = vperm.xlu0 %2233, %v1224_v44  }
0x13c5   :  { %2237 = vset.pattern.permute.xlu2 %v2354_v28  ;;  %2236 = vset.pattern.permute.xlu1 %v2353_v5 }
0x13c6   :  { %1247 = vperm.xlu2 %2237, %v1224_v44   ;;  %1242 = vperm.xlu1 %2236, %v1224_v44  }
0x13ce   :  { %2238 = vset.pattern.permute.xlu1 %v2352_v4  ;;  %2239 = vset.pattern.permute.xlu2 %v2350_v0 }
0x1417   :  { %v1238_v45 = vpop.permute.xlu2 %1237 }
0x1418   :  { %v1240_v51 = vmul.f32 %v1238_v45, %v2416_v34 }
0x1420   :  { %v1248_v58 = vpop.permute.xlu2 %1247 }
0x1421   :  { %v1250_v56 = vmul.f32 %v1248_v58, %v2422_v42 }
0x142f   :  { %v1233_v46 = vpop.permute.xlu1 %1232 }
0x1430   :  { %v1228_v47 = vpop.permute.xlu0 %1227  ;;  %v1235_v48 = vmul.f32 %v1233_v46, %v2410_v31 }
0x1431   :  { %v1230_v60 = vmul.f32 %v1228_v47, %v2414_v33 }
0x1433   :  { %v1251_v54 = vadd.f32 %v1235_v48, %v1230_v60 }
0x1438   :  { %v1243_v52 = vpop.permute.xlu1 %1242 }
0x1439   :  { %v1245_v53 = vmul.f32 %v1243_v52, %v2412_v32 }
0x143b   :  { %v1252_v55 = vadd.f32 %v1245_v53, %v1240_v51 }
0x143d   :  { %v1253_v57 = vadd.f32 %v1252_v55, %v1251_v54 }
0x143f   :  { %v1254_v59 = vadd.f32 %v1253_v57, %v1250_v56 }
0x1441   :  { %v1255_v62 = vperm.slane %v1254_v59, 0  ;;  %v1257_v2 = vperm.slane %v1254_v59, 1  ;;  %v1259_v61 = vperm.slane %v1254_v59, 2 }
0x1443   :  { %v1256_v63 = vmul.f32 %v1255_v62, %v2387_v8  ;;  %v1258_v12 = vmul.f32 %v1257_v2, %v2397_v16  ;;  %v1260_v3 = vmul.f32 %v1259_v61, %v2395_v15 }
0x1445   :  { %v1261_v6 = vadd.f32 %v1256_v63, %v2425_v49  ;;  %v1262_v7 = vadd.f32 %v1260_v3, %v1258_v12 }
0x1447   :  { %v1263_v25 = vadd.f32 %v1262_v7, %v1261_v6 }
0x1449   :  { %v1264_v11 = vmul.f32 0.125, %v1263_v25  ;;  %v1328_v61 = vadd.f32 %v1263_v25, %v2861_v19 }
0x144b   :  { %v1265_v13 = vadd.f32 %v1264_v11, %v2810_v40  ;;  %v1329_v6 = vmul.f32 2.0, %v1328_v61 }
0x144d   :  { %1273 = vperm.xlu1 %2238, %v1265_v13   ;;  %1268 = vperm.xlu0 %2233, %v1265_v13  }
0x1455   :  { %2241 = vset.pattern.permute.xlu1 %v2351_v1  ;;  %2240 = vset.pattern.permute.xlu0 %v2352_v4 }
0x14bf   :  { %v1274_v14 = vpop.permute.xlu1 %1273  ;;  %v1269_v18 = vpop.permute.xlu0 %1268 }
0x14c0   :  { %v1276_v20 = vmul.f32 %v1274_v14, %v2391_v10  ;;  %v1271_v21 = vmul.f32 %v1269_v18, %v2389_v9 }
0x14c2   :  { %v1277_v23 = vadd.f32 %v1276_v20, %v1271_v21 }
0x14c4   :  { %v1278_v24 = vperm.slane %v1277_v23, 0  ;;  %v1280_v27 = vperm.slane %v1277_v23, 1  ;;  %v1282_v26 = vperm.slane %v1277_v23, 2 }
0x14c6   :  { %v1279_v29 = vmul.f32 %v1278_v24, %v2387_v8  ;;  %v1281_v38 = vmul.f32 %v1280_v27, %v2397_v16  ;;  %v1283_v30 = vmul.f32 %v1282_v26, %v2395_v15 }
0x14c8   :  { %v1284_v35 = vadd.f32 %v1279_v29, %v2399_v17  ;;  %v1285_v36 = vadd.f32 %v1283_v30, %v1281_v38 }
0x14ca   :  { %v1286_v37 = vadd.f32 %v1285_v36, %v1284_v35 }
0x14cc   :  { %v1287_v39 = vmax.f32 %v1286_v37, 0.0 }
0x14ce   :  { %1300 = vperm.xlu1 %2241, %v1287_v39   ;;  %1295 = vperm.xlu0 %2240, %v1287_v39  }
0x14cf   :  { %1290 = vperm.xlu2 %2239, %v1287_v39  }
0x14d6   :  { %2243 = vset.pattern.permute.xlu1 %v2354_v28 }
0x14d7   :  { %2242 = vset.pattern.permute.xlu2 %v2353_v5  ;;  %1310 = vperm.xlu1 %2243, %v1287_v39  }
0x14d8   :  { %1305 = vperm.xlu2 %2242, %v1287_v39  }
0x14df   :  { %2245 = vset.pattern.permute.xlu1 %v2350_v0 }
0x14e0   :  { %2244 = vset.pattern.permute.xlu2 %v2350_v0 }
0x1529   :  { %v1291_v43 = vpop.permute.xlu2 %1290 }
0x152a   :  { %v1293_v47 = vmul.f32 %v1291_v43, %v2414_v33 }
0x1532   :  { %v1306_v44 = vpop.permute.xlu2 %1305 }
0x1533   :  { %v1308_v48 = vmul.f32 %v1306_v44, %v2412_v32 }
0x1540   :  { %v1301_v50 = vpop.permute.xlu1 %1300  ;;  %v1296_v41 = vpop.permute.xlu0 %1295 }
0x1541   :  { %v1303_v46 = vmul.f32 %v1301_v50, %v2416_v34  ;;  %v1298_v45 = vmul.f32 %v1296_v41, %v2410_v31 }
0x1543   :  { %v1315_v60 = vadd.f32 %v1308_v48, %v1303_v46  ;;  %v1314_v52 = vadd.f32 %v1298_v45, %v1293_v47 }
0x1545   :  { %v1316_v58 = vadd.f32 %v1315_v60, %v1314_v52 }
0x1549   :  { %v1311_v51 = vpop.permute.xlu1 %1310 }
0x154a   :  { %v1313_v53 = vmul.f32 %v1311_v51, %v2422_v42 }
0x154c   :  { %v1317_v54 = vadd.f32 %v1316_v58, %v1313_v53 }
0x154e   :  { %v1318_v55 = vperm.slane %v1317_v54, 0  ;;  %v1320_v56 = vperm.slane %v1317_v54, 1  ;;  %v1322_v57 = vperm.slane %v1317_v54, 2 }
0x1550   :  { %v1319_v59 = vmul.f32 %v1318_v55, %v2387_v8  ;;  %v1321_v62 = vmul.f32 %v1320_v56, %v2397_v16  ;;  %v1323_v2 = vmul.f32 %v1322_v57, %v2395_v15 }
0x1552   :  { %v1324_v63 = vadd.f32 %v1319_v59, %v2425_v49  ;;  %v1325_v12 = vadd.f32 %v1323_v2, %v1321_v62 }
0x1554   :  { %v1326_v3 = vadd.f32 %v1325_v12, %v1324_v63 }
0x1556   :  { %v1327_v7 = vadd.f32 %v1326_v3, %v2835_v22 }
0x1558   :  { %v1330_v11 = vadd.f32 %v1329_v6, %v1327_v7 }
0x155a   :  { %v1331_v13 = vmul.f32 0.020833334, %v1330_v11 }
0x155c   :  { %v2911_v14 = vadd.f32 %v1331_v13, %v2810_v40 }
0x155e   :  { %1340 = vperm.xlu0 %2240, %v2911_v14   ;;  %1335 = vperm.xlu2 %2244, %v2911_v14  }
0x1566   :  { %2247 = vset.pattern.permute.xlu0 %v2351_v1  ;;  %2246 = vset.pattern.permute.xlu2 %v2352_v4 }
0x15b8   :  { %v1336_v19 = vpop.permute.xlu2 %1335 }
0x15b9   :  { %v1338_v18 = vmul.f32 %v1336_v19, %v2389_v9 }
0x15d0   :  { %v1341_v25 = vpop.permute.xlu0 %1340 }
0x15d1   :  { %v1343_v20 = vmul.f32 %v1341_v25, %v2391_v10 }
0x15d3   :  { %v1344_v22 = vadd.f32 %v1343_v20, %v1338_v18 }
0x15d5   :  { %v1345_v21 = vperm.slane %v1344_v22, 0  ;;  %v1347_v23 = vperm.slane %v1344_v22, 1  ;;  %v1349_v24 = vperm.slane %v1344_v22, 2 }
0x15d7   :  { %v1346_v40 = vmul.f32 %v1345_v21, %v2387_v8  ;;  %v1348_v27 = vmul.f32 %v1347_v23, %v2397_v16  ;;  %v1350_v26 = vmul.f32 %v1349_v24, %v2395_v15 }
0x15d9   :  { %v1351_v29 = vadd.f32 %v1346_v40, %v2399_v17  ;;  %v1352_v38 = vadd.f32 %v1350_v26, %v1348_v27 }
0x15db   :  { %v1353_v30 = vadd.f32 %v1352_v38, %v1351_v29 }
0x15dd   :  { %v1354_v35 = vmax.f32 %v1353_v30, 0.0 }
0x15df   :  { %1367 = vperm.xlu0 %2247, %v1354_v35   ;;  %1362 = vperm.xlu2 %2246, %v1354_v35  }
0x15e0   :  { %1357 = vperm.xlu1 %2245, %v1354_v35  }
0x15e7   :  { %2249 = vset.pattern.permute.xlu2 %v2354_v28  ;;  %2252 = vset.pattern.permute.xlu0 %v2350_v0 }
0x15e8   :  { %2248 = vset.pattern.permute.xlu1 %v2353_v5  ;;  %1377 = vperm.xlu2 %2249, %v1354_v35  }
0x15e9   :  { %1372 = vperm.xlu1 %2248, %v1354_v35  }
0x15f0   :  { %2251 = vset.pattern.permute.xlu2 %v2352_v4 }
0x15f1   :  { %2250 = vset.pattern.permute.xlu1 %v2350_v0 }
0x1639   :  { %v1363_v37 = vpop.permute.xlu2 %1362 }
0x163a   :  { %v1365_v41 = vmul.f32 %v1363_v37, %v2410_v31 }
0x1642   :  { %v1378_v45 = vpop.permute.xlu2 %1377 }
0x1643   :  { %v1380_v60 = vmul.f32 %v1378_v45, %v2422_v42 }
0x1651   :  { %v1368_v39 = vpop.permute.xlu0 %1367 }
0x1652   :  { %v1358_v36 = vpop.permute.xlu1 %1357  ;;  %v1370_v44 = vmul.f32 %v1368_v39, %v2416_v34 }
0x1653   :  { %v1360_v43 = vmul.f32 %v1358_v36, %v2414_v33 }
0x1655   :  { %v1381_v47 = vadd.f32 %v1365_v41, %v1360_v43 }
0x165b   :  { %v1373_v50 = vpop.permute.xlu1 %1372 }
0x165c   :  { %v1375_v46 = vmul.f32 %v1373_v50, %v2412_v32 }
0x165e   :  { %v1382_v48 = vadd.f32 %v1375_v46, %v1370_v44 }
0x1660   :  { %v1383_v52 = vadd.f32 %v1382_v48, %v1381_v47 }
0x1662   :  { %v1384_v51 = vadd.f32 %v1383_v52, %v1380_v60 }
0x1664   :  { %v1385_v53 = vperm.slane %v1384_v51, 0  ;;  %v1387_v58 = vperm.slane %v1384_v51, 1  ;;  %v1389_v54 = vperm.slane %v1384_v51, 2 }
0x1666   :  { %v1386_v55 = vmul.f32 %v1385_v53, %v2387_v8  ;;  %v1388_v56 = vmul.f32 %v1387_v58, %v2397_v16  ;;  %v1390_v57 = vmul.f32 %v1389_v54, %v2395_v15 }
0x1668   :  { %v1391_v59 = vadd.f32 %v1386_v55, %v2425_v49  ;;  %v1392_v62 = vadd.f32 %v1390_v57, %v1388_v56 }
0x166a   :  { %v2937_v2 = vadd.f32 %v1392_v62, %v1391_v59 }
0x166c   :  { %v1394_v61 = vmul.f32 0.0625, %v2937_v2 }
0x166e   :  { %v1395_v63 = vadd.f32 %v1394_v61, %v2911_v14 }
0x1670   :  { %1403 = vperm.xlu2 %2251, %v1395_v63   ;;  %1398 = vperm.xlu1 %2250, %v1395_v63  }
0x1678   :  { %2254 = vset.pattern.permute.xlu2 %v2351_v1  ;;  %2253 = vset.pattern.permute.xlu1 %v2352_v4 }
0x16ca   :  { %v1404_v12 = vpop.permute.xlu2 %1403 }
0x16cb   :  { %v1406_v6 = vmul.f32 %v1404_v12, %v2391_v10 }
0x16e2   :  { %v1399_v3 = vpop.permute.xlu1 %1398 }
0x16e3   :  { %v1401_v7 = vmul.f32 %v1399_v3, %v2389_v9 }
0x16e5   :  { %v1407_v11 = vadd.f32 %v1406_v6, %v1401_v7 }
0x16e7   :  { %v1408_v13 = vperm.slane %v1407_v11, 0  ;;  %v1410_v19 = vperm.slane %v1407_v11, 1  ;;  %v1412_v25 = vperm.slane %v1407_v11, 2 }
0x16e9   :  { %v1409_v18 = vmul.f32 %v1408_v13, %v2387_v8  ;;  %v1411_v20 = vmul.f32 %v1410_v19, %v2397_v16  ;;  %v1413_v22 = vmul.f32 %v1412_v25, %v2395_v15 }
0x16eb   :  { %v1414_v21 = vadd.f32 %v1409_v18, %v2399_v17  ;;  %v1415_v23 = vadd.f32 %v1413_v22, %v1411_v20 }
0x16ed   :  { %v1416_v24 = vadd.f32 %v1415_v23, %v1414_v21 }
0x16ef   :  { %v1417_v40 = vmax.f32 %v1416_v24, 0.0 }
0x16f1   :  { %1430 = vperm.xlu2 %2254, %v1417_v40   ;;  %1425 = vperm.xlu1 %2253, %v1417_v40  }
0x16f2   :  { %1420 = vperm.xlu0 %2252, %v1417_v40  }
0x16f9   :  { %2256 = vset.pattern.permute.xlu2 %v2354_v28  ;;  %2255 = vset.pattern.permute.xlu1 %v2353_v5 }
0x16fa   :  { %1440 = vperm.xlu2 %2256, %v1417_v40   ;;  %1435 = vperm.xlu1 %2255, %v1417_v40  }
0x1702   :  { %2257 = vset.pattern.permute.xlu1 %v2352_v4  ;;  %2258 = vset.pattern.permute.xlu2 %v2350_v0 }
0x174b   :  { %v1431_v26 = vpop.permute.xlu2 %1430 }
0x174c   :  { %v1433_v36 = vmul.f32 %v1431_v26, %v2416_v34 }
0x1754   :  { %v1441_v39 = vpop.permute.xlu2 %1440 }
0x1755   :  { %v1443_v41 = vmul.f32 %v1441_v39, %v2422_v42 }
0x1763   :  { %v1426_v27 = vpop.permute.xlu1 %1425 }
0x1764   :  { %v1421_v29 = vpop.permute.xlu0 %1420  ;;  %v1428_v38 = vmul.f32 %v1426_v27, %v2410_v31 }
0x1765   :  { %v1423_v30 = vmul.f32 %v1421_v29, %v2414_v33 }
0x1767   :  { %v1444_v43 = vadd.f32 %v1428_v38, %v1423_v30 }
0x176c   :  { %v1436_v35 = vpop.permute.xlu1 %1435 }
0x176d   :  { %v1438_v37 = vmul.f32 %v1436_v35, %v2412_v32 }
0x176f   :  { %v1445_v50 = vadd.f32 %v1438_v37, %v1433_v36 }
0x1771   :  { %v1446_v44 = vadd.f32 %v1445_v50, %v1444_v43 }
0x1773   :  { %v1447_v46 = vadd.f32 %v1446_v44, %v1443_v41 }
0x1775   :  { %v1448_v45 = vperm.slane %v1447_v46, 0  ;;  %v1450_v47 = vperm.slane %v1447_v46, 1  ;;  %v1452_v48 = vperm.slane %v1447_v46, 2 }
0x1777   :  { %v1449_v60 = vmul.f32 %v1448_v45, %v2387_v8  ;;  %v1451_v52 = vmul.f32 %v1450_v47, %v2397_v16  ;;  %v1453_v51 = vmul.f32 %v1452_v48, %v2395_v15 }
0x1779   :  { %v1454_v53 = vadd.f32 %v1449_v60, %v2425_v49  ;;  %v1455_v58 = vadd.f32 %v1453_v51, %v1451_v52 }
0x177b   :  { %v2962_v54 = vadd.f32 %v1455_v58, %v1454_v53 }
0x177d   :  { %v1457_v55 = vmul.f32 0.0625, %v2962_v54 }
0x177f   :  { %v1458_v56 = vadd.f32 %v1457_v55, %v2911_v14 }
0x1781   :  { %1466 = vperm.xlu1 %2257, %v1458_v56   ;;  %1461 = vperm.xlu0 %2252, %v1458_v56  }
0x1789   :  { %2260 = vset.pattern.permute.xlu1 %v2351_v1  ;;  %2259 = vset.pattern.permute.xlu0 %v2352_v4 }
0x17f3   :  { %v1467_v57 = vpop.permute.xlu1 %1466  ;;  %v1462_v59 = vpop.permute.xlu0 %1461 }
0x17f4   :  { %v1469_v62 = vmul.f32 %v1467_v57, %v2391_v10  ;;  %v1464_v61 = vmul.f32 %v1462_v59, %v2389_v9 }
0x17f6   :  { %v1470_v63 = vadd.f32 %v1469_v62, %v1464_v61 }
0x17f8   :  { %v1471_v12 = vperm.slane %v1470_v63, 0  ;;  %v1473_v3 = vperm.slane %v1470_v63, 1  ;;  %v1475_v6 = vperm.slane %v1470_v63, 2 }
0x17fa   :  { %v1472_v7 = vmul.f32 %v1471_v12, %v2387_v8  ;;  %v1474_v11 = vmul.f32 %v1473_v3, %v2397_v16  ;;  %v1476_v13 = vmul.f32 %v1475_v6, %v2395_v15 }
0x17fc   :  { %v1477_v19 = vadd.f32 %v1472_v7, %v2399_v17  ;;  %v1478_v25 = vadd.f32 %v1476_v13, %v1474_v11 }
0x17fe   :  { %v1479_v18 = vadd.f32 %v1478_v25, %v1477_v19 }
0x1800   :  { %v1480_v20 = vmax.f32 %v1479_v18, 0.0 }
0x1802   :  { %1493 = vperm.xlu1 %2260, %v1480_v20   ;;  %1488 = vperm.xlu0 %2259, %v1480_v20  }
0x1803   :  { %1483 = vperm.xlu2 %2258, %v1480_v20  }
0x180a   :  { %2262 = vset.pattern.permute.xlu1 %v2354_v28 }
0x180b   :  { %2261 = vset.pattern.permute.xlu2 %v2353_v5  ;;  %1503 = vperm.xlu1 %2262, %v1480_v20  }
0x180c   :  { %1498 = vperm.xlu2 %2261, %v1480_v20  }
0x1813   :  { %2264 = vset.pattern.permute.xlu1 %v2350_v0 }
0x1814   :  { %2263 = vset.pattern.permute.xlu2 %v2350_v0 }
0x185d   :  { %v1484_v22 = vpop.permute.xlu2 %1483 }
0x185e   :  { %v1486_v26 = vmul.f32 %v1484_v22, %v2414_v33 }
0x1866   :  { %v1499_v24 = vpop.permute.xlu2 %1498 }
0x1867   :  { %v1501_v29 = vmul.f32 %v1499_v24, %v2412_v32 }
0x1874   :  { %v1494_v21 = vpop.permute.xlu1 %1493  ;;  %v1489_v23 = vpop.permute.xlu0 %1488 }
0x1875   :  { %v1496_v40 = vmul.f32 %v1494_v21, %v2416_v34  ;;  %v1491_v27 = vmul.f32 %v1489_v23, %v2410_v31 }
0x1877   :  { %v1508_v38 = vadd.f32 %v1501_v29, %v1496_v40  ;;  %v1507_v30 = vadd.f32 %v1491_v27, %v1486_v26 }
0x1879   :  { %v1509_v37 = vadd.f32 %v1508_v38, %v1507_v30 }
0x187d   :  { %v1504_v35 = vpop.permute.xlu1 %1503 }
0x187e   :  { %v1506_v36 = vmul.f32 %v1504_v35, %v2422_v42 }
0x1880   :  { %v1510_v39 = vadd.f32 %v1509_v37, %v1506_v36 }
0x1882   :  { %v1511_v43 = vperm.slane %v1510_v39, 0  ;;  %v1513_v50 = vperm.slane %v1510_v39, 1  ;;  %v1515_v41 = vperm.slane %v1510_v39, 2 }
0x1884   :  { %v1512_v44 = vmul.f32 %v1511_v43, %v2387_v8  ;;  %v1514_v46 = vmul.f32 %v1513_v50, %v2397_v16  ;;  %v1516_v45 = vmul.f32 %v1515_v41, %v2395_v15 }
0x1886   :  { %v1517_v47 = vadd.f32 %v1512_v44, %v2425_v49  ;;  %v1518_v48 = vadd.f32 %v1516_v45, %v1514_v46 }
0x1888   :  { %v1519_v60 = vadd.f32 %v1518_v48, %v1517_v47 }
0x188a   :  { %v1520_v52 = vmul.f32 0.125, %v1519_v60  ;;  %v1584_v41 = vadd.f32 %v1519_v60, %v2962_v54 }
0x188c   :  { %v1521_v51 = vadd.f32 %v1520_v52, %v2911_v14  ;;  %v1585_v47 = vmul.f32 2.0, %v1584_v41 }
0x188e   :  { %1529 = vperm.xlu0 %2259, %v1521_v51   ;;  %1524 = vperm.xlu2 %2263, %v1521_v51  }
0x1896   :  { %2266 = vset.pattern.permute.xlu0 %v2351_v1  ;;  %2265 = vset.pattern.permute.xlu2 %v2352_v4 }
0x18e8   :  { %v1525_v53 = vpop.permute.xlu2 %1524 }
0x18e9   :  { %v1527_v55 = vmul.f32 %v1525_v53, %v2389_v9 }
0x1900   :  { %v1530_v58 = vpop.permute.xlu0 %1529 }
0x1901   :  { %v1532_v56 = vmul.f32 %v1530_v58, %v2391_v10 }
0x1903   :  { %v1533_v57 = vadd.f32 %v1532_v56, %v1527_v55 }
0x1905   :  { %v1534_v59 = vperm.slane %v1533_v57, 0  ;;  %v1536_v62 = vperm.slane %v1533_v57, 1  ;;  %v1538_v61 = vperm.slane %v1533_v57, 2 }
0x1907   :  { %v1535_v63 = vmul.f32 %v1534_v59, %v2387_v8  ;;  %v1537_v12 = vmul.f32 %v1536_v62, %v2397_v16  ;;  %v1539_v3 = vmul.f32 %v1538_v61, %v2395_v15 }
0x1909   :  { %v1540_v6 = vadd.f32 %v1535_v63, %v2399_v17  ;;  %v1541_v7 = vadd.f32 %v1539_v3, %v1537_v12 }
0x190b   :  { %v1542_v11 = vadd.f32 %v1541_v7, %v1540_v6 }
0x190d   :  { %v1543_v13 = vmax.f32 %v1542_v11, 0.0 }
0x190f   :  { %1556 = vperm.xlu0 %2266, %v1543_v13   ;;  %1551 = vperm.xlu2 %2265, %v1543_v13  }
0x1910   :  { %1546 = vperm.xlu1 %2264, %v1543_v13  }
0x1917   :  { %2268 = vset.pattern.permute.xlu2 %v2354_v28  ;;  %2271 = vset.pattern.permute.xlu0 %v2350_v0 }
0x1918   :  { %2267 = vset.pattern.permute.xlu1 %v2353_v5  ;;  %1566 = vperm.xlu2 %2268, %v1543_v13  }
0x1919   :  { %1561 = vperm.xlu1 %2267, %v1543_v13  }
0x1920   :  { %2270 = vset.pattern.permute.xlu2 %v2352_v4 }
0x1921   :  { %2269 = vset.pattern.permute.xlu1 %v2350_v0 }
0x1969   :  { %v1552_v25 = vpop.permute.xlu2 %1551 }
0x196a   :  { %v1554_v21 = vmul.f32 %v1552_v25, %v2410_v31 }
0x1972   :  { %v1567_v40 = vpop.permute.xlu2 %1566 }
0x1973   :  { %v1569_v29 = vmul.f32 %v1567_v40, %v2422_v42 }
0x1981   :  { %v1557_v18 = vpop.permute.xlu0 %1556 }
0x1982   :  { %v1547_v19 = vpop.permute.xlu1 %1546  ;;  %v1559_v23 = vmul.f32 %v1557_v18, %v2416_v34 }
0x1983   :  { %v1549_v20 = vmul.f32 %v1547_v19, %v2414_v33 }
0x1985   :  { %v1570_v27 = vadd.f32 %v1554_v21, %v1549_v20 }
0x198b   :  { %v1562_v22 = vpop.permute.xlu1 %1561 }
0x198c   :  { %v1564_v24 = vmul.f32 %v1562_v22, %v2412_v32 }
0x198e   :  { %v1571_v26 = vadd.f32 %v1564_v24, %v1559_v23 }
0x1990   :  { %v1572_v38 = vadd.f32 %v1571_v26, %v1570_v27 }
0x1992   :  { %v1573_v30 = vadd.f32 %v1572_v38, %v1569_v29 }
0x1994   :  { %v1574_v35 = vperm.slane %v1573_v30, 0  ;;  %v1576_v36 = vperm.slane %v1573_v30, 1  ;;  %v1578_v37 = vperm.slane %v1573_v30, 2 }
0x1996   :  { %v1575_v39 = vmul.f32 %v1574_v35, %v2387_v8  ;;  %v1577_v43 = vmul.f32 %v1576_v36, %v2397_v16  ;;  %v1579_v50 = vmul.f32 %v1578_v37, %v2395_v15 }
0x1998   :  { %v1580_v44 = vadd.f32 %v1575_v39, %v2425_v49  ;;  %v1581_v46 = vadd.f32 %v1579_v50, %v1577_v43 }
0x199a   :  { %v1582_v45 = vadd.f32 %v1581_v46, %v1580_v44 }
0x199c   :  { %v1583_v48 = vadd.f32 %v1582_v45, %v2937_v2 }
0x199e   :  { %v1586_v52 = vadd.f32 %v1585_v47, %v1583_v48 }
0x19a0   :  { %v1587_v51 = vmul.f32 0.020833334, %v1586_v52 }
0x19a2   :  { %v3013_v53 = vadd.f32 %v1587_v51, %v2911_v14 }
0x19a4   :  { %1596 = vperm.xlu2 %2270, %v3013_v53   ;;  %1591 = vperm.xlu1 %2269, %v3013_v53  }
0x19ac   :  { %2273 = vset.pattern.permute.xlu2 %v2351_v1  ;;  %2272 = vset.pattern.permute.xlu1 %v2352_v4 }
0x19fe   :  { %v1597_v54 = vpop.permute.xlu2 %1596 }
0x19ff   :  { %v1599_v58 = vmul.f32 %v1597_v54, %v2391_v10 }
0x1a16   :  { %v1592_v60 = vpop.permute.xlu1 %1591 }
0x1a17   :  { %v1594_v55 = vmul.f32 %v1592_v60, %v2389_v9 }
0x1a19   :  { %v1600_v2 = vadd.f32 %v1599_v58, %v1594_v55 }
0x1a1b   :  { %v1601_v56 = vperm.slane %v1600_v2, 0  ;;  %v1603_v57 = vperm.slane %v1600_v2, 1  ;;  %v1605_v59 = vperm.slane %v1600_v2, 2 }
0x1a1d   :  { %v1602_v14 = vmul.f32 %v1601_v56, %v2387_v8  ;;  %v1604_v62 = vmul.f32 %v1603_v57, %v2397_v16  ;;  %v1606_v61 = vmul.f32 %v1605_v59, %v2395_v15 }
0x1a1f   :  { %v1607_v63 = vadd.f32 %v1602_v14, %v2399_v17  ;;  %v1608_v12 = vadd.f32 %v1606_v61, %v1604_v62 }
0x1a21   :  { %v1609_v3 = vadd.f32 %v1608_v12, %v1607_v63 }
0x1a23   :  { %v1610_v6 = vmax.f32 %v1609_v3, 0.0 }
0x1a25   :  { %1623 = vperm.xlu2 %2273, %v1610_v6   ;;  %1618 = vperm.xlu1 %2272, %v1610_v6  }
0x1a26   :  { %1613 = vperm.xlu0 %2271, %v1610_v6  }
0x1a2d   :  { %2275 = vset.pattern.permute.xlu2 %v2354_v28  ;;  %2274 = vset.pattern.permute.xlu1 %v2353_v5 }
0x1a2e   :  { %1633 = vperm.xlu2 %2275, %v1610_v6   ;;  %1628 = vperm.xlu1 %2274, %v1610_v6  }
0x1a36   :  { %2276 = vset.pattern.permute.xlu1 %v2352_v4  ;;  %2277 = vset.pattern.permute.xlu2 %v2350_v0 }
0x1a7f   :  { %v1624_v11 = vpop.permute.xlu2 %1623 }
0x1a80   :  { %v1626_v20 = vmul.f32 %v1624_v11, %v2416_v34 }
0x1a88   :  { %v1634_v21 = vpop.permute.xlu2 %1633 }
0x1a89   :  { %v1636_v40 = vmul.f32 %v1634_v21, %v2422_v42 }
0x1a97   :  { %v1619_v7 = vpop.permute.xlu1 %1618 }
0x1a98   :  { %v1614_v13 = vpop.permute.xlu0 %1613  ;;  %v1621_v19 = vmul.f32 %v1619_v7, %v2410_v31 }
0x1a99   :  { %v1616_v25 = vmul.f32 %v1614_v13, %v2414_v33 }
0x1a9b   :  { %v1637_v23 = vadd.f32 %v1621_v19, %v1616_v25 }
0x1aa0   :  { %v1629_v18 = vpop.permute.xlu1 %1628 }
0x1aa1   :  { %v1631_v22 = vmul.f32 %v1629_v18, %v2412_v32 }
0x1aa3   :  { %v1638_v24 = vadd.f32 %v1631_v22, %v1626_v20 }
0x1aa5   :  { %v1639_v27 = vadd.f32 %v1638_v24, %v1637_v23 }
0x1aa7   :  { %v1640_v26 = vadd.f32 %v1639_v27, %v1636_v40 }
0x1aa9   :  { %v1641_v29 = vperm.slane %v1640_v26, 0  ;;  %v1643_v38 = vperm.slane %v1640_v26, 1  ;;  %v1645_v30 = vperm.slane %v1640_v26, 2 }
0x1aab   :  { %v1642_v35 = vmul.f32 %v1641_v29, %v2387_v8  ;;  %v1644_v36 = vmul.f32 %v1643_v38, %v2397_v16  ;;  %v1646_v37 = vmul.f32 %v1645_v30, %v2395_v15 }
0x1aad   :  { %v1647_v39 = vadd.f32 %v1642_v35, %v2425_v49  ;;  %v1648_v43 = vadd.f32 %v1646_v37, %v1644_v36 }
0x1aaf   :  { %v3038_v50 = vadd.f32 %v1648_v43, %v1647_v39 }
0x1ab1   :  { %v1650_v41 = vmul.f32 0.0625, %v3038_v50 }
0x1ab3   :  { %v1651_v44 = vadd.f32 %v1650_v41, %v3013_v53 }
0x1ab5   :  { %1659 = vperm.xlu1 %2276, %v1651_v44   ;;  %1654 = vperm.xlu0 %2271, %v1651_v44  }
0x1abd   :  { %2279 = vset.pattern.permute.xlu1 %v2351_v1  ;;  %2278 = vset.pattern.permute.xlu0 %v2352_v4 }
0x1b27   :  { %v1660_v46 = vpop.permute.xlu1 %1659  ;;  %v1655_v45 = vpop.permute.xlu0 %1654 }
0x1b28   :  { %v1662_v47 = vmul.f32 %v1660_v46, %v2391_v10  ;;  %v1657_v48 = vmul.f32 %v1655_v45, %v2389_v9 }
0x1b2a   :  { %v1663_v52 = vadd.f32 %v1662_v47, %v1657_v48 }
0x1b2c   :  { %v1664_v51 = vperm.slane %v1663_v52, 0  ;;  %v1666_v54 = vperm.slane %v1663_v52, 1  ;;  %v1668_v60 = vperm.slane %v1663_v52, 2 }
0x1b2e   :  { %v1665_v58 = vmul.f32 %v1664_v51, %v2387_v8  ;;  %v1667_v55 = vmul.f32 %v1666_v54, %v2397_v16  ;;  %v1669_v2 = vmul.f32 %v1668_v60, %v2395_v15 }
0x1b30   :  { %v1670_v56 = vadd.f32 %v1665_v58, %v2399_v17  ;;  %v1671_v57 = vadd.f32 %v1669_v2, %v1667_v55 }
0x1b32   :  { %v1672_v59 = vadd.f32 %v1671_v57, %v1670_v56 }
0x1b34   :  { %v1673_v14 = vmax.f32 %v1672_v59, 0.0 }
0x1b36   :  { %1686 = vperm.xlu1 %2279, %v1673_v14   ;;  %1681 = vperm.xlu0 %2278, %v1673_v14  }
0x1b37   :  { %1676 = vperm.xlu2 %2277, %v1673_v14  }
0x1b3e   :  { %2281 = vset.pattern.permute.xlu1 %v2354_v28 }
0x1b3f   :  { %2280 = vset.pattern.permute.xlu2 %v2353_v5  ;;  %1696 = vperm.xlu1 %2281, %v1673_v14  }
0x1b40   :  { %1691 = vperm.xlu2 %2280, %v1673_v14  }
0x1b47   :  { %2283 = vset.pattern.permute.xlu1 %v2350_v0 }
0x1b48   :  { %2282 = vset.pattern.permute.xlu2 %v2350_v0 }
0x1b91   :  { %v1677_v62 = vpop.permute.xlu2 %1676 }
0x1b92   :  { %v1679_v7 = vmul.f32 %v1677_v62, %v2414_v33 }
0x1b9a   :  { %v1692_v12 = vpop.permute.xlu2 %1691 }
0x1b9b   :  { %v1694_v11 = vmul.f32 %v1692_v12, %v2412_v32 }
0x1ba8   :  { %v1687_v61 = vpop.permute.xlu1 %1686  ;;  %v1682_v63 = vpop.permute.xlu0 %1681 }
0x1ba9   :  { %v1689_v3 = vmul.f32 %v1687_v61, %v2416_v34  ;;  %v1684_v6 = vmul.f32 %v1682_v63, %v2410_v31 }
0x1bab   :  { %v1701_v13 = vadd.f32 %v1694_v11, %v1689_v3  ;;  %v1700_v19 = vadd.f32 %v1684_v6, %v1679_v7 }
0x1bad   :  { %v1702_v20 = vadd.f32 %v1701_v13, %v1700_v19 }
0x1bb1   :  { %v1697_v25 = vpop.permute.xlu1 %1696 }
0x1bb2   :  { %v1699_v18 = vmul.f32 %v1697_v25, %v2422_v42 }
0x1bb4   :  { %v1703_v22 = vadd.f32 %v1702_v20, %v1699_v18 }
0x1bb6   :  { %v1704_v21 = vperm.slane %v1703_v22, 0  ;;  %v1706_v23 = vperm.slane %v1703_v22, 1  ;;  %v1708_v24 = vperm.slane %v1703_v22, 2 }
0x1bb8   :  { %v1705_v40 = vmul.f32 %v1704_v21, %v2387_v8  ;;  %v1707_v27 = vmul.f32 %v1706_v23, %v2397_v16  ;;  %v1709_v26 = vmul.f32 %v1708_v24, %v2395_v15 }
0x1bba   :  { %v1710_v29 = vadd.f32 %v1705_v40, %v2425_v49  ;;  %v1711_v38 = vadd.f32 %v1709_v26, %v1707_v27 }
0x1bbc   :  { %v3063_v30 = vadd.f32 %v1711_v38, %v1710_v29 }
0x1bbe   :  { %v1713_v35 = vmul.f32 0.0625, %v3063_v30 }
0x1bc0   :  { %v1714_v36 = vadd.f32 %v1713_v35, %v3013_v53 }
0x1bc2   :  { %1722 = vperm.xlu0 %2278, %v1714_v36   ;;  %1717 = vperm.xlu2 %2282, %v1714_v36  }
0x1bca   :  { %2285 = vset.pattern.permute.xlu0 %v2351_v1  ;;  %2284 = vset.pattern.permute.xlu2 %v2352_v4 }
0x1c1c   :  { %v1718_v37 = vpop.permute.xlu2 %1717 }
0x1c1d   :  { %v1720_v43 = vmul.f32 %v1718_v37, %v2389_v9 }
0x1c34   :  { %v1723_v39 = vpop.permute.xlu0 %1722 }
0x1c35   :  { %v1725_v41 = vmul.f32 %v1723_v39, %v2391_v10 }
0x1c37   :  { %v1726_v44 = vadd.f32 %v1725_v41, %v1720_v43 }
0x1c39   :  { %v1727_v46 = vperm.slane %v1726_v44, 0  ;;  %v1729_v45 = vperm.slane %v1726_v44, 1  ;;  %v1731_v47 = vperm.slane %v1726_v44, 2 }
0x1c3b   :  { %v1728_v48 = vmul.f32 %v1727_v46, %v2387_v8  ;;  %v1730_v52 = vmul.f32 %v1729_v45, %v2397_v16  ;;  %v1732_v51 = vmul.f32 %v1731_v47, %v2395_v15 }
0x1c3d   :  { %v1733_v54 = vadd.f32 %v1728_v48, %v2399_v17  ;;  %v1734_v60 = vadd.f32 %v1732_v51, %v1730_v52 }
0x1c3f   :  { %v1735_v58 = vadd.f32 %v1734_v60, %v1733_v54 }
0x1c41   :  { %v1736_v55 = vmax.f32 %v1735_v58, 0.0 }
0x1c43   :  { %1749 = vperm.xlu0 %2285, %v1736_v55   ;;  %1744 = vperm.xlu2 %2284, %v1736_v55  }
0x1c44   :  { %1739 = vperm.xlu1 %2283, %v1736_v55  }
0x1c4b   :  { %2287 = vset.pattern.permute.xlu2 %v2354_v28  ;;  %2290 = vset.pattern.permute.xlu0 %v2350_v0 }
0x1c4c   :  { %2286 = vset.pattern.permute.xlu1 %v2353_v5  ;;  %1759 = vperm.xlu2 %2287, %v1736_v55  }
0x1c4d   :  { %1754 = vperm.xlu1 %2286, %v1736_v55  }
0x1c54   :  { %2289 = vset.pattern.permute.xlu2 %v2352_v4 }
0x1c55   :  { %2288 = vset.pattern.permute.xlu1 %v2350_v0 }
0x1c9d   :  { %v1745_v56 = vpop.permute.xlu2 %1744 }
0x1c9e   :  { %v1747_v62 = vmul.f32 %v1745_v56, %v2410_v31 }
0x1ca6   :  { %v1760_v12 = vpop.permute.xlu2 %1759 }
0x1ca7   :  { %v1762_v7 = vmul.f32 %v1760_v12, %v2422_v42 }
0x1cb5   :  { %v1750_v57 = vpop.permute.xlu0 %1749 }
0x1cb6   :  { %v1740_v2 = vpop.permute.xlu1 %1739  ;;  %v1752_v61 = vmul.f32 %v1750_v57, %v2416_v34 }
0x1cb7   :  { %v1742_v59 = vmul.f32 %v1740_v2, %v2414_v33 }
0x1cb9   :  { %v1763_v3 = vadd.f32 %v1747_v62, %v1742_v59 }
0x1cbf   :  { %v1755_v14 = vpop.permute.xlu1 %1754 }
0x1cc0   :  { %v1757_v63 = vmul.f32 %v1755_v14, %v2412_v32 }
0x1cc2   :  { %v1764_v6 = vadd.f32 %v1757_v63, %v1752_v61 }
0x1cc4   :  { %v1765_v11 = vadd.f32 %v1764_v6, %v1763_v3 }
0x1cc6   :  { %v1766_v13 = vadd.f32 %v1765_v11, %v1762_v7 }
0x1cc8   :  { %v1767_v19 = vperm.slane %v1766_v13, 0  ;;  %v1769_v25 = vperm.slane %v1766_v13, 1  ;;  %v1771_v18 = vperm.slane %v1766_v13, 2 }
0x1cca   :  { %v1768_v20 = vmul.f32 %v1767_v19, %v2387_v8  ;;  %v1770_v22 = vmul.f32 %v1769_v25, %v2397_v16  ;;  %v1772_v21 = vmul.f32 %v1771_v18, %v2395_v15 }
0x1ccc   :  { %v1773_v23 = vadd.f32 %v1768_v20, %v2425_v49  ;;  %v1774_v24 = vadd.f32 %v1772_v21, %v1770_v22 }
0x1cce   :  { %v1775_v40 = vadd.f32 %v1774_v24, %v1773_v23 }
0x1cd0   :  { %v1776_v27 = vmul.f32 0.125, %v1775_v40  ;;  %v1840_v18 = vadd.f32 %v1775_v40, %v3063_v30 }
0x1cd2   :  { %v1777_v26 = vadd.f32 %v1776_v27, %v3013_v53  ;;  %v1841_v23 = vmul.f32 2.0, %v1840_v18 }
0x1cd4   :  { %1785 = vperm.xlu2 %2289, %v1777_v26   ;;  %1780 = vperm.xlu1 %2288, %v1777_v26  }
0x1cdc   :  { %2292 = vset.pattern.permute.xlu2 %v2351_v1  ;;  %2291 = vset.pattern.permute.xlu1 %v2352_v4 }
0x1d2e   :  { %v1786_v29 = vpop.permute.xlu2 %1785 }
0x1d2f   :  { %v1788_v35 = vmul.f32 %v1786_v29, %v2391_v10 }
0x1d46   :  { %v1781_v38 = vpop.permute.xlu1 %1780 }
0x1d47   :  { %v1783_v36 = vmul.f32 %v1781_v38, %v2389_v9 }
0x1d49   :  { %v1789_v37 = vadd.f32 %v1788_v35, %v1783_v36 }
0x1d4b   :  { %v1790_v39 = vperm.slane %v1789_v37, 0  ;;  %v1792_v43 = vperm.slane %v1789_v37, 1  ;;  %v1794_v41 = vperm.slane %v1789_v37, 2 }
0x1d4d   :  { %v1791_v44 = vmul.f32 %v1790_v39, %v2387_v8  ;;  %v1793_v46 = vmul.f32 %v1792_v43, %v2397_v16  ;;  %v1795_v45 = vmul.f32 %v1794_v41, %v2395_v15 }
0x1d4f   :  { %v1796_v47 = vadd.f32 %v1791_v44, %v2399_v17  ;;  %v1797_v48 = vadd.f32 %v1795_v45, %v1793_v46 }
0x1d51   :  { %v1798_v52 = vadd.f32 %v1797_v48, %v1796_v47 }
0x1d53   :  { %v1799_v51 = vmax.f32 %v1798_v52, 0.0 }
0x1d55   :  { %1812 = vperm.xlu2 %2292, %v1799_v51   ;;  %1807 = vperm.xlu1 %2291, %v1799_v51  }
0x1d56   :  { %1802 = vperm.xlu0 %2290, %v1799_v51  }
0x1d5d   :  { %2294 = vset.pattern.permute.xlu2 %v2354_v28  ;;  %2293 = vset.pattern.permute.xlu1 %v2353_v5 }
0x1d5e   :  { %1822 = vperm.xlu2 %2294, %v1799_v51   ;;  %1817 = vperm.xlu1 %2293, %v1799_v51  }
0x1d66   :  { %2295 = vset.pattern.permute.xlu1 %v2352_v4  ;;  %2296 = vset.pattern.permute.xlu2 %v2350_v0 }
0x1daf   :  { %v1813_v60 = vpop.permute.xlu2 %1812 }
0x1db0   :  { %v1815_v57 = vmul.f32 %v1813_v60, %v2416_v34 }
0x1db8   :  { %v1823_v14 = vpop.permute.xlu2 %1822 }
0x1db9   :  { %v1825_v63 = vmul.f32 %v1823_v14, %v2422_v42 }
0x1dc7   :  { %v1808_v54 = vpop.permute.xlu1 %1807 }
0x1dc8   :  { %v1803_v58 = vpop.permute.xlu0 %1802  ;;  %v1810_v55 = vmul.f32 %v1808_v54, %v2410_v31 }
0x1dc9   :  { %v1805_v2 = vmul.f32 %v1803_v58, %v2414_v33 }
0x1dcb   :  { %v1826_v62 = vadd.f32 %v1810_v55, %v1805_v2 }
0x1dd0   :  { %v1818_v56 = vpop.permute.xlu1 %1817 }
0x1dd1   :  { %v1820_v59 = vmul.f32 %v1818_v56, %v2412_v32 }
0x1dd3   :  { %v1827_v61 = vadd.f32 %v1820_v59, %v1815_v57 }
0x1dd5   :  { %v1828_v12 = vadd.f32 %v1827_v61, %v1826_v62 }
0x1dd7   :  { %v1829_v3 = vadd.f32 %v1828_v12, %v1825_v63 }
0x1dd9   :  { %v1830_v6 = vperm.slane %v1829_v3, 0  ;;  %v1832_v7 = vperm.slane %v1829_v3, 1  ;;  %v1834_v11 = vperm.slane %v1829_v3, 2 }
0x1ddb   :  { %v1831_v13 = vmul.f32 %v1830_v6, %v2387_v8  ;;  %v1833_v19 = vmul.f32 %v1832_v7, %v2397_v16  ;;  %v1835_v25 = vmul.f32 %v1834_v11, %v2395_v15 }
0x1ddd   :  { %v1836_v20 = vadd.f32 %v1831_v13, %v2425_v49  ;;  %v1837_v22 = vadd.f32 %v1835_v25, %v1833_v19 }
0x1ddf   :  { %v1838_v21 = vadd.f32 %v1837_v22, %v1836_v20 }
0x1de1   :  { %v1839_v24 = vadd.f32 %v1838_v21, %v3038_v50 }
0x1de3   :  { %v1842_v27 = vadd.f32 %v1841_v23, %v1839_v24 }
0x1de5   :  { %v1843_v26 = vmul.f32 0.020833334, %v1842_v27 }
0x1de7   :  { %v3114_v29 = vadd.f32 %v1843_v26, %v3013_v53 }
0x1de9   :  { %1852 = vperm.xlu1 %2295, %v3114_v29   ;;  %1847 = vperm.xlu0 %2290, %v3114_v29  }
0x1df1   :  { %2298 = vset.pattern.permute.xlu1 %v2351_v1  ;;  %2297 = vset.pattern.permute.xlu0 %v2352_v4 }
0x1e5b   :  { %v1853_v30 = vpop.permute.xlu1 %1852  ;;  %v1848_v40 = vpop.permute.xlu0 %1847 }
0x1e5c   :  { %v1855_v38 = vmul.f32 %v1853_v30, %v2391_v10  ;;  %v1850_v35 = vmul.f32 %v1848_v40, %v2389_v9 }
0x1e5e   :  { %v1856_v50 = vadd.f32 %v1855_v38, %v1850_v35 }
0x1e60   :  { %v1857_v36 = vperm.slane %v1856_v50, 0  ;;  %v1859_v37 = vperm.slane %v1856_v50, 1  ;;  %v1861_v39 = vperm.slane %v1856_v50, 2 }
0x1e62   :  { %v1858_v53 = vmul.f32 %v1857_v36, %v2387_v8  ;;  %v1860_v43 = vmul.f32 %v1859_v37, %v2397_v16  ;;  %v1862_v41 = vmul.f32 %v1861_v39, %v2395_v15 }
0x1e64   :  { %v1863_v44 = vadd.f32 %v1858_v53, %v2399_v17  ;;  %v1864_v46 = vadd.f32 %v1862_v41, %v1860_v43 }
0x1e66   :  { %v1865_v45 = vadd.f32 %v1864_v46, %v1863_v44 }
0x1e68   :  { %v1866_v47 = vmax.f32 %v1865_v45, 0.0 }
0x1e6a   :  { %1879 = vperm.xlu1 %2298, %v1866_v47   ;;  %1874 = vperm.xlu0 %2297, %v1866_v47  }
0x1e6b   :  { %1869 = vperm.xlu2 %2296, %v1866_v47  }
0x1e72   :  { %2300 = vset.pattern.permute.xlu1 %v2354_v28 }
0x1e73   :  { %2299 = vset.pattern.permute.xlu2 %v2353_v5  ;;  %1889 = vperm.xlu1 %2300, %v1866_v47  }
0x1e74   :  { %1884 = vperm.xlu2 %2299, %v1866_v47  }
0x1e7b   :  { %2302 = vset.pattern.permute.xlu1 %v2350_v0 }
0x1e7c   :  { %2301 = vset.pattern.permute.xlu2 %v2350_v0 }
0x1ec5   :  { %v1870_v48 = vpop.permute.xlu2 %1869 }
0x1ec6   :  { %v1872_v55 = vmul.f32 %v1870_v48, %v2414_v33 }
0x1ece   :  { %v1885_v54 = vpop.permute.xlu2 %1884 }
0x1ecf   :  { %v1887_v2 = vmul.f32 %v1885_v54, %v2412_v32 }
0x1edc   :  { %v1880_v52 = vpop.permute.xlu1 %1879  ;;  %v1875_v51 = vpop.permute.xlu0 %1874 }
0x1edd   :  { %v1882_v60 = vmul.f32 %v1880_v52, %v2416_v34  ;;  %v1877_v58 = vmul.f32 %v1875_v51, %v2410_v31 }
0x1edf   :  { %v1894_v56 = vadd.f32 %v1887_v2, %v1882_v60  ;;  %v1893_v57 = vadd.f32 %v1877_v58, %v1872_v55 }
0x1ee1   :  { %v1895_v62 = vadd.f32 %v1894_v56, %v1893_v57 }
0x1ee5   :  { %v1890_v59 = vpop.permute.xlu1 %1889 }
0x1ee6   :  { %v1892_v14 = vmul.f32 %v1890_v59, %v2422_v42 }
0x1ee8   :  { %v1896_v61 = vadd.f32 %v1895_v62, %v1892_v14 }
0x1eea   :  { %v1897_v63 = vperm.slane %v1896_v61, 0  ;;  %v1899_v12 = vperm.slane %v1896_v61, 1  ;;  %v1901_v3 = vperm.slane %v1896_v61, 2 }
0x1eec   :  { %v1898_v6 = vmul.f32 %v1897_v63, %v2387_v8  ;;  %v1900_v7 = vmul.f32 %v1899_v12, %v2397_v16  ;;  %v1902_v11 = vmul.f32 %v1901_v3, %v2395_v15 }
0x1eee   :  { %v1903_v13 = vadd.f32 %v1898_v6, %v2425_v49  ;;  %v1904_v19 = vadd.f32 %v1902_v11, %v1900_v7 }
0x1ef0   :  { %v3139_v25 = vadd.f32 %v1904_v19, %v1903_v13 }
0x1ef2   :  { %v1906_v18 = vmul.f32 0.0625, %v3139_v25 }
0x1ef4   :  { %v1907_v20 = vadd.f32 %v1906_v18, %v3114_v29 }
0x1ef6   :  { %1915 = vperm.xlu0 %2297, %v1907_v20   ;;  %1910 = vperm.xlu2 %2301, %v1907_v20  }
0x1efe   :  { %2304 = vset.pattern.permute.xlu0 %v2351_v1  ;;  %2303 = vset.pattern.permute.xlu2 %v2352_v4 }
0x1f50   :  { %v1911_v22 = vpop.permute.xlu2 %1910 }
0x1f51   :  { %v1913_v23 = vmul.f32 %v1911_v22, %v2389_v9 }
0x1f68   :  { %v1916_v21 = vpop.permute.xlu0 %1915 }
0x1f69   :  { %v1918_v24 = vmul.f32 %v1916_v21, %v2391_v10 }
0x1f6b   :  { %v1919_v27 = vadd.f32 %v1918_v24, %v1913_v23 }
0x1f6d   :  { %v1920_v26 = vperm.slane %v1919_v27, 0  ;;  %v1922_v30 = vperm.slane %v1919_v27, 1  ;;  %v1924_v40 = vperm.slane %v1919_v27, 2 }
0x1f6f   :  { %v1921_v38 = vmul.f32 %v1920_v26, %v2387_v8  ;;  %v1923_v35 = vmul.f32 %v1922_v30, %v2397_v16  ;;  %v1925_v50 = vmul.f32 %v1924_v40, %v2395_v15 }
0x1f71   :  { %v1926_v36 = vadd.f32 %v1921_v38, %v2399_v17  ;;  %v1927_v37 = vadd.f32 %v1925_v50, %v1923_v35 }
0x1f73   :  { %v1928_v39 = vadd.f32 %v1927_v37, %v1926_v36 }
0x1f75   :  { %v1929_v53 = vmax.f32 %v1928_v39, 0.0 }
0x1f77   :  { %1942 = vperm.xlu0 %2304, %v1929_v53   ;;  %1937 = vperm.xlu2 %2303, %v1929_v53  }
0x1f78   :  { %1932 = vperm.xlu1 %2302, %v1929_v53  }
0x1f7f   :  { %2306 = vset.pattern.permute.xlu2 %v2354_v28  ;;  %2309 = vset.pattern.permute.xlu0 %v2350_v0 }
0x1f80   :  { %2305 = vset.pattern.permute.xlu1 %v2353_v5  ;;  %1952 = vperm.xlu2 %2306, %v1929_v53  }
0x1f81   :  { %1947 = vperm.xlu1 %2305, %v1929_v53  }
0x1f88   :  { %2308 = vset.pattern.permute.xlu2 %v2352_v4 }
0x1f89   :  { %2307 = vset.pattern.permute.xlu1 %v2350_v0 }
0x1fd1   :  { %v1938_v41 = vpop.permute.xlu2 %1937 }
0x1fd2   :  { %v1940_v47 = vmul.f32 %v1938_v41, %v2410_v31 }
0x1fda   :  { %v1953_v51 = vpop.permute.xlu2 %1952 }
0x1fdb   :  { %v1955_v58 = vmul.f32 %v1953_v51, %v2422_v42 }
0x1fe9   :  { %v1943_v44 = vpop.permute.xlu0 %1942 }
0x1fea   :  { %v1933_v43 = vpop.permute.xlu1 %1932  ;;  %v1945_v48 = vmul.f32 %v1943_v44, %v2416_v34 }
0x1feb   :  { %v1935_v46 = vmul.f32 %v1933_v43, %v2414_v33 }
0x1fed   :  { %v1956_v54 = vadd.f32 %v1940_v47, %v1935_v46 }
0x1ff3   :  { %v1948_v45 = vpop.permute.xlu1 %1947 }
0x1ff4   :  { %v1950_v52 = vmul.f32 %v1948_v45, %v2412_v32 }
0x1ff6   :  { %v1957_v60 = vadd.f32 %v1950_v52, %v1945_v48 }
0x1ff8   :  { %v1958_v55 = vadd.f32 %v1957_v60, %v1956_v54 }
0x1ffa   :  { %v1959_v2 = vadd.f32 %v1958_v55, %v1955_v58 }
0x1ffc   :  { %v1960_v56 = vperm.slane %v1959_v2, 0  ;;  %v1962_v57 = vperm.slane %v1959_v2, 1  ;;  %v1964_v59 = vperm.slane %v1959_v2, 2 }
0x1ffe   :  { %v1961_v14 = vmul.f32 %v1960_v56, %v2387_v8  ;;  %v1963_v62 = vmul.f32 %v1962_v57, %v2397_v16  ;;  %v1965_v61 = vmul.f32 %v1964_v59, %v2395_v15 }
0x2000   :  { %v1966_v63 = vadd.f32 %v1961_v14, %v2425_v49  ;;  %v1967_v12 = vadd.f32 %v1965_v61, %v1963_v62 }
0x2002   :  { %v3165_v3 = vadd.f32 %v1967_v12, %v1966_v63 }
0x2004   :  { %v1969_v6 = vmul.f32 0.0625, %v3165_v3 }
0x2006   :  { %v1970_v7 = vadd.f32 %v1969_v6, %v3114_v29 }
0x2008   :  { %1978 = vperm.xlu2 %2308, %v1970_v7   ;;  %1973 = vperm.xlu1 %2307, %v1970_v7  }
0x2010   :  { %2311 = vset.pattern.permute.xlu2 %v2351_v1  ;;  %2310 = vset.pattern.permute.xlu1 %v2352_v4 }
0x2062   :  { %v1979_v11 = vpop.permute.xlu2 %1978 }
0x2063   :  { %v1981_v19 = vmul.f32 %v1979_v11, %v2391_v10 }
0x207a   :  { %v1974_v13 = vpop.permute.xlu1 %1973 }
0x207b   :  { %v1976_v18 = vmul.f32 %v1974_v13, %v2389_v9 }
0x207d   :  { %v1982_v20 = vadd.f32 %v1981_v19, %v1976_v18 }
0x207f   :  { %v1983_v22 = vperm.slane %v1982_v20, 0  ;;  %v1985_v21 = vperm.slane %v1982_v20, 1  ;;  %v1987_v23 = vperm.slane %v1982_v20, 2 }
0x2081   :  { %v1984_v24 = vmul.f32 %v1983_v22, %v2387_v8  ;;  %v1986_v27 = vmul.f32 %v1985_v21, %v2397_v16  ;;  %v1988_v26 = vmul.f32 %v1987_v23, %v2395_v15 }
0x2083   :  { %v1989_v30 = vadd.f32 %v1984_v24, %v2399_v17  ;;  %v1990_v40 = vadd.f32 %v1988_v26, %v1986_v27 }
0x2085   :  { %v1991_v38 = vadd.f32 %v1990_v40, %v1989_v30 }
0x2087   :  { %v1992_v35 = vmax.f32 %v1991_v38, 0.0 }
0x2089   :  { %2005 = vperm.xlu2 %2311, %v1992_v35   ;;  %2000 = vperm.xlu1 %2310, %v1992_v35  }
0x208a   :  { %1995 = vperm.xlu0 %2309, %v1992_v35  }
0x2091   :  { %2313 = vset.pattern.permute.xlu2 %v2354_v28  ;;  %2312 = vset.pattern.permute.xlu1 %v2353_v5 }
0x2092   :  { %2015 = vperm.xlu2 %2313, %v1992_v35   ;;  %2010 = vperm.xlu1 %2312, %v1992_v35  }
0x209a   :  { %2314 = vset.pattern.permute.xlu1 %v2352_v4  ;;  %2315 = vset.pattern.permute.xlu2 %v2350_v0 }
0x20e3   :  { %v2006_v36 = vpop.permute.xlu2 %2005 }
0x20e4   :  { %v2008_v41 = vmul.f32 %v2006_v36, %v2416_v34 }
0x20ec   :  { %v2016_v46 = vpop.permute.xlu2 %2015 }
0x20ed   :  { %v2018_v48 = vmul.f32 %v2016_v46, %v2422_v42 }
0x20fb   :  { %v2001_v50 = vpop.permute.xlu1 %2000 }
0x20fc   :  { %v1996_v37 = vpop.permute.xlu0 %1995  ;;  %v2003_v39 = vmul.f32 %v2001_v50, %v2410_v31 }
0x20fd   :  { %v1998_v53 = vmul.f32 %v1996_v37, %v2414_v33 }
0x20ff   :  { %v2019_v45 = vadd.f32 %v2003_v39, %v1998_v53 }
0x2104   :  { %v2011_v43 = vpop.permute.xlu1 %2010 }
0x2105   :  { %v2013_v44 = vmul.f32 %v2011_v43, %v2412_v32 }
0x2107   :  { %v2020_v47 = vadd.f32 %v2013_v44, %v2008_v41 }
0x2109   :  { %v2021_v52 = vadd.f32 %v2020_v47, %v2019_v45 }
0x210b   :  { %v2022_v51 = vadd.f32 %v2021_v52, %v2018_v48 }
0x210d   :  { %v2023_v0 = vperm.slane %v2022_v51, 0  ;;  %v2025_v54 = vperm.slane %v2022_v51, 1  ;;  %v2027_v60 = vperm.slane %v2022_v51, 2 }
0x210f   :  { %v2024_v58 = vmul.f32 %v2023_v0, %v2387_v8  ;;  %v2026_v55 = vmul.f32 %v2025_v54, %v2397_v16  ;;  %v2028_v2 = vmul.f32 %v2027_v60, %v2395_v15 }
0x2111   :  { %v2029_v56 = vadd.f32 %v2024_v58, %v2425_v49  ;;  %v2030_v57 = vadd.f32 %v2028_v2, %v2026_v55 }
0x2113   :  { %v2031_v59 = vadd.f32 %v2030_v57, %v2029_v56 }
0x2115   :  { %v2032_v14 = vmul.f32 0.125, %v2031_v59 }
0x2117   :  { %v2033_v62 = vadd.f32 %v2032_v14, %v3114_v29 }
0x2119   :  { %2041 = vperm.xlu1 %2314, %v2033_v62   ;;  %2036 = vperm.xlu0 %2309, %v2033_v62  }
0x2121   :  { %2317 = vset.pattern.permute.xlu1 %v2351_v1  ;;  %2316 = vset.pattern.permute.xlu0 %v2352_v4 }
0x218b   :  { %v2042_v61 = vpop.permute.xlu1 %2041  ;;  %v2037_v63 = vpop.permute.xlu0 %2036 }
0x218c   :  { %v2044_v12 = vmul.f32 %v2042_v61, %v2391_v10  ;;  %v2039_v6 = vmul.f32 %v2037_v63, %v2389_v9 }
0x218e   :  { %v2045_v7 = vadd.f32 %v2044_v12, %v2039_v6 }
0x2190   :  { %v2046_v11 = vperm.slane %v2045_v7, 0  ;;  %v2048_v13 = vperm.slane %v2045_v7, 1  ;;  %v2050_v19 = vperm.slane %v2045_v7, 2 }
0x2192   :  { %v2047_v18 = vmul.f32 %v2046_v11, %v2387_v8  ;;  %v2049_v20 = vmul.f32 %v2048_v13, %v2397_v16  ;;  %v2051_v22 = vmul.f32 %v2050_v19, %v2395_v15 }
0x2194   :  { %v2052_v1 = vadd.f32 %v2047_v18, %v2399_v17  ;;  %v2053_v21 = vadd.f32 %v2051_v22, %v2049_v20 }
0x2196   :  { %v2054_v4 = vadd.f32 %v2053_v21, %v2052_v1 }
0x2198   :  { %v2055_v23 = vmax.f32 %v2054_v4, 0.0 }
0x219a   :  { %2068 = vperm.xlu1 %2317, %v2055_v23   ;;  %2063 = vperm.xlu0 %2316, %v2055_v23  }
0x219b   :  { %2058 = vperm.xlu2 %2315, %v2055_v23  }
0x21a2   :  { %2319 = vset.pattern.permute.xlu1 %v2354_v28  ;;  %2320 = vset.pattern.permute.xlu0 %v2354_v28 }
0x21a3   :  { %2318 = vset.pattern.permute.xlu2 %v2353_v5  ;;  %2078 = vperm.xlu1 %2319, %v2055_v23  }
0x21a4   :  { %2073 = vperm.xlu2 %2318, %v2055_v23  }
0x21f5   :  { %v2059_v9 = vpop.permute.xlu2 %2058 }
0x21f6   :  { %v2061_v30 = vmul.f32 %v2059_v9, %v2414_v33  ;;  %v2096_v33 = vadd.f32 %v2031_v59, %v3165_v3 }
0x21f8   :  { %v2097_v46 = vmul.f32 2.0, %v2096_v33 }
0x21fe   :  { %v2074_v27 = vpop.permute.xlu2 %2073 }
0x21ff   :  { %v2076_v40 = vmul.f32 %v2074_v27, %v2412_v32 }
0x220c   :  { %v2069_v10 = vpop.permute.xlu1 %2068  ;;  %v2064_v24 = vpop.permute.xlu0 %2063 }
0x220d   :  { %v2071_v17 = vmul.f32 %v2069_v10, %v2416_v34  ;;  %v2066_v26 = vmul.f32 %v2064_v24, %v2410_v31 }
0x220f   :  { %v2083_v38 = vadd.f32 %v2076_v40, %v2071_v17  ;;  %v2082_v35 = vadd.f32 %v2066_v26, %v2061_v30 }
0x2211   :  { %v2084_v5 = vadd.f32 %v2083_v38, %v2082_v35 }
0x2215   :  { %v2079_v50 = vpop.permute.xlu1 %2078 }
0x2216   :  { %v2081_v28 = vmul.f32 %v2079_v50, %v2422_v42 }
0x2218   :  { %v2085_v36 = vadd.f32 %v2084_v5, %v2081_v28 }
0x221a   :  { %v2086_v37 = vperm.slane %v2085_v36, 0  ;;  %v2088_v39 = vperm.slane %v2085_v36, 1  ;;  %v2090_v53 = vperm.slane %v2085_v36, 2 }
0x221c   :  { %v2087_v43 = vmul.f32 %v2086_v37, %v2387_v8  ;;  %v2089_v34 = vmul.f32 %v2088_v39, %v2397_v16  ;;  %v2091_v31 = vmul.f32 %v2090_v53, %v2395_v15 }
0x221e   :  { %v2092_v32 = vadd.f32 %v2087_v43, %v2425_v49  ;;  %v2093_v41 = vadd.f32 %v2091_v31, %v2089_v34 }
0x2220   :  { %v2094_v44 = vadd.f32 %v2093_v41, %v2092_v32 }
0x2222   :  { %v2095_v42 = vadd.f32 %v2094_v44, %v3139_v25 }
0x2224   :  { %v2098_v45 = vadd.f32 %v2097_v46, %v2095_v42 }
0x2226   :  { %v2099_v47 = vmul.f32 0.020833334, %v2098_v45 }
0x2228   :  { %v2100_v48 = vadd.f32 %v2099_v47, %v3114_v29 }
0x222a   :  { %2101 = vst [vmem:[%s3219_s2] sm:$0xff] %v2100_v48 }
0x222b   :  { %2106 = vsyncpa [#allocation3], 1 }

</bundles_post_ra>
